<compile_context>
chip_gen: v7x
topology: tpu7x:2x2x1
jax: 0.10.0
libtpu: 0.0.40
codegen_flags: <defaults>
</compile_context>

<pallas_src>
import functools
import inspect
import math

import jax
import jax.numpy as jnp
from jax import lax
from jax.experimental import pallas as pl
from jax.experimental.pallas import tpu as pltpu


# --------------------------------------------------------------------------- #
# Kernel
# --------------------------------------------------------------------------- #
def attention_kernel(x_ref, wqkv_ref, wproj_ref, bias_ref, o_ref, acc_ref, *,
                     num_heads, seq_len, compute_dtype, approx_reciprocal):
    """One grid step: a (bt*N, C_pad) row tile of the flattened activations.

    x_ref    : (R, C_pad)            activations, compute_dtype (R = bt * N)
    wqkv_ref : (3H, C_pad, hd_pad)   per-head Q/K/V weights (scale folded into Q)
    wproj_ref: (H, hd_pad, C_pad)    per-head rows of the output projection
    bias_ref : (1, C_pad)            output-projection bias (f32)
    o_ref    : (R, C_pad)            output tile
    acc_ref  : (R, C_pad) f32        VMEM accumulator for the output projection
    """
    R = x_ref.shape[0]
    N = seq_len
    bt = R // N
    H = num_heads
    HD = wproj_ref.shape[1]          # padded head dim (multiple of 128)

    acc_ref[...] = jnp.zeros_like(acc_ref)

    def head_body(h, carry):
        # Read x inside the body: bounds the live range per iteration and
        # streams the MXU operand straight from VMEM (3 vld slots/cycle).
        x = x_ref[...]                                           # (R, C_pad)

        # Per-head Q/K/V projections: lane-dense (R,C_pad)@(C_pad,HD) matmuls.
        # 1/sqrt(head_dim) is pre-folded into the Q weights in the wrapper.
        qh = jnp.dot(x, wqkv_ref[h], preferred_element_type=jnp.float32)
        kh = jnp.dot(x, wqkv_ref[H + h], preferred_element_type=jnp.float32)
        vh = jnp.dot(x, wqkv_ref[2 * H + h], preferred_element_type=jnp.float32)
        qh = qh.reshape(bt, N, HD).astype(compute_dtype)
        kh = kh.reshape(bt, N, HD).astype(compute_dtype)
        vh = vh.reshape(bt, N, HD).astype(compute_dtype)

        # Scores: contract head_dim of BOTH operands -> no k transpose / XLU.
        s = jnp.einsum('bnd,bmd->bnm', qh, kh,
                       preferred_element_type=jnp.float32)       # (bt, N, N)

        # Numerically stable softmax, kept in f32 (v5e has no bf16 VPU/EUP).
        s = s - jnp.max(s, axis=-1, keepdims=True)
        p = jnp.exp(s)
        denom = jnp.sum(p, axis=-1, keepdims=True)
        if approx_reciprocal:
            p = p * pl.reciprocal(denom, approx=True)            # EUP slot
        else:
            p = p / denom

        ctx = jnp.einsum('bnm,bmd->bnd', p.astype(compute_dtype), vh,
                         preferred_element_type=jnp.float32)     # (bt, N, HD)

        # Accumulate this head's slice of the output projection directly:
        # no ctx slab, no narrow masked stores -- one lane-dense (R,C_pad) add.
        acc_ref[...] += jnp.dot(ctx.reshape(R, HD).astype(compute_dtype),
                                wproj_ref[h],
                                preferred_element_type=jnp.float32)
        return carry

    lax.fori_loop(0, H, head_body, 0, unroll=True)

    o_ref[...] = (acc_ref[...] + bias_ref[...]).astype(o_ref.dtype)


# --------------------------------------------------------------------------- #
# Wrapper helpers
# --------------------------------------------------------------------------- #
def _round_up(v, m):
    return ((v + m - 1) // m) * m


def _supports_single_buffered_weights():
    """Explicit capability check (replaces the old broad try/except fallback):
    only use pipeline_mode=pl.Buffered(1) if this jax exposes the API."""
    if not hasattr(pl, "Buffered"):
        return False
    try:
        params = inspect.signature(pl.BlockSpec).parameters
    except (TypeError, ValueError):
        return False
    return "pipeline_mode" in params


_HAS_WEIGHT_SINGLE_BUFFERING = _supports_single_buffered_weights()


def _vmem_limit_bytes():
    """Generation-aware VMEM limit: v5e/v6e have 128 MiB physical, v7x 64 MiB."""
    phys = 64 * 1024 * 1024          # conservative default (v7x is the smallest)
    try:                              # capability probe only; never masks kernel errors
        info = pltpu.get_tpu_info()
        phys = int(getattr(info, "vmem_capacity_bytes", phys))
    except Exception:
        pass
    if phys >= 128 * 1024 * 1024:
        return 96 * 1024 * 1024       # v5e / v6e
    return 48 * 1024 * 1024           # v7x


def _choose_bt(batch, seq, rows_cap):
    """Largest batch tile (divisor of `batch`) with bt*seq <= rows_cap, preferring
    8-aligned row counts (sublane constraint) and >= 2 (ideally >= 4) grid steps
    so both v7x TensorCores get work and the pipeline has depth."""
    cap = max(1, rows_cap // max(seq, 1))
    divisors = [d for d in range(min(batch, cap), 0, -1) if batch % d == 0]
    if not divisors:
        divisors = [1]

    def aligned(d):
        return (d * seq) % 8 == 0 or d == batch   # block == full array is legal

    for min_steps in (4, 2, 1):
        need = min(min_steps, batch)
        for d in divisors:
            if aligned(d) and batch // d >= need:
                return d
    return batch


# --------------------------------------------------------------------------- #
# Public entry point
# --------------------------------------------------------------------------- #
def attention_pallas(x, wqkv_t, wproj_t, bproj, *, num_heads,
                     compute_dtype=jnp.float32, out_dtype=None,
                     target_rows=2048, approx_reciprocal=True):
    """x: (B, N, C); wqkv_t: (C, 3C); wproj_t: (C, C); bproj: (C,).

    compute_dtype: MXU operand dtype (f32 everywhere is the v5e-safe default;
    bf16 is the fast path on v6e/v7x).  Softmax / accumulation stay f32.
    """
    x = jnp.asarray(x)
    wqkv_t = jnp.asarray(wqkv_t)
    wproj_t = jnp.asarray(wproj_t)
    bproj = jnp.asarray(bproj)

    B, N, C = x.shape
    H = num_heads
    assert C % H == 0, "dim must be divisible by num_heads"
    hd = C // H
    scale = hd ** (-0.5)
    out_dtype = compute_dtype if out_dtype is None else out_dtype

    C_pad = _round_up(C, 128)
    hd_pad = _round_up(hd, 128)

    # ---- weights: fold scale into Q, lane-pad head_dim & C, heads on a
    #      leading axis so the kernel indexes them on the (cheap) leading dim.
    w3 = wqkv_t.reshape(C, 3, H, hd)
    w3 = w3.at[:, 0].multiply(scale)                       # fold softmax scale into Q
    w3 = jnp.pad(w3, ((0, C_pad - C), (0, 0), (0, 0), (0, hd_pad - hd)))
    wqkv_p = jnp.transpose(w3, (1, 2, 0, 3)).reshape(3 * H, C_pad, hd_pad)
    wqkv_p = wqkv_p.astype(compute_dtype)                  # (3H, C_pad, hd_pad)

    wp = wproj_t.reshape(H, hd, C)
    wp = jnp.pad(wp, ((0, 0), (0, hd_pad - hd), (0, C_pad - C)))
    wproj_p = wp.astype(compute_dtype)                     # (H, hd_pad, C_pad)

    bproj_p = jnp.pad(bproj, (0, C_pad - C)).reshape(1, C_pad).astype(jnp.float32)

    # ---- activations: row-flattened, lane-padded, compute dtype at HBM
    #      boundary (bf16 halves activation DMA on v6e/v7x). Zero lanes are
    #      layout plumbing; they drop out exactly (zero weight rows/cols).
    x2 = jnp.pad(x.reshape(B * N, C).astype(compute_dtype),
                 ((0, 0), (0, C_pad - C)))                 # (B*N, C_pad)

    # ---- tile selection under an explicit, generation-aware VMEM budget ----
    budget = _vmem_limit_bytes()
    in_bytes = jnp.dtype(compute_dtype).itemsize
    out_bytes = jnp.dtype(out_dtype).itemsize
    weight_bufs = 1 if _HAS_WEIGHT_SINGLE_BUFFERING else 2
    weight_bytes = weight_bufs * (4 * H * C_pad * hd_pad * in_bytes + C_pad * 4)
    # per row: double-buffered x/out DMA tiles + f32 accumulator + per-head
    # q/k/v/ctx temporaries + f32 score/prob rows.
    per_row = (C_pad * (2 * in_bytes + 2 * out_bytes + 4)
               + hd_pad * (4 * 4 + 4 * in_bytes)
               + 8 * N)
    slack = 6 * 1024 * 1024                                # compiler-internal scratch
    max_rows = max(N, int((budget - weight_bytes - slack) // per_row))
    rows_cap = int(min(target_rows, max_rows))
    bt = _choose_bt(B, N, rows_cap)
    grid = (B // bt,)

    kernel = functools.partial(
        attention_kernel, num_heads=H, seq_len=N,
        compute_dtype=compute_dtype, approx_reciprocal=approx_reciprocal)

    def _const_spec(shape):
        index_map = lambda i, _n=len(shape): (0,) * _n
        if _HAS_WEIGHT_SINGLE_BUFFERING:
            # Grid-invariant weights: a single VMEM buffer each -> more
            # headroom for big activation row tiles.
            return pl.BlockSpec(shape, index_map, pipeline_mode=pl.Buffered(1))
        return pl.BlockSpec(shape, index_map)

    out2 = pl.pallas_call(
        kernel,
        out_shape=jax.ShapeDtypeStruct((B * N, C_pad), out_dtype),
        grid_spec=pltpu.PrefetchScalarGridSpec(
            num_scalar_prefetch=0,
            grid=grid,
            in_specs=[
                pl.BlockSpec((bt * N, C_pad), lambda i: (i, 0)),   # activations
                _const_spec((3 * H, C_pad, hd_pad)),               # Wqkv (scaled Q)
                _const_spec((H, hd_pad, C_pad)),                   # Wproj
                _const_spec((1, C_pad)),                           # proj bias
            ],
            out_specs=pl.BlockSpec((bt * N, C_pad), lambda i: (i, 0)),
            scratch_shapes=[pltpu.VMEM((bt * N, C_pad), jnp.float32)],
        ),
        compiler_params=pltpu.CompilerParams(
            dimension_semantics=("parallel",),
            vmem_limit_bytes=int(budget),
        ),
    )(x2, wqkv_p, wproj_p, bproj_p)

    return out2[:, :C].reshape(B, N, C)


# --------------------------------------------------------------------------- #
# Pure-JAX reference (transcription of the PyTorch forward) + self-test
# --------------------------------------------------------------------------- #
def attention_reference(x, wqkv_t, wproj_t, bproj, *, num_heads):
    B, N, C = x.shape
    hd = C // num_heads
    qkv = x @ wqkv_t                                             # (B, N, 3C)
    qkv = qkv.reshape(B, N, 3, num_heads, hd).transpose(2, 0, 3, 1, 4)
    q, k, v = qkv[0], qkv[1], qkv[2]                             # (B, H, N, hd)
    attn = (q @ jnp.swapaxes(k, -2, -1)) * (hd ** (-0.5))        # (B, H, N, N)
    attn = jax.nn.softmax(attn, axis=-1)
    out = jnp.swapaxes(attn @ v, 1, 2).reshape(B, N, C)
    return out @ wproj_t + bproj


if __name__ == "__main__":
    B, N, C = 2, 8, 32
    NUM_HEADS = 8

    key = jax.random.PRNGKey(0)
    kx, kqkv, kproj, kb = jax.random.split(key, 4)

    x = jax.random.normal(kx, (B, N, C), dtype=jnp.float32)

    # nn.Linear(dim, 3*dim, bias=False) / nn.Linear(dim, dim) parameters,
    # stored pre-transposed for y = x @ W^T.
    bound = 1.0 / math.sqrt(C)
    wqkv_t = jax.random.uniform(kqkv, (C, 3 * C), jnp.float32, -bound, bound)
    wproj_t = jax.random.uniform(kproj, (C, C), jnp.float32, -bound, bound)
    bproj = jax.random.uniform(kb, (C,), jnp.float32, -bound, bound)

    ref = attention_reference(x, wqkv_t, wproj_t, bproj, num_heads=NUM_HEADS)

    # f32 MXU operands: tight check against the module-equivalent reference.
    out_f32 = attention_pallas(x, wqkv_t, wproj_t, bproj,
                               num_heads=NUM_HEADS, compute_dtype=jnp.float32)
    out_f32 = jax.block_until_ready(out_f32)
    err_f32 = float(jnp.max(jnp.abs(out_f32 - ref)))
    assert jnp.allclose(out_f32, ref, atol=5e-3, rtol=5e-3), \
        f"f32 path max abs err = {err_f32}"

    # bf16 MXU operands + bf16 HBM boundary (v6e/v7x fast path); softmax and
    # accumulation stay f32 in-kernel.
    out_bf16 = attention_pallas(x, wqkv_t, wproj_t, bproj,
                                num_heads=NUM_HEADS, compute_dtype=jnp.bfloat16)
    out_bf16 = jax.block_until_ready(out_bf16).astype(jnp.float32)
    err_bf16 = float(jnp.max(jnp.abs(out_bf16 - ref)))
    assert jnp.allclose(out_bf16, ref, atol=5e-2, rtol=5e-2), \
        f"bf16 path max abs err = {err_bf16}"

    print("KERNEL_OK")
</pallas_src>

<mosaic_0001>
module attributes {stable_mosaic.version = 11 : i64} {
  func.func @attention_kernel(%arg0: i32, %arg1: memref<8x128xf32, #tpu.memory_space<vmem>>, %arg2: memref<24x128x128xf32, #tpu.memory_space<vmem>>, %arg3: memref<8x128x128xf32, #tpu.memory_space<vmem>>, %arg4: memref<1x128xf32, #tpu.memory_space<vmem>>, %arg5: memref<8x128xf32, #tpu.memory_space<vmem>>, %arg6: memref<8x128xf32, #tpu.memory_space<vmem>>) attributes {dimension_semantics = [#tpu.dimension_semantics<parallel>], iteration_bounds = array<i64: 2>, scalar_prefetch = 0 : i64, scratch_operands = 1 : i64, tpu.core_type = #tpu.core_type<tc>, window_params = [{transform_indices = @transform_0, window_bounds = array<i64: 8, 128>}, {pipeline_mode = #tpu.pipeline_mode<synchronous>, transform_indices = @transform_1, window_bounds = array<i64: 24, 128, 128>}, {pipeline_mode = #tpu.pipeline_mode<synchronous>, transform_indices = @transform_2, window_bounds = array<i64: 8, 128, 128>}, {pipeline_mode = #tpu.pipeline_mode<synchronous>, transform_indices = @transform_3, window_bounds = array<i64: 1, 128>}, {transform_indices = @transform_4, window_bounds = array<i64: 8, 128>}]} {
    %cst = arith.constant 0.000000e+00 : f32
    %0 = vector.broadcast %cst : f32 to vector<8x128xf32>
    %c0 = arith.constant 0 : index
    %c0_0 = arith.constant 0 : index
    %1 = vector.load %arg6[%c0, %c0_0] : memref<8x128xf32, #tpu.memory_space<vmem>>, vector<8x128xf32>
    tpu.vector_store %arg6[%c0, %c0_0], %0 {strides = array<i32>} : memref<8x128xf32, #tpu.memory_space<vmem>>, vector<8x128xf32>,
    %c0_i32 = arith.constant 0 : i32
    %c0_1 = arith.constant 0 : index
    %c0_2 = arith.constant 0 : index
    %2 = vector.load %arg1[%c0_1, %c0_2] : memref<8x128xf32, #tpu.memory_space<vmem>>, vector<8x128xf32>
    %3 = arith.index_cast %c0_i32 : i32 to index
    %c0_3 = arith.constant 0 : index
    %c0_4 = arith.constant 0 : index
    %4 = vector.load %arg2[%3, %c0_3, %c0_4] : memref<24x128x128xf32, #tpu.memory_space<vmem>>, vector<1x128x128xf32>
    %5 = vector.shape_cast %4 : vector<1x128x128xf32> to vector<128x128xf32>
    %cst_5 = arith.constant dense<0.000000e+00> : vector<8x128xf32>
    %6 = tpu.matmul %2, %5, %cst_5 {dimension_numbers = #tpu.dot_dimension_numbers<[1], [0], [0], [1], [0, 0, 1, 1], [], []>} : vector<8x128xf32>, vector<128x128xf32>, vector<8x128xf32> -> vector<8x128xf32>
    %c8_i32 = arith.constant 8 : i32
    %7 = arith.addi %c8_i32, %c0_i32 : i32
    %8 = arith.index_cast %7 : i32 to index
    %c0_6 = arith.constant 0 : index
    %c0_7 = arith.constant 0 : index
    %9 = vector.load %arg2[%8, %c0_6, %c0_7] : memref<24x128x128xf32, #tpu.memory_space<vmem>>, vector<1x128x128xf32>
    %10 = vector.shape_cast %9 : vector<1x128x128xf32> to vector<128x128xf32>
    %cst_8 = arith.constant dense<0.000000e+00> : vector<8x128xf32>
    %11 = tpu.matmul %2, %10, %cst_8 {dimension_numbers = #tpu.dot_dimension_numbers<[1], [0], [0], [1], [0, 0, 1, 1], [], []>} : vector<8x128xf32>, vector<128x128xf32>, vector<8x128xf32> -> vector<8x128xf32>
    %c16_i32 = arith.constant 16 : i32
    %12 = arith.addi %c16_i32, %c0_i32 : i32
    %13 = arith.index_cast %12 : i32 to index
    %c0_9 = arith.constant 0 : index
    %c0_10 = arith.constant 0 : index
    %14 = vector.load %arg2[%13, %c0_9, %c0_10] : memref<24x128x128xf32, #tpu.memory_space<vmem>>, vector<1x128x128xf32>
    %15 = vector.shape_cast %14 : vector<1x128x128xf32> to vector<128x128xf32>
    %cst_11 = arith.constant dense<0.000000e+00> : vector<8x128xf32>
    %16 = tpu.matmul %2, %15, %cst_11 {dimension_numbers = #tpu.dot_dimension_numbers<[1], [0], [0], [1], [0, 0, 1, 1], [], []>} : vector<8x128xf32>, vector<128x128xf32>, vector<8x128xf32> -> vector<8x128xf32>
    %17 = vector.shape_cast %6 : vector<8x128xf32> to vector<1x8x128xf32>
    %18 = vector.shape_cast %11 : vector<8x128xf32> to vector<1x8x128xf32>
    %19 = vector.shape_cast %16 : vector<8x128xf32> to vector<1x8x128xf32>
    "tpu.trace_start"() <{level = 10 : i32, message = "bnd,bmd->bnm"}> : () -> ()
    %cst_12 = arith.constant dense<0.000000e+00> : vector<1x8x8xf32>
    %20 = tpu.matmul %17, %18, %cst_12 {dimension_numbers = #tpu.dot_dimension_numbers<[2], [2], [1], [1], [0, 0, 0, 1, 1, 1], [0], [0]>} : vector<1x8x128xf32>, vector<1x8x128xf32>, vector<1x8x8xf32> -> vector<1x8x8xf32>
    "tpu.trace_stop"() : () -> ()
    %cst_13 = arith.constant dense<0xFF800000> : vector<1x8xf32>
    %21 = vector.multi_reduction <maximumf>, %20, %cst_13 [2] : vector<1x8x8xf32> to vector<1x8xf32>
    %22 = vector.shape_cast %21 : vector<1x8xf32> to vector<1x8x1xf32>
    %23 = vector.broadcast %22 : vector<1x8x1xf32> to vector<1x8x8xf32>
    %24 = arith.subf %20, %23 : vector<1x8x8xf32>
    %25 = math.exp %24 : vector<1x8x8xf32>
    %cst_14 = arith.constant dense<0.000000e+00> : vector<1x8xf32>
    %26 = vector.multi_reduction <add>, %25, %cst_14 [2] : vector<1x8x8xf32> to vector<1x8xf32>
    %27 = vector.shape_cast %26 : vector<1x8xf32> to vector<1x8x1xf32>
    %28 = tpu.reciprocal %27 {approx = true} : vector<1x8x1xf32> -> vector<1x8x1xf32>
    %29 = vector.broadcast %28 : vector<1x8x1xf32> to vector<1x8x8xf32>
    %30 = arith.mulf %25, %29 : vector<1x8x8xf32>
    "tpu.trace_start"() <{level = 10 : i32, message = "bnm,bmd->bnd"}> : () -> ()
    %cst_15 = arith.constant dense<0.000000e+00> : vector<1x8x128xf32>
    %31 = tpu.matmul %30, %19, %cst_15 {dimension_numbers = #tpu.dot_dimension_numbers<[2], [1], [1], [2], [0, 0, 0, 1, 1, 2], [0], [0]>} : vector<1x8x8xf32>, vector<1x8x128xf32>, vector<1x8x128xf32> -> vector<1x8x128xf32>
    "tpu.trace_stop"() : () -> ()
    %c0_16 = arith.constant 0 : index
    %c0_17 = arith.constant 0 : index
    %32 = vector.load %arg6[%c0_16, %c0_17] : memref<8x128xf32, #tpu.memory_space<vmem>>, vector<8x128xf32>
    %33 = vector.shape_cast %31 : vector<1x8x128xf32> to vector<8x128xf32>
    %34 = arith.index_cast %c0_i32 : i32 to index
    %c0_18 = arith.constant 0 : index
    %c0_19 = arith.constant 0 : index
    %35 = vector.load %arg3[%34, %c0_18, %c0_19] : memref<8x128x128xf32, #tpu.memory_space<vmem>>, vector<1x128x128xf32>
    %36 = vector.shape_cast %35 : vector<1x128x128xf32> to vector<128x128xf32>
    %cst_20 = arith.constant dense<0.000000e+00> : vector<8x128xf32>
    %37 = tpu.matmul %33, %36, %cst_20 {dimension_numbers = #tpu.dot_dimension_numbers<[1], [0], [0], [1], [0, 0, 1, 1], [], []>} : vector<8x128xf32>, vector<128x128xf32>, vector<8x128xf32> -> vector<8x128xf32>
    %38 = arith.addf %32, %37 : vector<8x128xf32>
    %c0_21 = arith.constant 0 : index
    %c0_22 = arith.constant 0 : index
    %39 = vector.load %arg6[%c0_21, %c0_22] : memref<8x128xf32, #tpu.memory_space<vmem>>, vector<8x128xf32>
    tpu.vector_store %arg6[%c0_21, %c0_22], %38 {strides = array<i32>} : memref<8x128xf32, #tpu.memory_space<vmem>>, vector<8x128xf32>,
    %c1_i32 = arith.constant 1 : i32
    %c0_23 = arith.constant 0 : index
    %c0_24 = arith.constant 0 : index
    %40 = vector.load %arg1[%c0_23, %c0_24] : memref<8x128xf32, #tpu.memory_space<vmem>>, vector<8x128xf32>
    %41 = arith.index_cast %c1_i32 : i32 to index
    %c0_25 = arith.constant 0 : index
    %c0_26 = arith.constant 0 : index
    %42 = vector.load %arg2[%41, %c0_25, %c0_26] : memref<24x128x128xf32, #tpu.memory_space<vmem>>, vector<1x128x128xf32>
    %43 = vector.shape_cast %42 : vector<1x128x128xf32> to vector<128x128xf32>
    %cst_27 = arith.constant dense<0.000000e+00> : vector<8x128xf32>
    %44 = tpu.matmul %40, %43, %cst_27 {dimension_numbers = #tpu.dot_dimension_numbers<[1], [0], [0], [1], [0, 0, 1, 1], [], []>} : vector<8x128xf32>, vector<128x128xf32>, vector<8x128xf32> -> vector<8x128xf32>
    %c8_i32_28 = arith.constant 8 : i32
    %45 = arith.addi %c8_i32_28, %c1_i32 : i32
    %46 = arith.index_cast %45 : i32 to index
    %c0_29 = arith.constant 0 : index
    %c0_30 = arith.constant 0 : index
    %47 = vector.load %arg2[%46, %c0_29, %c0_30] : memref<24x128x128xf32, #tpu.memory_space<vmem>>, vector<1x128x128xf32>
    %48 = vector.shape_cast %47 : vector<1x128x128xf32> to vector<128x128xf32>
    %cst_31 = arith.constant dense<0.000000e+00> : vector<8x128xf32>
    %49 = tpu.matmul %40, %48, %cst_31 {dimension_numbers = #tpu.dot_dimension_numbers<[1], [0], [0], [1], [0, 0, 1, 1], [], []>} : vector<8x128xf32>, vector<128x128xf32>, vector<8x128xf32> -> vector<8x128xf32>
    %c16_i32_32 = arith.constant 16 : i32
    %50 = arith.addi %c16_i32_32, %c1_i32 : i32
    %51 = arith.index_cast %50 : i32 to index
    %c0_33 = arith.constant 0 : index
    %c0_34 = arith.constant 0 : index
    %52 = vector.load %arg2[%51, %c0_33, %c0_34] : memref<24x128x128xf32, #tpu.memory_space<vmem>>, vector<1x128x128xf32>
    %53 = vector.shape_cast %52 : vector<1x128x128xf32> to vector<128x128xf32>
    %cst_35 = arith.constant dense<0.000000e+00> : vector<8x128xf32>
    %54 = tpu.matmul %40, %53, %cst_35 {dimension_numbers = #tpu.dot_dimension_numbers<[1], [0], [0], [1], [0, 0, 1, 1], [], []>} : vector<8x128xf32>, vector<128x128xf32>, vector<8x128xf32> -> vector<8x128xf32>
    %55 = vector.shape_cast %44 : vector<8x128xf32> to vector<1x8x128xf32>
    %56 = vector.shape_cast %49 : vector<8x128xf32> to vector<1x8x128xf32>
    %57 = vector.shape_cast %54 : vector<8x128xf32> to vector<1x8x128xf32>
    "tpu.trace_start"() <{level = 10 : i32, message = "bnd,bmd->bnm"}> : () -> ()
    %cst_36 = arith.constant dense<0.000000e+00> : vector<1x8x8xf32>
    %58 = tpu.matmul %55, %56, %cst_36 {dimension_numbers = #tpu.dot_dimension_numbers<[2], [2], [1], [1], [0, 0, 0, 1, 1, 1], [0], [0]>} : vector<1x8x128xf32>, vector<1x8x128xf32>, vector<1x8x8xf32> -> vector<1x8x8xf32>
    "tpu.trace_stop"() : () -> ()
    %cst_37 = arith.constant dense<0xFF800000> : vector<1x8xf32>
    %59 = vector.multi_reduction <maximumf>, %58, %cst_37 [2] : vector<1x8x8xf32> to vector<1x8xf32>
    %60 = vector.shape_cast %59 : vector<1x8xf32> to vector<1x8x1xf32>
    %61 = vector.broadcast %60 : vector<1x8x1xf32> to vector<1x8x8xf32>
    %62 = arith.subf %58, %61 : vector<1x8x8xf32>
    %63 = math.exp %62 : vector<1x8x8xf32>
    %cst_38 = arith.constant dense<0.000000e+00> : vector<1x8xf32>
    %64 = vector.multi_reduction <add>, %63, %cst_38 [2] : vector<1x8x8xf32> to vector<1x8xf32>
    %65 = vector.shape_cast %64 : vector<1x8xf32> to vector<1x8x1xf32>
    %66 = tpu.reciprocal %65 {approx = true} : vector<1x8x1xf32> -> vector<1x8x1xf32>
    %67 = vector.broadcast %66 : vector<1x8x1xf32> to vector<1x8x8xf32>
    %68 = arith.mulf %63, %67 : vector<1x8x8xf32>
    "tpu.trace_start"() <{level = 10 : i32, message = "bnm,bmd->bnd"}> : () -> ()
    %cst_39 = arith.constant dense<0.000000e+00> : vector<1x8x128xf32>
    %69 = tpu.matmul %68, %57, %cst_39 {dimension_numbers = #tpu.dot_dimension_numbers<[2], [1], [1], [2], [0, 0, 0, 1, 1, 2], [0], [0]>} : vector<1x8x8xf32>, vector<1x8x128xf32>, vector<1x8x128xf32> -> vector<1x8x128xf32>
    "tpu.trace_stop"() : () -> ()
    %c0_40 = arith.constant 0 : index
    %c0_41 = arith.constant 0 : index
    %70 = vector.load %arg6[%c0_40, %c0_41] : memref<8x128xf32, #tpu.memory_space<vmem>>, vector<8x128xf32>
    %71 = vector.shape_cast %69 : vector<1x8x128xf32> to vector<8x128xf32>
    %72 = arith.index_cast %c1_i32 : i32 to index
    %c0_42 = arith.constant 0 : index
    %c0_43 = arith.constant 0 : index
    %73 = vector.load %arg3[%72, %c0_42, %c0_43] : memref<8x128x128xf32, #tpu.memory_space<vmem>>, vector<1x128x128xf32>
    %74 = vector.shape_cast %73 : vector<1x128x128xf32> to vector<128x128xf32>
    %cst_44 = arith.constant dense<0.000000e+00> : vector<8x128xf32>
    %75 = tpu.matmul %71, %74, %cst_44 {dimension_numbers = #tpu.dot_dimension_numbers<[1], [0], [0], [1], [0, 0, 1, 1], [], []>} : vector<8x128xf32>, vector<128x128xf32>, vector<8x128xf32> -> vector<8x128xf32>
    %76 = arith.addf %70, %75 : vector<8x128xf32>
    %c0_45 = arith.constant 0 : index
    %c0_46 = arith.constant 0 : index
    %77 = vector.load %arg6[%c0_45, %c0_46] : memref<8x128xf32, #tpu.memory_space<vmem>>, vector<8x128xf32>
    tpu.vector_store %arg6[%c0_45, %c0_46], %76 {strides = array<i32>} : memref<8x128xf32, #tpu.memory_space<vmem>>, vector<8x128xf32>,
    %c2_i32 = arith.constant 2 : i32
    %c0_47 = arith.constant 0 : index
    %c0_48 = arith.constant 0 : index
    %78 = vector.load %arg1[%c0_47, %c0_48] : memref<8x128xf32, #tpu.memory_space<vmem>>, vector<8x128xf32>
    %79 = arith.index_cast %c2_i32 : i32 to index
    %c0_49 = arith.constant 0 : index
    %c0_50 = arith.constant 0 : index
    %80 = vector.load %arg2[%79, %c0_49, %c0_50] : memref<24x128x128xf32, #tpu.memory_space<vmem>>, vector<1x128x128xf32>
    %81 = vector.shape_cast %80 : vector<1x128x128xf32> to vector<128x128xf32>
    %cst_51 = arith.constant dense<0.000000e+00> : vector<8x128xf32>
    %82 = tpu.matmul %78, %81, %cst_51 {dimension_numbers = #tpu.dot_dimension_numbers<[1], [0], [0], [1], [0, 0, 1, 1], [], []>} : vector<8x128xf32>, vector<128x128xf32>, vector<8x128xf32> -> vector<8x128xf32>
    %c8_i32_52 = arith.constant 8 : i32
    %83 = arith.addi %c8_i32_52, %c2_i32 : i32
    %84 = arith.index_cast %83 : i32 to index
    %c0_53 = arith.constant 0 : index
    %c0_54 = arith.constant 0 : index
    %85 = vector.load %arg2[%84, %c0_53, %c0_54] : memref<24x128x128xf32, #tpu.memory_space<vmem>>, vector<1x128x128xf32>
    %86 = vector.shape_cast %85 : vector<1x128x128xf32> to vector<128x128xf32>
    %cst_55 = arith.constant dense<0.000000e+00> : vector<8x128xf32>
    %87 = tpu.matmul %78, %86, %cst_55 {dimension_numbers = #tpu.dot_dimension_numbers<[1], [0], [0], [1], [0, 0, 1, 1], [], []>} : vector<8x128xf32>, vector<128x128xf32>, vector<8x128xf32> -> vector<8x128xf32>
    %c16_i32_56 = arith.constant 16 : i32
    %88 = arith.addi %c16_i32_56, %c2_i32 : i32
    %89 = arith.index_cast %88 : i32 to index
    %c0_57 = arith.constant 0 : index
    %c0_58 = arith.constant 0 : index
    %90 = vector.load %arg2[%89, %c0_57, %c0_58] : memref<24x128x128xf32, #tpu.memory_space<vmem>>, vector<1x128x128xf32>
    %91 = vector.shape_cast %90 : vector<1x128x128xf32> to vector<128x128xf32>
    %cst_59 = arith.constant dense<0.000000e+00> : vector<8x128xf32>
    %92 = tpu.matmul %78, %91, %cst_59 {dimension_numbers = #tpu.dot_dimension_numbers<[1], [0], [0], [1], [0, 0, 1, 1], [], []>} : vector<8x128xf32>, vector<128x128xf32>, vector<8x128xf32> -> vector<8x128xf32>
    %93 = vector.shape_cast %82 : vector<8x128xf32> to vector<1x8x128xf32>
    %94 = vector.shape_cast %87 : vector<8x128xf32> to vector<1x8x128xf32>
    %95 = vector.shape_cast %92 : vector<8x128xf32> to vector<1x8x128xf32>
    "tpu.trace_start"() <{level = 10 : i32, message = "bnd,bmd->bnm"}> : () -> ()
    %cst_60 = arith.constant dense<0.000000e+00> : vector<1x8x8xf32>
    %96 = tpu.matmul %93, %94, %cst_60 {dimension_numbers = #tpu.dot_dimension_numbers<[2], [2], [1], [1], [0, 0, 0, 1, 1, 1], [0], [0]>} : vector<1x8x128xf32>, vector<1x8x128xf32>, vector<1x8x8xf32> -> vector<1x8x8xf32>
    "tpu.trace_stop"() : () -> ()
    %cst_61 = arith.constant dense<0xFF800000> : vector<1x8xf32>
    %97 = vector.multi_reduction <maximumf>, %96, %cst_61 [2] : vector<1x8x8xf32> to vector<1x8xf32>
    %98 = vector.shape_cast %97 : vector<1x8xf32> to vector<1x8x1xf32>
    %99 = vector.broadcast %98 : vector<1x8x1xf32> to vector<1x8x8xf32>
    %100 = arith.subf %96, %99 : vector<1x8x8xf32>
    %101 = math.exp %100 : vector<1x8x8xf32>
    %cst_62 = arith.constant dense<0.000000e+00> : vector<1x8xf32>
    %102 = vector.multi_reduction <add>, %101, %cst_62 [2] : vector<1x8x8xf32> to vector<1x8xf32>
    %103 = vector.shape_cast %102 : vector<1x8xf32> to vector<1x8x1xf32>
    %104 = tpu.reciprocal %103 {approx = true} : vector<1x8x1xf32> -> vector<1x8x1xf32>
    %105 = vector.broadcast %104 : vector<1x8x1xf32> to vector<1x8x8xf32>
    %106 = arith.mulf %101, %105 : vector<1x8x8xf32>
    "tpu.trace_start"() <{level = 10 : i32, message = "bnm,bmd->bnd"}> : () -> ()
    %cst_63 = arith.constant dense<0.000000e+00> : vector<1x8x128xf32>
    %107 = tpu.matmul %106, %95, %cst_63 {dimension_numbers = #tpu.dot_dimension_numbers<[2], [1], [1], [2], [0, 0, 0, 1, 1, 2], [0], [0]>} : vector<1x8x8xf32>, vector<1x8x128xf32>, vector<1x8x128xf32> -> vector<1x8x128xf32>
    "tpu.trace_stop"() : () -> ()
    %c0_64 = arith.constant 0 : index
    %c0_65 = arith.constant 0 : index
    %108 = vector.load %arg6[%c0_64, %c0_65] : memref<8x128xf32, #tpu.memory_space<vmem>>, vector<8x128xf32>
    %109 = vector.shape_cast %107 : vector<1x8x128xf32> to vector<8x128xf32>
    %110 = arith.index_cast %c2_i32 : i32 to index
    %c0_66 = arith.constant 0 : index
    %c0_67 = arith.constant 0 : index
    %111 = vector.load %arg3[%110, %c0_66, %c0_67] : memref<8x128x128xf32, #tpu.memory_space<vmem>>, vector<1x128x128xf32>
    %112 = vector.shape_cast %111 : vector<1x128x128xf32> to vector<128x128xf32>
    %cst_68 = arith.constant dense<0.000000e+00> : vector<8x128xf32>
    %113 = tpu.matmul %109, %112, %cst_68 {dimension_numbers = #tpu.dot_dimension_numbers<[1], [0], [0], [1], [0, 0, 1, 1], [], []>} : vector<8x128xf32>, vector<128x128xf32>, vector<8x128xf32> -> vector<8x128xf32>
    %114 = arith.addf %108, %113 : vector<8x128xf32>
    %c0_69 = arith.constant 0 : index
    %c0_70 = arith.constant 0 : index
    %115 = vector.load %arg6[%c0_69, %c0_70] : memref<8x128xf32, #tpu.memory_space<vmem>>, vector<8x128xf32>
    tpu.vector_store %arg6[%c0_69, %c0_70], %114 {strides = array<i32>} : memref<8x128xf32, #tpu.memory_space<vmem>>, vector<8x128xf32>,
    %c3_i32 = arith.constant 3 : i32
    %c0_71 = arith.constant 0 : index
    %c0_72 = arith.constant 0 : index
    %116 = vector.load %arg1[%c0_71, %c0_72] : memref<8x128xf32, #tpu.memory_space<vmem>>, vector<8x128xf32>
    %117 = arith.index_cast %c3_i32 : i32 to index
    %c0_73 = arith.constant 0 : index
    %c0_74 = arith.constant 0 : index
    %118 = vector.load %arg2[%117, %c0_73, %c0_74] : memref<24x128x128xf32, #tpu.memory_space<vmem>>, vector<1x128x128xf32>
    %119 = vector.shape_cast %118 : vector<1x128x128xf32> to vector<128x128xf32>
    %cst_75 = arith.constant dense<0.000000e+00> : vector<8x128xf32>
    %120 = tpu.matmul %116, %119, %cst_75 {dimension_numbers = #tpu.dot_dimension_numbers<[1], [0], [0], [1], [0, 0, 1, 1], [], []>} : vector<8x128xf32>, vector<128x128xf32>, vector<8x128xf32> -> vector<8x128xf32>
    %c8_i32_76 = arith.constant 8 : i32
    %121 = arith.addi %c8_i32_76, %c3_i32 : i32
    %122 = arith.index_cast %121 : i32 to index
    %c0_77 = arith.constant 0 : index
    %c0_78 = arith.constant 0 : index
    %123 = vector.load %arg2[%122, %c0_77, %c0_78] : memref<24x128x128xf32, #tpu.memory_space<vmem>>, vector<1x128x128xf32>
    %124 = vector.shape_cast %123 : vector<1x128x128xf32> to vector<128x128xf32>
    %cst_79 = arith.constant dense<0.000000e+00> : vector<8x128xf32>
    %125 = tpu.matmul %116, %124, %cst_79 {dimension_numbers = #tpu.dot_dimension_numbers<[1], [0], [0], [1], [0, 0, 1, 1], [], []>} : vector<8x128xf32>, vector<128x128xf32>, vector<8x128xf32> -> vector<8x128xf32>
    %c16_i32_80 = arith.constant 16 : i32
    %126 = arith.addi %c16_i32_80, %c3_i32 : i32
    %127 = arith.index_cast %126 : i32 to index
    %c0_81 = arith.constant 0 : index
    %c0_82 = arith.constant 0 : index
    %128 = vector.load %arg2[%127, %c0_81, %c0_82] : memref<24x128x128xf32, #tpu.memory_space<vmem>>, vector<1x128x128xf32>
    %129 = vector.shape_cast %128 : vector<1x128x128xf32> to vector<128x128xf32>
    %cst_83 = arith.constant dense<0.000000e+00> : vector<8x128xf32>
    %130 = tpu.matmul %116, %129, %cst_83 {dimension_numbers = #tpu.dot_dimension_numbers<[1], [0], [0], [1], [0, 0, 1, 1], [], []>} : vector<8x128xf32>, vector<128x128xf32>, vector<8x128xf32> -> vector<8x128xf32>
    %131 = vector.shape_cast %120 : vector<8x128xf32> to vector<1x8x128xf32>
    %132 = vector.shape_cast %125 : vector<8x128xf32> to vector<1x8x128xf32>
    %133 = vector.shape_cast %130 : vector<8x128xf32> to vector<1x8x128xf32>
    "tpu.trace_start"() <{level = 10 : i32, message = "bnd,bmd->bnm"}> : () -> ()
    %cst_84 = arith.constant dense<0.000000e+00> : vector<1x8x8xf32>
    %134 = tpu.matmul %131, %132, %cst_84 {dimension_numbers = #tpu.dot_dimension_numbers<[2], [2], [1], [1], [0, 0, 0, 1, 1, 1], [0], [0]>} : vector<1x8x128xf32>, vector<1x8x128xf32>, vector<1x8x8xf32> -> vector<1x8x8xf32>
    "tpu.trace_stop"() : () -> ()
    %cst_85 = arith.constant dense<0xFF800000> : vector<1x8xf32>
    %135 = vector.multi_reduction <maximumf>, %134, %cst_85 [2] : vector<1x8x8xf32> to vector<1x8xf32>
    %136 = vector.shape_cast %135 : vector<1x8xf32> to vector<1x8x1xf32>
    %137 = vector.broadcast %136 : vector<1x8x1xf32> to vector<1x8x8xf32>
    %138 = arith.subf %134, %137 : vector<1x8x8xf32>
    %139 = math.exp %138 : vector<1x8x8xf32>
    %cst_86 = arith.constant dense<0.000000e+00> : vector<1x8xf32>
    %140 = vector.multi_reduction <add>, %139, %cst_86 [2] : vector<1x8x8xf32> to vector<1x8xf32>
    %141 = vector.shape_cast %140 : vector<1x8xf32> to vector<1x8x1xf32>
    %142 = tpu.reciprocal %141 {approx = true} : vector<1x8x1xf32> -> vector<1x8x1xf32>
    %143 = vector.broadcast %142 : vector<1x8x1xf32> to vector<1x8x8xf32>
    %144 = arith.mulf %139, %143 : vector<1x8x8xf32>
    "tpu.trace_start"() <{level = 10 : i32, message = "bnm,bmd->bnd"}> : () -> ()
    %cst_87 = arith.constant dense<0.000000e+00> : vector<1x8x128xf32>
    %145 = tpu.matmul %144, %133, %cst_87 {dimension_numbers = #tpu.dot_dimension_numbers<[2], [1], [1], [2], [0, 0, 0, 1, 1, 2], [0], [0]>} : vector<1x8x8xf32>, vector<1x8x128xf32>, vector<1x8x128xf32> -> vector<1x8x128xf32>
    "tpu.trace_stop"() : () -> ()
    %c0_88 = arith.constant 0 : index
    %c0_89 = arith.constant 0 : index
    %146 = vector.load %arg6[%c0_88, %c0_89] : memref<8x128xf32, #tpu.memory_space<vmem>>, vector<8x128xf32>
    %147 = vector.shape_cast %145 : vector<1x8x128xf32> to vector<8x128xf32>
    %148 = arith.index_cast %c3_i32 : i32 to index
    %c0_90 = arith.constant 0 : index
    %c0_91 = arith.constant 0 : index
    %149 = vector.load %arg3[%148, %c0_90, %c0_91] : memref<8x128x128xf32, #tpu.memory_space<vmem>>, vector<1x128x128xf32>
    %150 = vector.shape_cast %149 : vector<1x128x128xf32> to vector<128x128xf32>
    %cst_92 = arith.constant dense<0.000000e+00> : vector<8x128xf32>
    %151 = tpu.matmul %147, %150, %cst_92 {dimension_numbers = #tpu.dot_dimension_numbers<[1], [0], [0], [1], [0, 0, 1, 1], [], []>} : vector<8x128xf32>, vector<128x128xf32>, vector<8x128xf32> -> vector<8x128xf32>
    %152 = arith.addf %146, %151 : vector<8x128xf32>
    %c0_93 = arith.constant 0 : index
    %c0_94 = arith.constant 0 : index
    %153 = vector.load %arg6[%c0_93, %c0_94] : memref<8x128xf32, #tpu.memory_space<vmem>>, vector<8x128xf32>
    tpu.vector_store %arg6[%c0_93, %c0_94], %152 {strides = array<i32>} : memref<8x128xf32, #tpu.memory_space<vmem>>, vector<8x128xf32>,
    %c4_i32 = arith.constant 4 : i32
    %c0_95 = arith.constant 0 : index
    %c0_96 = arith.constant 0 : index
    %154 = vector.load %arg1[%c0_95, %c0_96] : memref<8x128xf32, #tpu.memory_space<vmem>>, vector<8x128xf32>
    %155 = arith.index_cast %c4_i32 : i32 to index
    %c0_97 = arith.constant 0 : index
    %c0_98 = arith.constant 0 : index
    %156 = vector.load %arg2[%155, %c0_97, %c0_98] : memref<24x128x128xf32, #tpu.memory_space<vmem>>, vector<1x128x128xf32>
    %157 = vector.shape_cast %156 : vector<1x128x128xf32> to vector<128x128xf32>
    %cst_99 = arith.constant dense<0.000000e+00> : vector<8x128xf32>
    %158 = tpu.matmul %154, %157, %cst_99 {dimension_numbers = #tpu.dot_dimension_numbers<[1], [0], [0], [1], [0, 0, 1, 1], [], []>} : vector<8x128xf32>, vector<128x128xf32>, vector<8x128xf32> -> vector<8x128xf32>
    %c8_i32_100 = arith.constant 8 : i32
    %159 = arith.addi %c8_i32_100, %c4_i32 : i32
    %160 = arith.index_cast %159 : i32 to index
    %c0_101 = arith.constant 0 : index
    %c0_102 = arith.constant 0 : index
    %161 = vector.load %arg2[%160, %c0_101, %c0_102] : memref<24x128x128xf32, #tpu.memory_space<vmem>>, vector<1x128x128xf32>
    %162 = vector.shape_cast %161 : vector<1x128x128xf32> to vector<128x128xf32>
    %cst_103 = arith.constant dense<0.000000e+00> : vector<8x128xf32>
    %163 = tpu.matmul %154, %162, %cst_103 {dimension_numbers = #tpu.dot_dimension_numbers<[1], [0], [0], [1], [0, 0, 1, 1], [], []>} : vector<8x128xf32>, vector<128x128xf32>, vector<8x128xf32> -> vector<8x128xf32>
    %c16_i32_104 = arith.constant 16 : i32
    %164 = arith.addi %c16_i32_104, %c4_i32 : i32
    %165 = arith.index_cast %164 : i32 to index
    %c0_105 = arith.constant 0 : index
    %c0_106 = arith.constant 0 : index
    %166 = vector.load %arg2[%165, %c0_105, %c0_106] : memref<24x128x128xf32, #tpu.memory_space<vmem>>, vector<1x128x128xf32>
    %167 = vector.shape_cast %166 : vector<1x128x128xf32> to vector<128x128xf32>
    %cst_107 = arith.constant dense<0.000000e+00> : vector<8x128xf32>
    %168 = tpu.matmul %154, %167, %cst_107 {dimension_numbers = #tpu.dot_dimension_numbers<[1], [0], [0], [1], [0, 0, 1, 1], [], []>} : vector<8x128xf32>, vector<128x128xf32>, vector<8x128xf32> -> vector<8x128xf32>
    %169 = vector.shape_cast %158 : vector<8x128xf32> to vector<1x8x128xf32>
    %170 = vector.shape_cast %163 : vector<8x128xf32> to vector<1x8x128xf32>
    %171 = vector.shape_cast %168 : vector<8x128xf32> to vector<1x8x128xf32>
    "tpu.trace_start"() <{level = 10 : i32, message = "bnd,bmd->bnm"}> : () -> ()
    %cst_108 = arith.constant dense<0.000000e+00> : vector<1x8x8xf32>
    %172 = tpu.matmul %169, %170, %cst_108 {dimension_numbers = #tpu.dot_dimension_numbers<[2], [2], [1], [1], [0, 0, 0, 1, 1, 1], [0], [0]>} : vector<1x8x128xf32>, vector<1x8x128xf32>, vector<1x8x8xf32> -> vector<1x8x8xf32>
    "tpu.trace_stop"() : () -> ()
    %cst_109 = arith.constant dense<0xFF800000> : vector<1x8xf32>
    %173 = vector.multi_reduction <maximumf>, %172, %cst_109 [2] : vector<1x8x8xf32> to vector<1x8xf32>
    %174 = vector.shape_cast %173 : vector<1x8xf32> to vector<1x8x1xf32>
    %175 = vector.broadcast %174 : vector<1x8x1xf32> to vector<1x8x8xf32>
    %176 = arith.subf %172, %175 : vector<1x8x8xf32>
    %177 = math.exp %176 : vector<1x8x8xf32>
    %cst_110 = arith.constant dense<0.000000e+00> : vector<1x8xf32>
    %178 = vector.multi_reduction <add>, %177, %cst_110 [2] : vector<1x8x8xf32> to vector<1x8xf32>
    %179 = vector.shape_cast %178 : vector<1x8xf32> to vector<1x8x1xf32>
    %180 = tpu.reciprocal %179 {approx = true} : vector<1x8x1xf32> -> vector<1x8x1xf32>
    %181 = vector.broadcast %180 : vector<1x8x1xf32> to vector<1x8x8xf32>
    %182 = arith.mulf %177, %181 : vector<1x8x8xf32>
    "tpu.trace_start"() <{level = 10 : i32, message = "bnm,bmd->bnd"}> : () -> ()
    %cst_111 = arith.constant dense<0.000000e+00> : vector<1x8x128xf32>
    %183 = tpu.matmul %182, %171, %cst_111 {dimension_numbers = #tpu.dot_dimension_numbers<[2], [1], [1], [2], [0, 0, 0, 1, 1, 2], [0], [0]>} : vector<1x8x8xf32>, vector<1x8x128xf32>, vector<1x8x128xf32> -> vector<1x8x128xf32>
    "tpu.trace_stop"() : () -> ()
    %c0_112 = arith.constant 0 : index
    %c0_113 = arith.constant 0 : index
    %184 = vector.load %arg6[%c0_112, %c0_113] : memref<8x128xf32, #tpu.memory_space<vmem>>, vector<8x128xf32>
    %185 = vector.shape_cast %183 : vector<1x8x128xf32> to vector<8x128xf32>
    %186 = arith.index_cast %c4_i32 : i32 to index
    %c0_114 = arith.constant 0 : index
    %c0_115 = arith.constant 0 : index
    %187 = vector.load %arg3[%186, %c0_114, %c0_115] : memref<8x128x128xf32, #tpu.memory_space<vmem>>, vector<1x128x128xf32>
    %188 = vector.shape_cast %187 : vector<1x128x128xf32> to vector<128x128xf32>
    %cst_116 = arith.constant dense<0.000000e+00> : vector<8x128xf32>
    %189 = tpu.matmul %185, %188, %cst_116 {dimension_numbers = #tpu.dot_dimension_numbers<[1], [0], [0], [1], [0, 0, 1, 1], [], []>} : vector<8x128xf32>, vector<128x128xf32>, vector<8x128xf32> -> vector<8x128xf32>
    %190 = arith.addf %184, %189 : vector<8x128xf32>
    %c0_117 = arith.constant 0 : index
    %c0_118 = arith.constant 0 : index
    %191 = vector.load %arg6[%c0_117, %c0_118] : memref<8x128xf32, #tpu.memory_space<vmem>>, vector<8x128xf32>
    tpu.vector_store %arg6[%c0_117, %c0_118], %190 {strides = array<i32>} : memref<8x128xf32, #tpu.memory_space<vmem>>, vector<8x128xf32>,
    %c5_i32 = arith.constant 5 : i32
    %c0_119 = arith.constant 0 : index
    %c0_120 = arith.constant 0 : index
    %192 = vector.load %arg1[%c0_119, %c0_120] : memref<8x128xf32, #tpu.memory_space<vmem>>, vector<8x128xf32>
    %193 = arith.index_cast %c5_i32 : i32 to index
    %c0_121 = arith.constant 0 : index
    %c0_122 = arith.constant 0 : index
    %194 = vector.load %arg2[%193, %c0_121, %c0_122] : memref<24x128x128xf32, #tpu.memory_space<vmem>>, vector<1x128x128xf32>
    %195 = vector.shape_cast %194 : vector<1x128x128xf32> to vector<128x128xf32>
    %cst_123 = arith.constant dense<0.000000e+00> : vector<8x128xf32>
    %196 = tpu.matmul %192, %195, %cst_123 {dimension_numbers = #tpu.dot_dimension_numbers<[1], [0], [0], [1], [0, 0, 1, 1], [], []>} : vector<8x128xf32>, vector<128x128xf32>, vector<8x128xf32> -> vector<8x128xf32>
    %c8_i32_124 = arith.constant 8 : i32
    %197 = arith.addi %c8_i32_124, %c5_i32 : i32
    %198 = arith.index_cast %197 : i32 to index
    %c0_125 = arith.constant 0 : index
    %c0_126 = arith.constant 0 : index
    %199 = vector.load %arg2[%198, %c0_125, %c0_126] : memref<24x128x128xf32, #tpu.memory_space<vmem>>, vector<1x128x128xf32>
    %200 = vector.shape_cast %199 : vector<1x128x128xf32> to vector<128x128xf32>
    %cst_127 = arith.constant dense<0.000000e+00> : vector<8x128xf32>
    %201 = tpu.matmul %192, %200, %cst_127 {dimension_numbers = #tpu.dot_dimension_numbers<[1], [0], [0], [1], [0, 0, 1, 1], [], []>} : vector<8x128xf32>, vector<128x128xf32>, vector<8x128xf32> -> vector<8x128xf32>
    %c16_i32_128 = arith.constant 16 : i32
    %202 = arith.addi %c16_i32_128, %c5_i32 : i32
    %203 = arith.index_cast %202 : i32 to index
    %c0_129 = arith.constant 0 : index
    %c0_130 = arith.constant 0 : index
    %204 = vector.load %arg2[%203, %c0_129, %c0_130] : memref<24x128x128xf32, #tpu.memory_space<vmem>>, vector<1x128x128xf32>
    %205 = vector.shape_cast %204 : vector<1x128x128xf32> to vector<128x128xf32>
    %cst_131 = arith.constant dense<0.000000e+00> : vector<8x128xf32>
    %206 = tpu.matmul %192, %205, %cst_131 {dimension_numbers = #tpu.dot_dimension_numbers<[1], [0], [0], [1], [0, 0, 1, 1], [], []>} : vector<8x128xf32>, vector<128x128xf32>, vector<8x128xf32> -> vector<8x128xf32>
    %207 = vector.shape_cast %196 : vector<8x128xf32> to vector<1x8x128xf32>
    %208 = vector.shape_cast %201 : vector<8x128xf32> to vector<1x8x128xf32>
    %209 = vector.shape_cast %206 : vector<8x128xf32> to vector<1x8x128xf32>
    "tpu.trace_start"() <{level = 10 : i32, message = "bnd,bmd->bnm"}> : () -> ()
    %cst_132 = arith.constant dense<0.000000e+00> : vector<1x8x8xf32>
    %210 = tpu.matmul %207, %208, %cst_132 {dimension_numbers = #tpu.dot_dimension_numbers<[2], [2], [1], [1], [0, 0, 0, 1, 1, 1], [0], [0]>} : vector<1x8x128xf32>, vector<1x8x128xf32>, vector<1x8x8xf32> -> vector<1x8x8xf32>
    "tpu.trace_stop"() : () -> ()
    %cst_133 = arith.constant dense<0xFF800000> : vector<1x8xf32>
    %211 = vector.multi_reduction <maximumf>, %210, %cst_133 [2] : vector<1x8x8xf32> to vector<1x8xf32>
    %212 = vector.shape_cast %211 : vector<1x8xf32> to vector<1x8x1xf32>
    %213 = vector.broadcast %212 : vector<1x8x1xf32> to vector<1x8x8xf32>
    %214 = arith.subf %210, %213 : vector<1x8x8xf32>
    %215 = math.exp %214 : vector<1x8x8xf32>
    %cst_134 = arith.constant dense<0.000000e+00> : vector<1x8xf32>
    %216 = vector.multi_reduction <add>, %215, %cst_134 [2] : vector<1x8x8xf32> to vector<1x8xf32>
    %217 = vector.shape_cast %216 : vector<1x8xf32> to vector<1x8x1xf32>
    %218 = tpu.reciprocal %217 {approx = true} : vector<1x8x1xf32> -> vector<1x8x1xf32>
    %219 = vector.broadcast %218 : vector<1x8x1xf32> to vector<1x8x8xf32>
    %220 = arith.mulf %215, %219 : vector<1x8x8xf32>
    "tpu.trace_start"() <{level = 10 : i32, message = "bnm,bmd->bnd"}> : () -> ()
    %cst_135 = arith.constant dense<0.000000e+00> : vector<1x8x128xf32>
    %221 = tpu.matmul %220, %209, %cst_135 {dimension_numbers = #tpu.dot_dimension_numbers<[2], [1], [1], [2], [0, 0, 0, 1, 1, 2], [0], [0]>} : vector<1x8x8xf32>, vector<1x8x128xf32>, vector<1x8x128xf32> -> vector<1x8x128xf32>
    "tpu.trace_stop"() : () -> ()
    %c0_136 = arith.constant 0 : index
    %c0_137 = arith.constant 0 : index
    %222 = vector.load %arg6[%c0_136, %c0_137] : memref<8x128xf32, #tpu.memory_space<vmem>>, vector<8x128xf32>
    %223 = vector.shape_cast %221 : vector<1x8x128xf32> to vector<8x128xf32>
    %224 = arith.index_cast %c5_i32 : i32 to index
    %c0_138 = arith.constant 0 : index
    %c0_139 = arith.constant 0 : index
    %225 = vector.load %arg3[%224, %c0_138, %c0_139] : memref<8x128x128xf32, #tpu.memory_space<vmem>>, vector<1x128x128xf32>
    %226 = vector.shape_cast %225 : vector<1x128x128xf32> to vector<128x128xf32>
    %cst_140 = arith.constant dense<0.000000e+00> : vector<8x128xf32>
    %227 = tpu.matmul %223, %226, %cst_140 {dimension_numbers = #tpu.dot_dimension_numbers<[1], [0], [0], [1], [0, 0, 1, 1], [], []>} : vector<8x128xf32>, vector<128x128xf32>, vector<8x128xf32> -> vector<8x128xf32>
    %228 = arith.addf %222, %227 : vector<8x128xf32>
    %c0_141 = arith.constant 0 : index
    %c0_142 = arith.constant 0 : index
    %229 = vector.load %arg6[%c0_141, %c0_142] : memref<8x128xf32, #tpu.memory_space<vmem>>, vector<8x128xf32>
    tpu.vector_store %arg6[%c0_141, %c0_142], %228 {strides = array<i32>} : memref<8x128xf32, #tpu.memory_space<vmem>>, vector<8x128xf32>,
    %c6_i32 = arith.constant 6 : i32
    %c0_143 = arith.constant 0 : index
    %c0_144 = arith.constant 0 : index
    %230 = vector.load %arg1[%c0_143, %c0_144] : memref<8x128xf32, #tpu.memory_space<vmem>>, vector<8x128xf32>
    %231 = arith.index_cast %c6_i32 : i32 to index
    %c0_145 = arith.constant 0 : index
    %c0_146 = arith.constant 0 : index
    %232 = vector.load %arg2[%231, %c0_145, %c0_146] : memref<24x128x128xf32, #tpu.memory_space<vmem>>, vector<1x128x128xf32>
    %233 = vector.shape_cast %232 : vector<1x128x128xf32> to vector<128x128xf32>
    %cst_147 = arith.constant dense<0.000000e+00> : vector<8x128xf32>
    %234 = tpu.matmul %230, %233, %cst_147 {dimension_numbers = #tpu.dot_dimension_numbers<[1], [0], [0], [1], [0, 0, 1, 1], [], []>} : vector<8x128xf32>, vector<128x128xf32>, vector<8x128xf32> -> vector<8x128xf32>
    %c8_i32_148 = arith.constant 8 : i32
    %235 = arith.addi %c8_i32_148, %c6_i32 : i32
    %236 = arith.index_cast %235 : i32 to index
    %c0_149 = arith.constant 0 : index
    %c0_150 = arith.constant 0 : index
    %237 = vector.load %arg2[%236, %c0_149, %c0_150] : memref<24x128x128xf32, #tpu.memory_space<vmem>>, vector<1x128x128xf32>
    %238 = vector.shape_cast %237 : vector<1x128x128xf32> to vector<128x128xf32>
    %cst_151 = arith.constant dense<0.000000e+00> : vector<8x128xf32>
    %239 = tpu.matmul %230, %238, %cst_151 {dimension_numbers = #tpu.dot_dimension_numbers<[1], [0], [0], [1], [0, 0, 1, 1], [], []>} : vector<8x128xf32>, vector<128x128xf32>, vector<8x128xf32> -> vector<8x128xf32>
    %c16_i32_152 = arith.constant 16 : i32
    %240 = arith.addi %c16_i32_152, %c6_i32 : i32
    %241 = arith.index_cast %240 : i32 to index
    %c0_153 = arith.constant 0 : index
    %c0_154 = arith.constant 0 : index
    %242 = vector.load %arg2[%241, %c0_153, %c0_154] : memref<24x128x128xf32, #tpu.memory_space<vmem>>, vector<1x128x128xf32>
    %243 = vector.shape_cast %242 : vector<1x128x128xf32> to vector<128x128xf32>
    %cst_155 = arith.constant dense<0.000000e+00> : vector<8x128xf32>
    %244 = tpu.matmul %230, %243, %cst_155 {dimension_numbers = #tpu.dot_dimension_numbers<[1], [0], [0], [1], [0, 0, 1, 1], [], []>} : vector<8x128xf32>, vector<128x128xf32>, vector<8x128xf32> -> vector<8x128xf32>
    %245 = vector.shape_cast %234 : vector<8x128xf32> to vector<1x8x128xf32>
    %246 = vector.shape_cast %239 : vector<8x128xf32> to vector<1x8x128xf32>
    %247 = vector.shape_cast %244 : vector<8x128xf32> to vector<1x8x128xf32>
    "tpu.trace_start"() <{level = 10 : i32, message = "bnd,bmd->bnm"}> : () -> ()
    %cst_156 = arith.constant dense<0.000000e+00> : vector<1x8x8xf32>
    %248 = tpu.matmul %245, %246, %cst_156 {dimension_numbers = #tpu.dot_dimension_numbers<[2], [2], [1], [1], [0, 0, 0, 1, 1, 1], [0], [0]>} : vector<1x8x128xf32>, vector<1x8x128xf32>, vector<1x8x8xf32> -> vector<1x8x8xf32>
    "tpu.trace_stop"() : () -> ()
    %cst_157 = arith.constant dense<0xFF800000> : vector<1x8xf32>
    %249 = vector.multi_reduction <maximumf>, %248, %cst_157 [2] : vector<1x8x8xf32> to vector<1x8xf32>
    %250 = vector.shape_cast %249 : vector<1x8xf32> to vector<1x8x1xf32>
    %251 = vector.broadcast %250 : vector<1x8x1xf32> to vector<1x8x8xf32>
    %252 = arith.subf %248, %251 : vector<1x8x8xf32>
    %253 = math.exp %252 : vector<1x8x8xf32>
    %cst_158 = arith.constant dense<0.000000e+00> : vector<1x8xf32>
    %254 = vector.multi_reduction <add>, %253, %cst_158 [2] : vector<1x8x8xf32> to vector<1x8xf32>
    %255 = vector.shape_cast %254 : vector<1x8xf32> to vector<1x8x1xf32>
    %256 = tpu.reciprocal %255 {approx = true} : vector<1x8x1xf32> -> vector<1x8x1xf32>
    %257 = vector.broadcast %256 : vector<1x8x1xf32> to vector<1x8x8xf32>
    %258 = arith.mulf %253, %257 : vector<1x8x8xf32>
    "tpu.trace_start"() <{level = 10 : i32, message = "bnm,bmd->bnd"}> : () -> ()
    %cst_159 = arith.constant dense<0.000000e+00> : vector<1x8x128xf32>
    %259 = tpu.matmul %258, %247, %cst_159 {dimension_numbers = #tpu.dot_dimension_numbers<[2], [1], [1], [2], [0, 0, 0, 1, 1, 2], [0], [0]>} : vector<1x8x8xf32>, vector<1x8x128xf32>, vector<1x8x128xf32> -> vector<1x8x128xf32>
    "tpu.trace_stop"() : () -> ()
    %c0_160 = arith.constant 0 : index
    %c0_161 = arith.constant 0 : index
    %260 = vector.load %arg6[%c0_160, %c0_161] : memref<8x128xf32, #tpu.memory_space<vmem>>, vector<8x128xf32>
    %261 = vector.shape_cast %259 : vector<1x8x128xf32> to vector<8x128xf32>
    %262 = arith.index_cast %c6_i32 : i32 to index
    %c0_162 = arith.constant 0 : index
    %c0_163 = arith.constant 0 : index
    %263 = vector.load %arg3[%262, %c0_162, %c0_163] : memref<8x128x128xf32, #tpu.memory_space<vmem>>, vector<1x128x128xf32>
    %264 = vector.shape_cast %263 : vector<1x128x128xf32> to vector<128x128xf32>
    %cst_164 = arith.constant dense<0.000000e+00> : vector<8x128xf32>
    %265 = tpu.matmul %261, %264, %cst_164 {dimension_numbers = #tpu.dot_dimension_numbers<[1], [0], [0], [1], [0, 0, 1, 1], [], []>} : vector<8x128xf32>, vector<128x128xf32>, vector<8x128xf32> -> vector<8x128xf32>
    %266 = arith.addf %260, %265 : vector<8x128xf32>
    %c0_165 = arith.constant 0 : index
    %c0_166 = arith.constant 0 : index
    %267 = vector.load %arg6[%c0_165, %c0_166] : memref<8x128xf32, #tpu.memory_space<vmem>>, vector<8x128xf32>
    tpu.vector_store %arg6[%c0_165, %c0_166], %266 {strides = array<i32>} : memref<8x128xf32, #tpu.memory_space<vmem>>, vector<8x128xf32>,
    %c7_i32 = arith.constant 7 : i32
    %c0_167 = arith.constant 0 : index
    %c0_168 = arith.constant 0 : index
    %268 = vector.load %arg1[%c0_167, %c0_168] : memref<8x128xf32, #tpu.memory_space<vmem>>, vector<8x128xf32>
    %269 = arith.index_cast %c7_i32 : i32 to index
    %c0_169 = arith.constant 0 : index
    %c0_170 = arith.constant 0 : index
    %270 = vector.load %arg2[%269, %c0_169, %c0_170] : memref<24x128x128xf32, #tpu.memory_space<vmem>>, vector<1x128x128xf32>
    %271 = vector.shape_cast %270 : vector<1x128x128xf32> to vector<128x128xf32>
    %cst_171 = arith.constant dense<0.000000e+00> : vector<8x128xf32>
    %272 = tpu.matmul %268, %271, %cst_171 {dimension_numbers = #tpu.dot_dimension_numbers<[1], [0], [0], [1], [0, 0, 1, 1], [], []>} : vector<8x128xf32>, vector<128x128xf32>, vector<8x128xf32> -> vector<8x128xf32>
    %c8_i32_172 = arith.constant 8 : i32
    %273 = arith.addi %c8_i32_172, %c7_i32 : i32
    %274 = arith.index_cast %273 : i32 to index
    %c0_173 = arith.constant 0 : index
    %c0_174 = arith.constant 0 : index
    %275 = vector.load %arg2[%274, %c0_173, %c0_174] : memref<24x128x128xf32, #tpu.memory_space<vmem>>, vector<1x128x128xf32>
    %276 = vector.shape_cast %275 : vector<1x128x128xf32> to vector<128x128xf32>
    %cst_175 = arith.constant dense<0.000000e+00> : vector<8x128xf32>
    %277 = tpu.matmul %268, %276, %cst_175 {dimension_numbers = #tpu.dot_dimension_numbers<[1], [0], [0], [1], [0, 0, 1, 1], [], []>} : vector<8x128xf32>, vector<128x128xf32>, vector<8x128xf32> -> vector<8x128xf32>
    %c16_i32_176 = arith.constant 16 : i32
    %278 = arith.addi %c16_i32_176, %c7_i32 : i32
    %279 = arith.index_cast %278 : i32 to index
    %c0_177 = arith.constant 0 : index
    %c0_178 = arith.constant 0 : index
    %280 = vector.load %arg2[%279, %c0_177, %c0_178] : memref<24x128x128xf32, #tpu.memory_space<vmem>>, vector<1x128x128xf32>
    %281 = vector.shape_cast %280 : vector<1x128x128xf32> to vector<128x128xf32>
    %cst_179 = arith.constant dense<0.000000e+00> : vector<8x128xf32>
    %282 = tpu.matmul %268, %281, %cst_179 {dimension_numbers = #tpu.dot_dimension_numbers<[1], [0], [0], [1], [0, 0, 1, 1], [], []>} : vector<8x128xf32>, vector<128x128xf32>, vector<8x128xf32> -> vector<8x128xf32>
    %283 = vector.shape_cast %272 : vector<8x128xf32> to vector<1x8x128xf32>
    %284 = vector.shape_cast %277 : vector<8x128xf32> to vector<1x8x128xf32>
    %285 = vector.shape_cast %282 : vector<8x128xf32> to vector<1x8x128xf32>
    "tpu.trace_start"() <{level = 10 : i32, message = "bnd,bmd->bnm"}> : () -> ()
    %cst_180 = arith.constant dense<0.000000e+00> : vector<1x8x8xf32>
    %286 = tpu.matmul %283, %284, %cst_180 {dimension_numbers = #tpu.dot_dimension_numbers<[2], [2], [1], [1], [0, 0, 0, 1, 1, 1], [0], [0]>} : vector<1x8x128xf32>, vector<1x8x128xf32>, vector<1x8x8xf32> -> vector<1x8x8xf32>
    "tpu.trace_stop"() : () -> ()
    %cst_181 = arith.constant dense<0xFF800000> : vector<1x8xf32>
    %287 = vector.multi_reduction <maximumf>, %286, %cst_181 [2] : vector<1x8x8xf32> to vector<1x8xf32>
    %288 = vector.shape_cast %287 : vector<1x8xf32> to vector<1x8x1xf32>
    %289 = vector.broadcast %288 : vector<1x8x1xf32> to vector<1x8x8xf32>
    %290 = arith.subf %286, %289 : vector<1x8x8xf32>
    %291 = math.exp %290 : vector<1x8x8xf32>
    %cst_182 = arith.constant dense<0.000000e+00> : vector<1x8xf32>
    %292 = vector.multi_reduction <add>, %291, %cst_182 [2] : vector<1x8x8xf32> to vector<1x8xf32>
    %293 = vector.shape_cast %292 : vector<1x8xf32> to vector<1x8x1xf32>
    %294 = tpu.reciprocal %293 {approx = true} : vector<1x8x1xf32> -> vector<1x8x1xf32>
    %295 = vector.broadcast %294 : vector<1x8x1xf32> to vector<1x8x8xf32>
    %296 = arith.mulf %291, %295 : vector<1x8x8xf32>
    "tpu.trace_start"() <{level = 10 : i32, message = "bnm,bmd->bnd"}> : () -> ()
    %cst_183 = arith.constant dense<0.000000e+00> : vector<1x8x128xf32>
    %297 = tpu.matmul %296, %285, %cst_183 {dimension_numbers = #tpu.dot_dimension_numbers<[2], [1], [1], [2], [0, 0, 0, 1, 1, 2], [0], [0]>} : vector<1x8x8xf32>, vector<1x8x128xf32>, vector<1x8x128xf32> -> vector<1x8x128xf32>
    "tpu.trace_stop"() : () -> ()
    %c0_184 = arith.constant 0 : index
    %c0_185 = arith.constant 0 : index
    %298 = vector.load %arg6[%c0_184, %c0_185] : memref<8x128xf32, #tpu.memory_space<vmem>>, vector<8x128xf32>
    %299 = vector.shape_cast %297 : vector<1x8x128xf32> to vector<8x128xf32>
    %300 = arith.index_cast %c7_i32 : i32 to index
    %c0_186 = arith.constant 0 : index
    %c0_187 = arith.constant 0 : index
    %301 = vector.load %arg3[%300, %c0_186, %c0_187] : memref<8x128x128xf32, #tpu.memory_space<vmem>>, vector<1x128x128xf32>
    %302 = vector.shape_cast %301 : vector<1x128x128xf32> to vector<128x128xf32>
    %cst_188 = arith.constant dense<0.000000e+00> : vector<8x128xf32>
    %303 = tpu.matmul %299, %302, %cst_188 {dimension_numbers = #tpu.dot_dimension_numbers<[1], [0], [0], [1], [0, 0, 1, 1], [], []>} : vector<8x128xf32>, vector<128x128xf32>, vector<8x128xf32> -> vector<8x128xf32>
    %304 = arith.addf %298, %303 : vector<8x128xf32>
    %c0_189 = arith.constant 0 : index
    %c0_190 = arith.constant 0 : index
    %305 = vector.load %arg6[%c0_189, %c0_190] : memref<8x128xf32, #tpu.memory_space<vmem>>, vector<8x128xf32>
    tpu.vector_store %arg6[%c0_189, %c0_190], %304 {strides = array<i32>} : memref<8x128xf32, #tpu.memory_space<vmem>>, vector<8x128xf32>,
    %c8_i32_191 = arith.constant 8 : i32
    %c0_192 = arith.constant 0 : index
    %c0_193 = arith.constant 0 : index
    %306 = vector.load %arg6[%c0_192, %c0_193] : memref<8x128xf32, #tpu.memory_space<vmem>>, vector<8x128xf32>
    %c0_194 = arith.constant 0 : index
    %c0_195 = arith.constant 0 : index
    %307 = vector.load %arg4[%c0_194, %c0_195] : memref<1x128xf32, #tpu.memory_space<vmem>>, vector<1x128xf32>
    %308 = vector.broadcast %307 : vector<1x128xf32> to vector<8x128xf32>
    %309 = arith.addf %306, %308 : vector<8x128xf32>
    %c0_196 = arith.constant 0 : index
    %c0_197 = arith.constant 0 : index
    %310 = vector.load %arg5[%c0_196, %c0_197] : memref<8x128xf32, #tpu.memory_space<vmem>>, vector<8x128xf32>
    tpu.vector_store %arg5[%c0_196, %c0_197], %309 {strides = array<i32>} : memref<8x128xf32, #tpu.memory_space<vmem>>, vector<8x128xf32>,
    return
  }
  func.func @transform_0(%arg0: i32) -> (i32, i32) {
    %c0_i32 = arith.constant 0 : i32
    %c0_i32_0 = arith.constant 0 : i32
    return %arg0, %c0_i32 : i32, i32
  }
  func.func @transform_1(%arg0: i32) -> (i32, i32, i32) {
    %c0_i32 = arith.constant 0 : i32
    %c0_i32_0 = arith.constant 0 : i32
    %c0_i32_1 = arith.constant 0 : i32
    %c0_i32_2 = arith.constant 0 : i32
    return %c0_i32, %c0_i32_0, %c0_i32_1 : i32, i32, i32
  }
  func.func @transform_2(%arg0: i32) -> (i32, i32, i32) {
    %c0_i32 = arith.constant 0 : i32
    %c0_i32_0 = arith.constant 0 : i32
    %c0_i32_1 = arith.constant 0 : i32
    %c0_i32_2 = arith.constant 0 : i32
    return %c0_i32, %c0_i32_0, %c0_i32_1 : i32, i32, i32
  }
  func.func @transform_3(%arg0: i32) -> (i32, i32) {
    %c0_i32 = arith.constant 0 : i32
    %c0_i32_0 = arith.constant 0 : i32
    %c0_i32_1 = arith.constant 0 : i32
    return %c0_i32, %c0_i32_0 : i32, i32
  }
  func.func @transform_4(%arg0: i32) -> (i32, i32) {
    %c0_i32 = arith.constant 0 : i32
    %c0_i32_0 = arith.constant 0 : i32
    return %arg0, %c0_i32 : i32, i32
  }
}

</mosaic_0001>

<bundles_post_ra>
// kernel: tpu_custom_call.1
= control target key start
LH: loop header
LB: loop body
LE: loop exit
PB: predicated region body
PF: predicated region fallthrough
CT: control target
= control target key end

     0   :  { %9 = vsyncpa [#allocation4], 0  ;;  %s8042_s0 = inlined_call_operand.hbm [shape: f32[16,128], index: 0, kind: input, shape index: {}]   ;;  %s8043_s1 = inlined_call_operand.hbm [shape: f32[24,128,128], index: 1, kind: input, shape index: {}]   ;;  %s8044_s2 = inlined_call_operand.hbm [shape: f32[8,128,128], index: 2, kind: input, shape index: {}]   ;;  %s8045_s3 = inlined_call_operand.hbm [shape: f32[1,128], index: 3, kind: input, shape index: {}]   ;;  %s8046_s4 = inlined_call_operand.hbm [shape: f32[16,128], index: 4, kind: output, shape index: {}]  }
   0x1   :  { %11 = vsyncpa [#allocation4 + $0x1], 0 }
   0x2   :  { %12 = vsyncpa [#allocation7], 0 }
   0x3   :  { %13 = vsyncpa [#allocation10], 0 }
   0x4   :  { %14 = vsyncpa [#allocation5], 0 }
   0x5   :  { %16 = vsyncpa [#allocation5 + $0x1], 0  ;;  %s7336_s15 = smov 0   ;;  %s7338_s16 = smov 0  }
   0x6   :  { %s7340_s17 = smov 0   ;;  %s7342_s18 = smov 0  }
   0x7 LB: > { %s7357_s19 = sadd.s32 4294967295, %s7299_s18   ;;  %s4426_s20 = sadd.s32 4294967294, %s7299_s18   ;;  %s7299_s18 = sphi %s7342_s18, %s8069_s18   ;;  %s7295_s17 = sphi %s7340_s17, %s8068_s17   ;;  %s7291_s16 = sphi %s7338_s16, %s8067_s16   ;;  %s7287_s15 = sphi %s7336_s15, %s8066_s15  }
   0x8   : > { %p42_p0 = scmp.ne.s32.totalorder %s7291_s16, %s7287_s15  ;;  %p8047_p1 = scmp.eq.s32.totalorder %s7357_s19, 0 }
   0x9   : > { %p135_p3 = scmp.eq.s32.totalorder %s4426_s20, 1  ;;  %p4427_p5 = scmp.ge.s32.totalorder %s7299_s18, 1 }
   0xa   : > { %p7366_p4 = por %p8047_p1, %p42_p0  ;;  %p142_p7 = scmp.lt.s32.totalorder %s7299_s18, 3 }
   0xb   : > { %p7371_p6 = por %p135_p3, %p42_p0  ;;  %s7301_s24 = smov [#allocation6]  }
   0xc   : > { %s8050_s21 = scalar_select %p7366_p4, 1, 0 }
   0xd   : > { %s8051_s22 = scalar_select %p7371_p6, 1, 0 }
   0xe   : > { %p7376_p8 = pnand %p4427_p5, %p142_p7  ;;  %s154_s25 = sshll.u32 %s7301_s24, 4  ;;  %s7380_s25 = int_to_ptr.vmem [resolvable:$true] %s154_s25 }
   0xf   : > { %s7302_s27 = smov [#allocation8]   ;;  %s7303_s29 = smov [#allocation9]  }
  0x10   : > { %s8052_s23 = scalar_select %p7376_p8, 1, 0 }
  0x11   : > { %p7013_p9 = pneg %p7376_p8  ;;  %s167_s28 = sshll.u32 %s7302_s27, 4  ;;  %s7391_s28 = int_to_ptr.vmem [resolvable:$true] %s167_s28 }
  0x12   : > { %s7393_s30 = sshll.u32 %s7303_s29, 4  ;;  %s7111_s7 = scalar_lea.hbm %s8043_s1, 49152  ;;  %s182_s30 = int_to_ptr.vmem [resolvable:$true] %s7393_s30 }
  0x13   : > { %p7387_p11 = pnand %p7013_p9, %p8047_p1  ;;  %p7112_p12 = scmp.ne.s32.totalorder %s8043_s1, %s7111_s7 }
  0x14   : > { %p7118_p5 = scmp.lt.u32.totalorder %s7111_s7, %s8043_s1 }
  0x15   : > { %p7403_p13 = pneg %p7387_p11 }
  0x17   : > { %p7114_p0 = pnand %p7403_p13, %p7112_p12 }
  0x19   : > { %p7115_p3 = pneg %p7114_p0 }
  0x1b   : > { %p7120_p7 = pnand %p7118_p5, %p7115_p3 }
  0x1d   : > { %7123 = shalt.err (!%p7120_p7)
}
  0x1e   : > { %s7124_s13 = scalar_lea.vmem %s7380_s25, 49152  ;;  %p7132_p2 = scmp.lt.s32.totalorder %s7380_s25, %s7380_s25 }
  0x1f   : > { %p7125_p9 = scmp.ne.s32.totalorder %s7380_s25, %s7124_s13  ;;  %p7133_p6 = scmp.lt.s32.totalorder %s7124_s13, %s7124_s13 }
  0x21   : > { %p7127_p10 = pnand %p7125_p9, %p7403_p13  ;;  %p7134_p12 = por %p7133_p6, %p7132_p2 }
  0x23   : > { %p7128_p1 = pneg %p7127_p10 }
  0x25   : > { %p7135_p0 = pnand %p7134_p12, %p7128_p1 }
  0x27   : > { %7138 = shalt.err (!%p7135_p0)
}
  0x28   : > { %s7304_s14 = smov 128   ;;  %s7305_s20 = smov 8  }
  0x29   : > { %7016 = dma.hbm_to_vmem [thread:$0]  (!%p7387_p11), %s8043_s1, 49152, %s7380_s25, [#allocation7], %s7304_s14, %s7304_s14, %s7305_s20  }
  0x2a   : > { %s7139_s6 = scalar_lea.hbm %s8044_s2, 16384 }
  0x2b   : > { %p7140_p2 = scmp.ne.s32.totalorder %s8044_s2, %s7139_s6  ;;  %p7146_p10 = scmp.lt.u32.totalorder %s7139_s6, %s8044_s2 }
  0x2d   : > { %p7142_p1 = pnand %p7140_p2, %p7403_p13 }
  0x2f   : > { %p7143_p6 = pneg %p7142_p1 }
  0x31   : > { %p7148_p3 = pnand %p7146_p10, %p7143_p6 }
  0x33   : > { %7151 = shalt.err (!%p7148_p3)
}
  0x34   : > { %s7152_s25 = scalar_lea.vmem %s7391_s28, 16384  ;;  %p7160_p12 = scmp.lt.s32.totalorder %s7391_s28, %s7391_s28 }
  0x35   : > { %p7153_p5 = scmp.ne.s32.totalorder %s7391_s28, %s7152_s25  ;;  %p7161_p0 = scmp.lt.s32.totalorder %s7152_s25, %s7152_s25 }
  0x37   : > { %p7155_p7 = pnand %p7153_p5, %p7403_p13  ;;  %p7162_p2 = por %p7161_p0, %p7160_p12 }
  0x39   : > { %p7156_p9 = pneg %p7155_p7 }
  0x3b   : > { %p7163_p1 = pnand %p7162_p2, %p7156_p9 }
  0x3d   : > { %7166 = shalt.err (!%p7163_p1)
}
  0x3e   : > { %7019 = dma.hbm_to_vmem [thread:$0]  (!%p7387_p11), %s8044_s2, 16384, %s7391_s28, [#allocation7], %s7304_s14, %s7304_s14, %s7305_s20  }
  0x3f   : > { %s7167_s29 = scalar_lea.hbm %s8045_s3, 16 }
  0x40   : > { %p7168_p6 = scmp.ne.s32.totalorder %s8045_s3, %s7167_s29  ;;  %p7174_p5 = scmp.lt.u32.totalorder %s7167_s29, %s8045_s3 }
  0x42   : > { %p7170_p10 = pnand %p7168_p6, %p7403_p13 }
  0x44   : > { %p7171_p3 = pneg %p7170_p10 }
  0x46   : > { %p7176_p7 = pnand %p7174_p5, %p7171_p3 }
  0x48   : > { %7179 = shalt.err (!%p7176_p7)
}
  0x49   : > { %s7180_s9 = scalar_lea.vmem %s182_s30, 16  ;;  %s7187_s28 = scalar_lea.vmem %s182_s30, 32 }
  0x4a   : > { %p7181_p9 = scmp.ne.s32.totalorder %s182_s30, %s7180_s9  ;;  %p7188_p2 = scmp.lt.s32.totalorder %s182_s30, %s182_s30 }
  0x4b   : > { %p7189_p1 = scmp.lt.s32.totalorder %s7187_s28, %s7180_s9 }
  0x4c   : > { %p7183_p12 = pnand %p7181_p9, %p7403_p13 }
  0x4d   : > { %p7190_p4 = por %p7189_p1, %p7188_p2 }
  0x4e   : > { %p7184_p0 = pneg %p7183_p12 }
  0x50   : > { %p7191_p8 = pnand %p7190_p4, %p7184_p0 }
  0x52   : > { %7194 = shalt.err (!%p7191_p8)
}
  0x53   : > { %7022 = dma.hbm_to_vmem [thread:$0]  (!%p7387_p11), %s8045_s3, 16, %s182_s30, [#allocation10]  }
  0x54   : > { %s7467_s10 = sadd.s32 1, %s7299_s18   ;;  %s29_s26 = sadd.s32 1, %s7295_s17 }
  0x55   : > { %s26_s11 = ssub.s32 %s7299_s18, %s7467_s10  ;;  %p36_p8 = scmp.ne.s32.totalorder %s7295_s17, %s7291_s16 }
  0x56   : > { %p27_p4 = scmp.eq.s32.totalorder %s26_s11, 0  ;;  %p37_p13 = scmp.eq.s32.totalorder %s7299_s18, 0 }
  0x57   : > { %p7034_p6 = scmp.lt.s32.totalorder %s7299_s18, 2  ;;  %p8055_p3 = scmp.eq.s32.totalorder %s7357_s19, 1 }
  0x58   : > { %s7477_s25 = scalar_select %p27_p4, %s7295_s17, %s29_s26  }
  0x59   : > { %p38_p10 = por %p37_p13, %p36_p8  ;;  %p7481_p5 = por %p8055_p3, %p36_p8 }
  0x5a   : > { %s192_s13 = sand.u32 1, %s7295_s17   ;;  %s4433_s24 = sshll.u32 %s7299_s18, 7 }
  0x5b   : > { %s4432_s30 = sshll.u32 %s192_s13, 3  ;;  %s7490_s5 = scalar_lea.hbm %s8042_s0, %s4433_s24 }
  0x5c   : > { %s196_s6 = scalar_lea.vmem [#allocation3], %s4432_s30  ;;  %p7492_p11 = pnand %p7034_p6, %p38_p10 }
  0x5d   : > { %s203_s7 = sshll.u32 %s196_s6, 4  ;;  %s193_s9 = scalar_lea.sflag [#allocation4], %s192_s13  ;;  %s7496_s7 = int_to_ptr.vmem [resolvable:$true] %s203_s7 }
  0x5e   : > { %s7195_s28 = scalar_lea.hbm %s7490_s5, 128  ;;  %p7197_p9 = pneg %p7492_p11 }
  0x5f   : > { %p7196_p7 = scmp.ne.s32.totalorder %s7490_s5, %s7195_s28  ;;  %s7200_s11 = scalar_lea.hbm %s8042_s0, 256 }
  0x60   : > { %p7201_p2 = scmp.lt.u32.totalorder %s7490_s5, %s8042_s0  ;;  %p7202_p1 = scmp.lt.u32.totalorder %s7200_s11, %s7195_s28 }
  0x61   : > { %p7198_p12 = pnand %p7197_p9, %p7196_p7  ;;  %p7204_p8 = scmp.lt.u32.totalorder %s7195_s28, %s7490_s5 }
  0x62   : > { %p7203_p4 = por %p7202_p1, %p7201_p2 }
  0x63   : > { %p7199_p0 = pneg %p7198_p12 }
  0x64   : > { %p7205_p13 = por %p7204_p8, %p7203_p4 }
  0x66   : > { %p7206_p6 = pnand %p7205_p13, %p7199_p0 }
  0x68   : > { %7209 = shalt.err (!%p7206_p6)
}
  0x69   : > { %s7210_s13 = scalar_lea.vmem %s7496_s7, 128  ;;  %s7306_s30 = smov [#allocation3]  }
  0x6a   : > { %p7211_p10 = scmp.ne.s32.totalorder %s7496_s7, %s7210_s13  ;;  %s7215_s27 = sshll.u32 %s7306_s30, 4  ;;  %s7216_s27 = int_to_ptr.vmem [resolvable:$false] %s7215_s27 }
  0x6b   : > { %s7217_s29 = scalar_lea.vmem %s7216_s27, 256  ;;  %p7218_p12 = scmp.lt.s32.totalorder %s7496_s7, %s7216_s27 }
  0x6c   : > { %p7213_p3 = pnand %p7211_p10, %p7197_p9  ;;  %p7219_p2 = scmp.lt.s32.totalorder %s7217_s29, %s7210_s13 }
  0x6e   : > { %p7214_p7 = pneg %p7213_p3  ;;  %p7220_p1 = por %p7219_p2, %p7218_p12 }
  0x70   : > { %p7221_p4 = pnand %p7220_p1, %p7214_p7 }
  0x72   : > { %7224 = shalt.err (!%p7221_p4)
}
  0x73   : > { %7026 = dma.hbm_to_vmem [thread:$0]  (!%p7492_p11), %s7490_s5, 128, %s7496_s7, %s193_s9  }
  0x74   : > { %p8058_p0 = scmp.ne.s32.totalorder %s8052_s23, 0 }
  0x75   : > { %s7526_s6 = sand.u32 (!%p8058_p0), 1, %s7291_s16   ;;  %p8059_p9 = scmp.ne.s32.totalorder (!%p8058_p0), %s8050_s21, 0 }
  0x76   : > { %212 = sbr.rel (%p8058_p0) target bundleno = 8246 (0x2036), region = 36  ;;  %s4435_s28 = sshll.u32 (!%p8058_p0), %s7526_s6, 3 }
  0x77   : > { %s215_s14 = scalar_lea.sflag (!%p8058_p0), [#allocation4], %s7526_s6  ;;  %s7532_s20 = scalar_lea.vmem (!%p8058_p0), [#allocation3], %s4435_s28 }
  0x7d   : > { %7270 = dma.done.wait (%p8059_p9), %s215_s14, 128  }
  0x7e   : > { %7272 = vsyncadd (%p8059_p9), %s215_s14, 4294967168  ;;  %p8060_p11 = scmp.eq.s32.totalorder %s7357_s19, 0 }
  0x80   : > { %7274 = dma.done.wait (%p8060_p11), [#allocation7], 65536   ;;  %p8061_p8 = pmov %p8060_p11 }
  0x82   : > { %7276 = vsyncadd (%p8061_p8), [#allocation7], 4294901760  ;;  %p8062_p13 = pmov %p8061_p8 }
  0x83   : > { %p8063_p6 = pmov %p8061_p8 }
  0x84   : > { %7278 = dma.done.wait (%p8062_p13), [#allocation10], 16  }
  0x85   : > { %7280 = vsyncadd (%p8063_p6), [#allocation10], 4294967280  ;;  %v7307_v0 = vmov 0.0|0.0   ;;  %vm7308_vm0 = vmmov 0   ;;  %v7309_v1 = vmov 0.0   ;;  %v344_v2 = vld [vmem:[#allocation6 + $0x400] sm:$0xff] }
  0x86   : > { %6253 = vmatprep.subr.bf16.mxu1 %v7307_v0  ;;  %6229 = vmatprep.subr.bf16.mxu0 %v7307_v0  ;;  %v345_v3 = vld [vmem:[#allocation6 + $0x408] sm:$0xff]  ;;  %v257_v4 = vld [vmem:[#allocation6] sm:$0xff]  ;;  %v346_v7 = vld [vmem:[#allocation6 + $0x410] sm:$0xff]  ;;  %vm587_vm1 = vcmask 64512   ;;  %s4450_s21 = sshll.u32 %s7357_s19, 7  ;;  %s254_s23 = scalar_lea.vmem [#allocation11], %s4435_s28 }
  0x87   : > { %5096 = vmatprep.mubr.msk.f32.mxu1 %vm7308_vm0, %v7309_v1  ;;  %5061 = vmatprep.mubr.msk.f32.mxu0 %vm7308_vm0, %v7309_v1  ;;  %v6254_v5 = vpack.c.bf16 %v345_v3, %v344_v2  ;;  %v258_v6 = vld [vmem:[#allocation6 + $0x8] sm:$0xff]  ;;  %v347_v8 = vld [vmem:[#allocation6 + $0x418] sm:$0xff]  ;;  %v259_v10 = vld [vmem:[#allocation6 + $0x10] sm:$0xff]  ;;  %s4327_s5 = sshll.u32 %s254_s23, 4  ;;  %s7998_s9 = scalar_lea.hbm %s8046_s4, %s4450_s21  ;;  %s8000_s5 = int_to_ptr.vmem [resolvable:$true] %s4327_s5 }
  0x88   : > { %v6230_v9 = vpack.c.bf16 %v258_v6, %v257_v4  ;;  %v260_v11 = vld [vmem:[#allocation6 + $0x18] sm:$0xff]  ;;  %v6257_v12 = vpack.c.bf16 %v347_v8, %v346_v7  ;;  %v348_v14 = vld [vmem:[#allocation6 + $0x420] sm:$0xff]  ;;  %v349_v15 = vld [vmem:[#allocation6 + $0x428] sm:$0xff]  ;;  %s4314_s11 = scalar_lea.sflag [#allocation5], %s7526_s6  ;;  %s7225_s19 = scalar_lea.vmem %s8000_s5, 128 }
  0x89   : > { %6255 = vmatpush3.bf16.msra.mxu1 %v6254_v5  ;;  %v6233_v13 = vpack.c.bf16 %v260_v11, %v259_v10  ;;  %v261_v16 = vld [vmem:[#allocation6 + $0x20] sm:$0xff]  ;;  %v262_v17 = vld [vmem:[#allocation6 + $0x28] sm:$0xff]  ;;  %v6260_v18 = vpack.c.bf16 %v349_v15, %v348_v14  ;;  %v350_v20 = vld [vmem:[#allocation6 + $0x430] sm:$0xff]  ;;  %p7226_p10 = scmp.ne.s32.totalorder %s8000_s5, %s7225_s19  ;;  %s7310_s26 = smov [#allocation11]  }
  0x8a   : > { %6231 = vmatpush3.bf16.msra.mxu0 %v6230_v9  ;;  %6256 = vmatprep.subr.bf16.mxu1 %v7307_v0  ;;  %v6236_v19 = vpack.c.bf16 %v262_v17, %v261_v16  ;;  %v351_v21 = vld [vmem:[#allocation6 + $0x438] sm:$0xff]  ;;  %v263_v22 = vld [vmem:[#allocation6 + $0x30] sm:$0xff]  ;;  %v352_v26 = vld [vmem:[#allocation6 + $0x440] sm:$0xff]  ;;  %s7229_s24 = sshll.u32 %s7310_s26, 4  ;;  %s7230_s24 = int_to_ptr.vmem [resolvable:$false] %s7229_s24 }
  0x8b   : > { %6232 = vmatprep.subr.bf16.mxu0 %v7307_v0  ;;  %v264_v23 = vld [vmem:[#allocation6 + $0x38] sm:$0xff]  ;;  %v6263_v24 = vpack.c.bf16 %v351_v21, %v350_v20  ;;  %v353_v27 = vld [vmem:[#allocation6 + $0x448] sm:$0xff]  ;;  %v265_v28 = vld [vmem:[#allocation6 + $0x40] sm:$0xff]  ;;  %p7227_p3 = pnand %p7226_p10, %p7481_p5  ;;  %s7231_s13 = scalar_lea.vmem %s7230_s24, 256 }
  0x8c   : > { %v6239_v25 = vpack.c.bf16 %v264_v23, %v263_v22  ;;  %v266_v29 = vld [vmem:[#allocation6 + $0x48] sm:$0xff]  ;;  %v6266_v30 = vpack.c.bf16 %v353_v27, %v352_v26  ;;  %v354_v32 = vld [vmem:[#allocation6 + $0x450] sm:$0xff]  ;;  %v355_v33 = vld [vmem:[#allocation6 + $0x458] sm:$0xff]  ;;  %p7232_p12 = scmp.lt.s32.totalorder %s8000_s5, %s7230_s24  ;;  %p7233_p2 = scmp.lt.s32.totalorder %s7231_s13, %s7225_s19 }
  0x8d   : > { %6258 = vmatpush3.bf16.msra.mxu1 %v6257_v12  ;;  %v6242_v31 = vpack.c.bf16 %v266_v29, %v265_v28  ;;  %v267_v34 = vld [vmem:[#allocation6 + $0x50] sm:$0xff]  ;;  %v268_v35 = vld [vmem:[#allocation6 + $0x58] sm:$0xff]  ;;  %v6269_v36 = vpack.c.bf16 %v355_v33, %v354_v32  ;;  %v356_v38 = vld [vmem:[#allocation6 + $0x460] sm:$0xff]  ;;  %p7228_p7 = pneg %p7227_p3 }
  0x8e   : > { %6234 = vmatpush3.bf16.msra.mxu0 %v6233_v13  ;;  %6259 = vmatprep.subr.bf16.mxu1 %v7307_v0  ;;  %v6245_v37 = vpack.c.bf16 %v268_v35, %v267_v34  ;;  %v357_v39 = vld [vmem:[#allocation6 + $0x468] sm:$0xff]  ;;  %v269_v40 = vld [vmem:[#allocation6 + $0x60] sm:$0xff]  ;;  %v358_v44 = vld [vmem:[#allocation6 + $0x470] sm:$0xff]  ;;  %p7234_p1 = por %p7233_p2, %p7232_p12 }
  0x8f   : > { %6235 = vmatprep.subr.bf16.mxu0 %v7307_v0  ;;  %v270_v41 = vld [vmem:[#allocation6 + $0x68] sm:$0xff]  ;;  %v6272_v42 = vpack.c.bf16 %v357_v39, %v356_v38  ;;  %v359_v45 = vld [vmem:[#allocation6 + $0x478] sm:$0xff]  ;;  %v271_v46 = vld [vmem:[#allocation6 + $0x70] sm:$0xff] }
  0x90   : > { %v6248_v43 = vpack.c.bf16 %v270_v41, %v269_v40  ;;  %v272_v47 = vld [vmem:[#allocation6 + $0x78] sm:$0xff]  ;;  %v6275_v48 = vpack.c.bf16 %v359_v45, %v358_v44  ;;  %v431_v55 = vld [vmem:[#allocation6 + $0x800] sm:$0xff]  ;;  %v432_v56 = vld [vmem:[#allocation6 + $0x808] sm:$0xff]  ;;  %p7235_p4 = pnand %p7234_p1, %p7228_p7 }
  0x91   : > { %6261 = vmatpush3.bf16.msra.mxu1 %v6260_v18  ;;  %v6251_v49 = vpack.c.bf16 %v272_v47, %v271_v46  ;;  %v7567_v50 = vld [vmem:[%s7532_s20] sm:$0xff]  ;;  %v6278_v58 = vpack.c.bf16 %v432_v56, %v431_v55  ;;  %v435_v61 = vld [vmem:[#allocation6 + $0x820] sm:$0xff]  ;;  %v436_v62 = vld [vmem:[#allocation6 + $0x828] sm:$0xff] }
  0x92   : > { %6237 = vmatpush3.bf16.msra.mxu0 %v6236_v19  ;;  %6262 = vmatprep.subr.bf16.mxu1 %v7307_v0  ;;  %v433_v57 = vld [vmem:[#allocation6 + $0x810] sm:$0xff]  ;;  %v434_v59 = vld [vmem:[#allocation6 + $0x818] sm:$0xff]  ;;  %v6284_v63 = vpack.c.bf16 %v436_v62, %v435_v61  ;;  %v439_v5 = vld [vmem:[#allocation6 + $0x840] sm:$0xff] }
  0x93   : > { %6238 = vmatprep.subr.bf16.mxu0 %v7307_v0  ;;  %v6281_v60 = vpack.c.bf16 %v434_v59, %v433_v57  ;;  %v437_v2 = vld [vmem:[#allocation6 + $0x830] sm:$0xff]  ;;  %v438_v3 = vld [vmem:[#allocation6 + $0x838] sm:$0xff]  ;;  %v440_v6 = vld [vmem:[#allocation6 + $0x848] sm:$0xff] }
  0x94   : > { %v6287_v4 = vpack.c.bf16 %v438_v3, %v437_v2  ;;  %v6290_v7 = vpack.c.bf16 %v440_v6, %v439_v5  ;;  %v441_v8 = vld [vmem:[#allocation6 + $0x850] sm:$0xff]  ;;  %v442_v9 = vld [vmem:[#allocation6 + $0x858] sm:$0xff]  ;;  %v443_v11 = vld [vmem:[#allocation6 + $0x860] sm:$0xff] }
  0x95   : > { %6264 = vmatpush3.bf16.msra.mxu1 %v6263_v24  ;;  %v6293_v10 = vpack.c.bf16 %v442_v9, %v441_v8  ;;  %v444_v12 = vld [vmem:[#allocation6 + $0x868] sm:$0xff]  ;;  %v445_v14 = vld [vmem:[#allocation6 + $0x870] sm:$0xff]  ;;  %v446_v15 = vld [vmem:[#allocation6 + $0x878] sm:$0xff] }
  0x96   : > { %6240 = vmatpush3.bf16.msra.mxu0 %v6239_v25  ;;  %6265 = vmatprep.subr.bf16.mxu1 %v7307_v0  ;;  %v6296_v13 = vpack.c.bf16 %v444_v12, %v443_v11  ;;  %v6299_v16 = vpack.c.bf16 %v446_v15, %v445_v14  ;;  %v673_v28 = vld [vmem:[#allocation8] sm:$0xff]  ;;  %v674_v29 = vld [vmem:[#allocation8 + $0x8] sm:$0xff]  ;;  %v675_v33 = vld [vmem:[#allocation8 + $0x10] sm:$0xff] }
  0x97   : > { %6241 = vmatprep.subr.bf16.mxu0 %v7307_v0  ;;  %v676_v34 = vld [vmem:[#allocation8 + $0x18] sm:$0xff]  ;;  %v679_v39 = vld [vmem:[#allocation8 + $0x30] sm:$0xff]  ;;  %v763_v55 = vld [vmem:[#allocation6 + $0x80] sm:$0xff] }
  0x98   : > { %v6305_v35 = vpack.c.bf16 %v676_v34, %v675_v33  ;;  %v680_v40 = vld [vmem:[#allocation8 + $0x38] sm:$0xff]  ;;  %v683_v45 = vld [vmem:[#allocation8 + $0x50] sm:$0xff]  ;;  %v764_v56 = vld [vmem:[#allocation6 + $0x88] sm:$0xff] }
  0x99   : > { %6267 = vmatpush3.bf16.msra.mxu1 %v6266_v30  ;;  %v6311_v41 = vpack.c.bf16 %v680_v40, %v679_v39  ;;  %v684_v46 = vld [vmem:[#allocation8 + $0x58] sm:$0xff]  ;;  %v6326_v57 = vpack.c.bf16 %v764_v56, %v763_v55  ;;  %v767_v61 = vld [vmem:[#allocation6 + $0xa0] sm:$0xff]  ;;  %v768_v62 = vld [vmem:[#allocation6 + $0xa8] sm:$0xff] }
  0x9a   : > { %6243 = vmatpush3.bf16.msra.mxu0 %v6242_v31  ;;  %6268 = vmatprep.subr.bf16.mxu1 %v7307_v0  ;;  %v6302_v31 = vpack.c.bf16 %v674_v29, %v673_v28  ;;  %v6317_v47 = vpack.c.bf16 %v684_v46, %v683_v45  ;;  %v766_v59 = vld [vmem:[#allocation6 + $0x98] sm:$0xff]  ;;  %v769_v2 = vld [vmem:[#allocation6 + $0xb0] sm:$0xff]  ;;  %v771_v5 = vld [vmem:[#allocation6 + $0xc0] sm:$0xff] }
  0x9b   : > { %6244 = vmatprep.subr.bf16.mxu0 %v7307_v0  ;;  %v770_v3 = vld [vmem:[#allocation6 + $0xb8] sm:$0xff]  ;;  %v772_v6 = vld [vmem:[#allocation6 + $0xc8] sm:$0xff]  ;;  %v773_v8 = vld [vmem:[#allocation6 + $0xd0] sm:$0xff] }
  0x9c   : > { %v774_v9 = vld [vmem:[#allocation6 + $0xd8] sm:$0xff]  ;;  %v775_v11 = vld [vmem:[#allocation6 + $0xe0] sm:$0xff]  ;;  %v776_v12 = vld [vmem:[#allocation6 + $0xe8] sm:$0xff] }
  0x9d   : > { %6270 = vmatpush3.bf16.msra.mxu1 %v6269_v36  ;;  %v677_v36 = vld [vmem:[#allocation8 + $0x20] sm:$0xff]  ;;  %v777_v14 = vld [vmem:[#allocation6 + $0xf0] sm:$0xff]  ;;  %v778_v15 = vld [vmem:[#allocation6 + $0xf8] sm:$0xff] }
  0x9e   : > { %6246 = vmatpush3.bf16.msra.mxu0 %v6245_v37  ;;  %6271 = vmatprep.subr.bf16.mxu1 %v7307_v0  ;;  %v678_v37 = vld [vmem:[#allocation8 + $0x28] sm:$0xff]  ;;  %v856_v28 = vld [vmem:[#allocation6 + $0x4b0] sm:$0xff]  ;;  %v857_v29 = vld [vmem:[#allocation6 + $0x4b8] sm:$0xff] }
  0x9f   : > { %6247 = vmatprep.subr.bf16.mxu0 %v7307_v0  ;;  %v6308_v38 = vpack.c.bf16 %v678_v37, %v677_v36  ;;  %v860_v34 = vld [vmem:[#allocation6 + $0x4d0] sm:$0xff]  ;;  %v862_v37 = vld [vmem:[#allocation6 + $0x4e0] sm:$0xff] }
  0xa0   : > { %v864_v40 = vld [vmem:[#allocation6 + $0x4f0] sm:$0xff]  ;;  %v941_v56 = vld [vmem:[#allocation6 + $0x8a0] sm:$0xff] }
  0xa1   : > { %6273 = vmatpush3.bf16.msra.mxu1 %v6272_v42  ;;  %v681_v42 = vld [vmem:[#allocation8 + $0x40] sm:$0xff] }
  0xa2   : > { %6249 = vmatpush3.bf16.msra.mxu0 %v6248_v43  ;;  %6274 = vmatprep.subr.bf16.mxu1 %v7307_v0  ;;  %v682_v43 = vld [vmem:[#allocation8 + $0x48] sm:$0xff] }
  0xa3   : > { %6250 = vmatprep.subr.bf16.mxu0 %v7307_v0  ;;  %v6314_v44 = vpack.c.bf16 %v682_v43, %v681_v42 }
  0xa5   : > { %6276 = vmatpush3.bf16.msra.mxu1 %v6275_v48  ;;  %v685_v48 = vld [vmem:[#allocation8 + $0x60] sm:$0xff] }
  0xa6   : > { %6252 = vmatpush3.bf16.msra.mxu0 %v6251_v49  ;;  %5134 = vmatprep.subr.mxu1 %v7309_v1  ;;  %v686_v49 = vld [vmem:[#allocation8 + $0x68] sm:$0xff] }
  0xa7   : > { %6277 = vmatprep.subr.bf16.mxu0 %v7307_v0 }
  0xa8   : > { %5097 = vmatmul.mubr.f32.vlgmr.msra.gmra.mrb[0].mxu1 %v7567_v50 }
  0xa9   : > { %5062 = vmatmul.mubr.f32.vlgmr.msra.gmra.mrb[0].mxu0 %v7567_v50  ;;  %5136 = vmatprep.mubr.msk.f32.mxu1 %vm7308_vm0, %v7309_v1 }
  0xaa   : > { %5131 = vmatprep.mubr.msk.f32.mxu0 %vm7308_vm0, %v7309_v1  ;;  %6279 = vmatpush3.bf16.msra.mxu0 %v6278_v58  ;;  %v765_v58 = vld [vmem:[#allocation6 + $0x90] sm:$0xff] }
  0xab   : > { %6280 = vmatprep.subr.bf16.mxu0 %v7307_v0 }
  0xae   : > { %6282 = vmatpush3.bf16.msra.mxu0 %v6281_v60  ;;  %v6329_v60 = vpack.c.bf16 %v766_v59, %v765_v58  ;;  %v943_v59 = vld [vmem:[#allocation6 + $0x8b0] sm:$0xff] }
  0xaf   : > { %6283 = vmatprep.subr.bf16.mxu0 %v7307_v0 }
  0xb2   : > { %6285 = vmatpush3.bf16.msra.mxu0 %v6284_v63  ;;  %v6332_v63 = vpack.c.bf16 %v768_v62, %v767_v61  ;;  %v945_v62 = vld [vmem:[#allocation6 + $0x8c0] sm:$0xff] }
  0xb3   : > { %6286 = vmatprep.subr.bf16.mxu0 %v7307_v0 }
  0xb6   : > { %6288 = vmatpush3.bf16.msra.mxu0 %v6287_v4  ;;  %v6335_v4 = vpack.c.bf16 %v770_v3, %v769_v2  ;;  %v947_v3 = vld [vmem:[#allocation6 + $0x8d0] sm:$0xff] }
  0xb7   : > { %6289 = vmatprep.subr.bf16.mxu0 %v7307_v0 }
  0xba   : > { %6291 = vmatpush3.bf16.msra.mxu0 %v6290_v7  ;;  %v6338_v7 = vpack.c.bf16 %v772_v6, %v771_v5  ;;  %v949_v6 = vld [vmem:[#allocation6 + $0x8e0] sm:$0xff] }
  0xbb   : > { %6292 = vmatprep.subr.bf16.mxu0 %v7307_v0 }
  0xbe   : > { %6294 = vmatpush3.bf16.msra.mxu0 %v6293_v10  ;;  %v6341_v10 = vpack.c.bf16 %v774_v9, %v773_v8  ;;  %v951_v9 = vld [vmem:[#allocation6 + $0x8f0] sm:$0xff] }
  0xbf   : > { %6295 = vmatprep.subr.bf16.mxu0 %v7307_v0 }
  0xc2   : > { %6297 = vmatpush3.bf16.msra.mxu0 %v6296_v13  ;;  %v6344_v13 = vpack.c.bf16 %v776_v12, %v775_v11 }
  0xc3   : > { %6298 = vmatprep.subr.bf16.mxu0 %v7307_v0 }
  0xc6   : > { %6300 = vmatpush3.bf16.msra.mxu0 %v6299_v16  ;;  %v6347_v16 = vpack.c.bf16 %v778_v15, %v777_v14 }
  0xc7   : > { %6325 = vmatprep.subr.bf16.mxu0 %v7307_v0 }
  0xc9   : > { %5132 = vmatmul.mubr.f32.vlgmr.msra.gmra.mrb[2].mxu0 %v7567_v50 }
  0xca   : > { %5211 = vmatprep.mubr.msk.f32.mxu0 %vm7308_vm0, %v7309_v1  ;;  %6327 = vmatpush3.bf16.msra.mxu0 %v6326_v57  ;;  %v942_v57 = vld [vmem:[#allocation6 + $0x8a8] sm:$0xff] }
  0xcb   : > { %6328 = vmatprep.subr.bf16.mxu0 %v7307_v0  ;;  %v6380_v58 = vpack.c.bf16 %v942_v57, %v941_v56  ;;  %v1273_v57 = vld [vmem:[#allocation6 + $0x120] sm:$0xff] }
  0xce   : > { %6330 = vmatpush3.bf16.msra.mxu0 %v6329_v60  ;;  %v944_v60 = vld [vmem:[#allocation6 + $0x8b8] sm:$0xff] }
  0xcf   : > { %6331 = vmatprep.subr.bf16.mxu0 %v7307_v0  ;;  %v6383_v61 = vpack.c.bf16 %v944_v60, %v943_v59  ;;  %v1275_v60 = vld [vmem:[#allocation6 + $0x130] sm:$0xff] }
  0xd2   : > { %6333 = vmatpush3.bf16.msra.mxu0 %v6332_v63  ;;  %v946_v63 = vld [vmem:[#allocation6 + $0x8c8] sm:$0xff] }
  0xd3   : > { %6334 = vmatprep.subr.bf16.mxu0 %v7307_v0  ;;  %v6386_v2 = vpack.c.bf16 %v946_v63, %v945_v62  ;;  %v1277_v63 = vld [vmem:[#allocation6 + $0x140] sm:$0xff] }
  0xd6   : > { %6336 = vmatpush3.bf16.msra.mxu0 %v6335_v4  ;;  %v948_v4 = vld [vmem:[#allocation6 + $0x8d8] sm:$0xff] }
  0xd7   : > { %6337 = vmatprep.subr.bf16.mxu0 %v7307_v0  ;;  %v6389_v5 = vpack.c.bf16 %v948_v4, %v947_v3  ;;  %v1279_v4 = vld [vmem:[#allocation6 + $0x150] sm:$0xff] }
  0xda   : > { %6339 = vmatpush3.bf16.msra.mxu0 %v6338_v7  ;;  %v950_v7 = vld [vmem:[#allocation6 + $0x8e8] sm:$0xff] }
  0xdb   : > { %6340 = vmatprep.subr.bf16.mxu0 %v7307_v0  ;;  %v6392_v8 = vpack.c.bf16 %v950_v7, %v949_v6  ;;  %v1281_v7 = vld [vmem:[#allocation6 + $0x160] sm:$0xff] }
  0xde   : > { %6342 = vmatpush3.bf16.msra.mxu0 %v6341_v10  ;;  %v952_v10 = vld [vmem:[#allocation6 + $0x8f8] sm:$0xff] }
  0xdf   : > { %6343 = vmatprep.subr.bf16.mxu0 %v7307_v0  ;;  %v6395_v11 = vpack.c.bf16 %v952_v10, %v951_v9  ;;  %v1283_v10 = vld [vmem:[#allocation6 + $0x170] sm:$0xff] }
  0xe2   : > { %6345 = vmatpush3.bf16.msra.mxu0 %v6344_v13 }
  0xe3   : > { %6346 = vmatprep.subr.bf16.mxu0 %v7307_v0 }
  0xe6   : > { %6348 = vmatpush3.bf16.msra.mxu0 %v6347_v16 }
  0xe7   : > { %6373 = vmatprep.subr.bf16.mxu0 %v7307_v0 }
  0xe9   : > { %5212 = vmatmul.mubr.f32.vlgmr.msra.gmra.mrb[4].mxu0 %v7567_v50 }
  0xea   : > { %5281 = vmatprep.mubr.msk.f32.mxu0 %vm7308_vm0, %v7309_v1 }
 0x17b   : > { %v426_v51 = vpop.f32.mrb[0].mxu1 }
 0x17c   : > { %v5098_v52 = vpop.f32.mrb[1].mxu1  ;;  %5135 = vmatpush3.xpose.msra.mxu1 %v426_v51  ;;  %v339_v53 = vpop.f32.mrb[0].mxu0  ;;  %v6320_v51 = vpack.c.bf16 %v686_v49, %v685_v48  ;;  %v937_v49 = vld [vmem:[#allocation6 + $0x880] sm:$0xff] }
 0x17d   : > { %v5063_v54 = vpop.f32.mrb[1].mxu0  ;;  %5139 = vmatprep.subr.mxu1 %v7309_v1  ;;  %v687_v52 = vld [vmem:[#allocation8 + $0x70] sm:$0xff] }
 0x17f   : > { %5137 = vmatmul.mubr.f32.vlgmr.msra.gmra.mrb[2].mxu1 %v339_v53  ;;  %v688_v53 = vld [vmem:[#allocation8 + $0x78] sm:$0xff] }
 0x180   : > { %5141 = vmatprep.mubr.msk.f32.mxu1 %vm7308_vm0, %v7309_v1  ;;  %v6323_v54 = vpack.c.bf16 %v688_v53, %v687_v52  ;;  %v939_v52 = vld [vmem:[#allocation6 + $0x890] sm:$0xff] }
 0x19c   : > { %v513_v25 = vpop.f32.mrb[2].mxu0 }
 0x19d   : > { %v5133_v26 = vpop.f32.mrb[3].mxu0  ;;  %5140 = vmatpush3.msra.mxu1 %v513_v25  ;;  %v854_v25 = vld [vmem:[#allocation6 + $0x4a0] sm:$0xff] }
 0x19e   : > { %6301 = vmatprep.subr.bf16.mxu1 %v7307_v0  ;;  %v855_v26 = vld [vmem:[#allocation6 + $0x4a8] sm:$0xff] }
 0x1bc   : > { %v845_v43 = vpop.f32.mrb[4].mxu0 }
 0x252   : > { %v583_v17 = vpop.f32.mrb[2].mxu1 }
 0x253   : > { %v5138_v18 = vpop.f32.mrb[3].mxu1  ;;  %v588_v19 = vsel %vm587_vm1, %v583_v17, -inf }
 0x254   : > { %589 = vmax.xlane.f32.xlu0 %v588_v19  ;;  %v851_v18 = vld [vmem:[#allocation6 + $0x488] sm:$0xff] }
 0x2e1   : > { %v590_v20 = vpop.xlane.xlu0 %589 }
 0x2e2   : > { %v591_v21 = vsub.f32 %v583_v17, %v590_v20  ;;  %v850_v17 = vld [vmem:[#allocation6 + $0x480] sm:$0xff]  ;;  %v852_v20 = vld [vmem:[#allocation6 + $0x490] sm:$0xff] }
 0x2e3   : > { %v6350_v19 = vpack.c.bf16 %v851_v18, %v850_v17 }
 0x2e4   : > { %v592_v22 = vmul.f32 1.442695, %v591_v21  ;;  %v853_v21 = vld [vmem:[#allocation6 + $0x498] sm:$0xff] }
 0x2e6   : > { %7079 = vpow2.f32 %v592_v22 }
 0x2f0   : > { %v7080_v23 = vpop.eup %7079 }
 0x2f1   : > { %v594_v24 = vsel %vm587_vm1, %v7080_v23, 0.0 }
 0x2f2   : > { %595 = vadd.xlane.f32.xlu0 %v594_v24  ;;  %v6353_v24 = vpack.c.bf16 %v853_v21, %v852_v20 }
 0x37f   : > { %v596_v27 = vpop.xlane.xlu0 %595 }
 0x380   : > { %7081 = vrcp.f32 %v596_v27  ;;  %v6356_v27 = vpack.c.bf16 %v855_v26, %v854_v25 }
 0x38a   : > { %v7082_v30 = vpop.eup %7081 }
 0x38b   : > { %v598_v32 = vmul.f32 %v7082_v30, %v7080_v23  ;;  %v6359_v30 = vpack.c.bf16 %v857_v29, %v856_v28  ;;  %v1181_v28 = vld [vmem:[#allocation8 + $0x90] sm:$0xff]  ;;  %v1182_v29 = vld [vmem:[#allocation8 + $0x98] sm:$0xff] }
 0x38d   : > { %5142 = vmatmul.mubr.msk.f32.vlgmr.msra.gmra.mrb[4].mxu1 %vm587_vm1, %v598_v32  ;;  %v859_v32 = vld [vmem:[#allocation6 + $0x4c8] sm:$0xff] }
 0x38e   : > { %6303 = vmatpush3.bf16.msra.mxu1 %v6302_v31  ;;  %5176 = vmatprep.mubr.msk.f32.mxu1 %vm7308_vm0, %v7309_v1  ;;  %v858_v31 = vld [vmem:[#allocation6 + $0x4c0] sm:$0xff] }
 0x38f   : > { %6304 = vmatprep.subr.bf16.mxu1 %v7307_v0  ;;  %v6362_v33 = vpack.c.bf16 %v859_v32, %v858_v31  ;;  %v1183_v31 = vld [vmem:[#allocation8 + $0xa0] sm:$0xff]  ;;  %v1184_v32 = vld [vmem:[#allocation8 + $0xa8] sm:$0xff] }
 0x392   : > { %6306 = vmatpush3.bf16.msra.mxu1 %v6305_v35  ;;  %v861_v35 = vld [vmem:[#allocation6 + $0x4d8] sm:$0xff] }
 0x393   : > { %6307 = vmatprep.subr.bf16.mxu1 %v7307_v0  ;;  %v6365_v36 = vpack.c.bf16 %v861_v35, %v860_v34  ;;  %v1185_v34 = vld [vmem:[#allocation8 + $0xb0] sm:$0xff]  ;;  %v1186_v35 = vld [vmem:[#allocation8 + $0xb8] sm:$0xff] }
 0x396   : > { %6309 = vmatpush3.bf16.msra.mxu1 %v6308_v38  ;;  %v863_v38 = vld [vmem:[#allocation6 + $0x4e8] sm:$0xff] }
 0x397   : > { %6310 = vmatprep.subr.bf16.mxu1 %v7307_v0  ;;  %v6368_v39 = vpack.c.bf16 %v863_v38, %v862_v37  ;;  %v1187_v37 = vld [vmem:[#allocation8 + $0xc0] sm:$0xff]  ;;  %v1188_v38 = vld [vmem:[#allocation8 + $0xc8] sm:$0xff] }
 0x39a   : > { %6312 = vmatpush3.bf16.msra.mxu1 %v6311_v41  ;;  %v865_v41 = vld [vmem:[#allocation6 + $0x4f8] sm:$0xff] }
 0x39b   : > { %6313 = vmatprep.subr.bf16.mxu1 %v7307_v0  ;;  %v6371_v42 = vpack.c.bf16 %v865_v41, %v864_v40  ;;  %v1189_v40 = vld [vmem:[#allocation8 + $0xd0] sm:$0xff]  ;;  %v1190_v41 = vld [vmem:[#allocation8 + $0xd8] sm:$0xff] }
 0x39e   : > { %6315 = vmatpush3.bf16.msra.mxu1 %v6314_v44  ;;  %v5213_v44 = vpop.f32.mrb[5].mxu0 }
 0x39f   : > { %6316 = vmatprep.subr.bf16.mxu1 %v7307_v0  ;;  %v1192_v44 = vld [vmem:[#allocation8 + $0xe8] sm:$0xff] }
 0x3a2   : > { %6318 = vmatpush3.bf16.msra.mxu1 %v6317_v47 }
 0x3a3   : > { %6319 = vmatprep.subr.bf16.mxu1 %v7307_v0 }
 0x3a6   : > { %6321 = vmatpush3.bf16.msra.mxu1 %v6320_v51  ;;  %v938_v51 = vld [vmem:[#allocation6 + $0x888] sm:$0xff] }
 0x3a7   : > { %6322 = vmatprep.subr.bf16.mxu1 %v7307_v0  ;;  %v6374_v53 = vpack.c.bf16 %v938_v51, %v937_v49  ;;  %v1269_v51 = vld [vmem:[#allocation6 + $0x100] sm:$0xff] }
 0x3a9   : > { %6375 = vmatpush3.bf16.msra.mxu0 %v6374_v53 }
 0x3aa   : > { %6324 = vmatpush3.bf16.msra.mxu1 %v6323_v54  ;;  %v940_v54 = vld [vmem:[#allocation6 + $0x898] sm:$0xff]  ;;  %6376 = vmatprep.subr.bf16.mxu0 %v7307_v0 }
 0x3ab   : > { %6349 = vmatprep.subr.bf16.mxu1 %v7307_v0  ;;  %v6377_v55 = vpack.c.bf16 %v940_v54, %v939_v52  ;;  %v1270_v52 = vld [vmem:[#allocation6 + $0x108] sm:$0xff]  ;;  %v1271_v54 = vld [vmem:[#allocation6 + $0x110] sm:$0xff] }
 0x3ac   : > { %v6422_v53 = vpack.c.bf16 %v1270_v52, %v1269_v51  ;;  %v1446_v52 = vld [vmem:[#allocation6 + $0x918] sm:$0xff] }
 0x3ad   : > { %6378 = vmatpush3.bf16.msra.mxu0 %v6377_v55  ;;  %v1272_v55 = vld [vmem:[#allocation6 + $0x118] sm:$0xff] }
 0x3ae   : > { %6379 = vmatprep.subr.bf16.mxu0 %v7307_v0  ;;  %v6425_v56 = vpack.c.bf16 %v1272_v55, %v1271_v54  ;;  %v1448_v54 = vld [vmem:[#allocation6 + $0x928] sm:$0xff] }
 0x3b1   : > { %6381 = vmatpush3.bf16.msra.mxu0 %v6380_v58  ;;  %v1274_v58 = vld [vmem:[#allocation6 + $0x128] sm:$0xff] }
 0x3b2   : > { %6382 = vmatprep.subr.bf16.mxu0 %v7307_v0  ;;  %v6428_v59 = vpack.c.bf16 %v1274_v58, %v1273_v57  ;;  %v1450_v57 = vld [vmem:[#allocation6 + $0x938] sm:$0xff] }
 0x3b5   : > { %6384 = vmatpush3.bf16.msra.mxu0 %v6383_v61  ;;  %v1276_v61 = vld [vmem:[#allocation6 + $0x138] sm:$0xff] }
 0x3b6   : > { %6385 = vmatprep.subr.bf16.mxu0 %v7307_v0  ;;  %v6431_v62 = vpack.c.bf16 %v1276_v61, %v1275_v60  ;;  %v1452_v60 = vld [vmem:[#allocation6 + $0x948] sm:$0xff] }
 0x3b9   : > { %6387 = vmatpush3.bf16.msra.mxu0 %v6386_v2  ;;  %v1278_v2 = vld [vmem:[#allocation6 + $0x148] sm:$0xff] }
 0x3ba   : > { %6388 = vmatprep.subr.bf16.mxu0 %v7307_v0  ;;  %v6434_v3 = vpack.c.bf16 %v1278_v2, %v1277_v63  ;;  %v1454_v63 = vld [vmem:[#allocation6 + $0x958] sm:$0xff] }
 0x3bd   : > { %6390 = vmatpush3.bf16.msra.mxu0 %v6389_v5  ;;  %v1280_v5 = vld [vmem:[#allocation6 + $0x158] sm:$0xff] }
 0x3be   : > { %6391 = vmatprep.subr.bf16.mxu0 %v7307_v0  ;;  %v6437_v6 = vpack.c.bf16 %v1280_v5, %v1279_v4  ;;  %v1456_v4 = vld [vmem:[#allocation6 + $0x968] sm:$0xff] }
 0x3c1   : > { %6393 = vmatpush3.bf16.msra.mxu0 %v6392_v8  ;;  %v1282_v8 = vld [vmem:[#allocation6 + $0x168] sm:$0xff] }
 0x3c2   : > { %6394 = vmatprep.subr.bf16.mxu0 %v7307_v0  ;;  %v6440_v9 = vpack.c.bf16 %v1282_v8, %v1281_v7  ;;  %v1458_v7 = vld [vmem:[#allocation6 + $0x978] sm:$0xff] }
 0x3c5   : > { %6396 = vmatpush3.bf16.msra.mxu0 %v6395_v11  ;;  %v1284_v11 = vld [vmem:[#allocation6 + $0x178] sm:$0xff] }
 0x3c6   : > { %6421 = vmatprep.subr.bf16.mxu0 %v7307_v0 }
 0x3c8   : > { %5282 = vmatmul.mubr.f32.vlgmr.msra.gmra.mrb[6].mxu0 %v7567_v50 }
 0x3c9   : > { %5361 = vmatprep.mubr.msk.f32.mxu0 %vm7308_vm0, %v7309_v1  ;;  %6423 = vmatpush3.bf16.msra.mxu0 %v6422_v53 }
 0x3ca   : > { %6424 = vmatprep.subr.bf16.mxu0 %v7307_v0 }
 0x3cd   : > { %6426 = vmatpush3.bf16.msra.mxu0 %v6425_v56  ;;  %v1449_v56 = vld [vmem:[#allocation6 + $0x930] sm:$0xff] }
 0x3ce   : > { %6427 = vmatprep.subr.bf16.mxu0 %v7307_v0  ;;  %v6479_v58 = vpack.c.bf16 %v1450_v57, %v1449_v56  ;;  %v1781_v56 = vld [vmem:[#allocation6 + $0x1b0] sm:$0xff]  ;;  %v1782_v57 = vld [vmem:[#allocation6 + $0x1b8] sm:$0xff] }
 0x3d1   : > { %6429 = vmatpush3.bf16.msra.mxu0 %v6428_v59  ;;  %v1451_v59 = vld [vmem:[#allocation6 + $0x940] sm:$0xff] }
 0x3d2   : > { %6430 = vmatprep.subr.bf16.mxu0 %v7307_v0  ;;  %v6482_v61 = vpack.c.bf16 %v1452_v60, %v1451_v59  ;;  %v1783_v59 = vld [vmem:[#allocation6 + $0x1c0] sm:$0xff]  ;;  %v1784_v60 = vld [vmem:[#allocation6 + $0x1c8] sm:$0xff] }
 0x3d5   : > { %6432 = vmatpush3.bf16.msra.mxu0 %v6431_v62  ;;  %v1453_v62 = vld [vmem:[#allocation6 + $0x950] sm:$0xff] }
 0x3d6   : > { %6433 = vmatprep.subr.bf16.mxu0 %v7307_v0  ;;  %v6485_v2 = vpack.c.bf16 %v1454_v63, %v1453_v62  ;;  %v1785_v62 = vld [vmem:[#allocation6 + $0x1d0] sm:$0xff]  ;;  %v1786_v63 = vld [vmem:[#allocation6 + $0x1d8] sm:$0xff] }
 0x3d9   : > { %6435 = vmatpush3.bf16.msra.mxu0 %v6434_v3  ;;  %v1455_v3 = vld [vmem:[#allocation6 + $0x960] sm:$0xff] }
 0x3da   : > { %6436 = vmatprep.subr.bf16.mxu0 %v7307_v0  ;;  %v6488_v5 = vpack.c.bf16 %v1456_v4, %v1455_v3  ;;  %v1787_v3 = vld [vmem:[#allocation6 + $0x1e0] sm:$0xff]  ;;  %v1788_v4 = vld [vmem:[#allocation6 + $0x1e8] sm:$0xff] }
 0x3dd   : > { %6438 = vmatpush3.bf16.msra.mxu0 %v6437_v6  ;;  %v1457_v6 = vld [vmem:[#allocation6 + $0x970] sm:$0xff] }
 0x3de   : > { %6439 = vmatprep.subr.bf16.mxu0 %v7307_v0  ;;  %v6491_v8 = vpack.c.bf16 %v1458_v7, %v1457_v6  ;;  %v1789_v6 = vld [vmem:[#allocation6 + $0x1f0] sm:$0xff]  ;;  %v1790_v7 = vld [vmem:[#allocation6 + $0x1f8] sm:$0xff] }
 0x3e1   : > { %6441 = vmatpush3.bf16.msra.mxu0 %v6440_v9 }
 0x3e2   : > { %6442 = vmatprep.subr.bf16.mxu0 %v7307_v0 }
 0x460   : > { %v668_v22 = vpop.f32.mrb[4].mxu1 }
 0x461   : > { %v5143_v23 = vpop.f32.mrb[5].mxu1  ;;  %5177 = vmatmul.mubr.f32.vlgmr.msra.gmra.mrb[6].mxu1 %v668_v22 }
 0x462   : > { %6351 = vmatpush3.bf16.msra.mxu1 %v6350_v19  ;;  %5246 = vmatprep.mubr.msk.f32.mxu1 %vm7308_vm0, %v7309_v1  ;;  %v1179_v23 = vld [vmem:[#allocation8 + $0x80] sm:$0xff] }
 0x463   : > { %6352 = vmatprep.subr.bf16.mxu1 %v7307_v0 }
 0x466   : > { %6354 = vmatpush3.bf16.msra.mxu1 %v6353_v24  ;;  %v1180_v24 = vld [vmem:[#allocation8 + $0x88] sm:$0xff] }
 0x467   : > { %6355 = vmatprep.subr.bf16.mxu1 %v7307_v0  ;;  %v6398_v26 = vpack.c.bf16 %v1180_v24, %v1179_v23  ;;  %v1362_v24 = vld [vmem:[#allocation6 + $0x530] sm:$0xff] }
 0x46a   : > { %6357 = vmatpush3.bf16.msra.mxu1 %v6356_v27 }
 0x46b   : > { %6358 = vmatprep.subr.bf16.mxu1 %v7307_v0 }
 0x46e   : > { %6360 = vmatpush3.bf16.msra.mxu1 %v6359_v30  ;;  %v6401_v30 = vpack.c.bf16 %v1182_v29, %v1181_v28  ;;  %v1365_v28 = vld [vmem:[#allocation6 + $0x548] sm:$0xff] }
 0x46f   : > { %6361 = vmatprep.subr.bf16.mxu1 %v7307_v0 }
 0x472   : > { %6363 = vmatpush3.bf16.msra.mxu1 %v6362_v33  ;;  %v6404_v33 = vpack.c.bf16 %v1184_v32, %v1183_v31  ;;  %v1367_v31 = vld [vmem:[#allocation6 + $0x558] sm:$0xff] }
 0x473   : > { %6364 = vmatprep.subr.bf16.mxu1 %v7307_v0 }
 0x476   : > { %6366 = vmatpush3.bf16.msra.mxu1 %v6365_v36  ;;  %v6407_v36 = vpack.c.bf16 %v1186_v35, %v1185_v34  ;;  %v1369_v34 = vld [vmem:[#allocation6 + $0x568] sm:$0xff] }
 0x477   : > { %6367 = vmatprep.subr.bf16.mxu1 %v7307_v0 }
 0x47a   : > { %6369 = vmatpush3.bf16.msra.mxu1 %v6368_v39  ;;  %v6410_v39 = vpack.c.bf16 %v1188_v38, %v1187_v37  ;;  %v1371_v37 = vld [vmem:[#allocation6 + $0x578] sm:$0xff] }
 0x47b   : > { %6370 = vmatprep.subr.bf16.mxu1 %v7307_v0 }
 0x47e   : > { %6372 = vmatpush3.bf16.msra.mxu1 %v6371_v42  ;;  %v6413_v42 = vpack.c.bf16 %v1190_v41, %v1189_v40 }
 0x47f   : > { %5284 = vmatprep.subr.mxu1 %v7309_v1 }
 0x481   : > { %5247 = vmatmul.mubr.f32.vlgmr.msra.gmra.mrb[8].mxu1 %v7567_v50 }
 0x482   : > { %5286 = vmatprep.mubr.msk.f32.mxu1 %vm7308_vm0, %v7309_v1 }
 0x49b   : > { %v1019_v20 = vpop.f32.mrb[6].mxu0 }
 0x49c   : > { %v5283_v21 = vpop.f32.mrb[7].mxu0 }
 0x49d   : > { %v1360_v21 = vld [vmem:[#allocation6 + $0x520] sm:$0xff] }
 0x534   : > { %v7629_v45 = vpop.f32.mrb[6].mxu1 }
 0x535   : > { %v5178_v46 = vpop.f32.mrb[7].mxu1 }
 0x554   : > { %v932_v47 = vpop.f32.mrb[8].mxu1 }
 0x555   : > { %v5248_v48 = vpop.f32.mrb[9].mxu1  ;;  %5285 = vmatpush3.xpose.msra.mxu1 %v932_v47  ;;  %v1193_v47 = vld [vmem:[#allocation8 + $0xf0] sm:$0xff] }
 0x556   : > { %5289 = vmatprep.subr.mxu1 %v7309_v1  ;;  %v1194_v48 = vld [vmem:[#allocation8 + $0xf8] sm:$0xff] }
 0x557   : > { %v6419_v49 = vpack.c.bf16 %v1194_v48, %v1193_v47  ;;  %v1443_v47 = vld [vmem:[#allocation6 + $0x900] sm:$0xff]  ;;  %v1444_v48 = vld [vmem:[#allocation6 + $0x908] sm:$0xff] }
 0x558   : > { %5287 = vmatmul.mubr.f32.vlgmr.msra.gmra.mrb[10].mxu1 %v845_v43  ;;  %v1191_v43 = vld [vmem:[#allocation8 + $0xe0] sm:$0xff]  ;;  %v6470_v51 = vpack.c.bf16 %v1444_v48, %v1443_v47  ;;  %v1776_v48 = vld [vmem:[#allocation6 + $0x188] sm:$0xff] }
 0x559   : > { %5291 = vmatprep.mubr.msk.f32.mxu1 %vm7308_vm0, %v7309_v1  ;;  %5290 = vmatpush3.msra.mxu1 %v1019_v20  ;;  %v6416_v46 = vpack.c.bf16 %v1192_v44, %v1191_v43  ;;  %v1775_v47 = vld [vmem:[#allocation6 + $0x180] sm:$0xff] }
 0x55a   : > { %6397 = vmatprep.subr.bf16.mxu1 %v7307_v0 }
 0x62b   : > { %v1089_v12 = vpop.f32.mrb[10].mxu1 }
 0x62c   : > { %v5288_v13 = vpop.f32.mrb[11].mxu1  ;;  %v1093_v14 = vsel %vm587_vm1, %v1089_v12, -inf }
 0x62d   : > { %1094 = vmax.xlane.f32.xlu1 %v1093_v14  ;;  %v1356_v13 = vld [vmem:[#allocation6 + $0x500] sm:$0xff]  ;;  %v1357_v14 = vld [vmem:[#allocation6 + $0x508] sm:$0xff] }
 0x6ba   : > { %v1095_v15 = vpop.xlane.xlu1 %1094 }
 0x6bb   : > { %v1096_v16 = vsub.f32 %v1089_v12, %v1095_v15  ;;  %v6443_v12 = vpack.c.bf16 %v1284_v11, %v1283_v10  ;;  %v6446_v15 = vpack.c.bf16 %v1357_v14, %v1356_v13 }
 0x6bd   : > { %v1097_v17 = vmul.f32 1.442695, %v1096_v16  ;;  %6444 = vmatpush3.bf16.msra.mxu0 %v6443_v12  ;;  %v1358_v16 = vld [vmem:[#allocation6 + $0x510] sm:$0xff] }
 0x6be   : > { %6469 = vmatprep.subr.bf16.mxu0 %v7307_v0 }
 0x6bf   : > { %7083 = vpow2.f32 %v1097_v17  ;;  %v1359_v17 = vld [vmem:[#allocation6 + $0x518] sm:$0xff] }
 0x6c0   : > { %5362 = vmatmul.mubr.f32.vlgmr.msra.gmra.mrb[8].mxu0 %v7567_v50  ;;  %v6449_v20 = vpack.c.bf16 %v1359_v17, %v1358_v16 }
 0x6c1   : > { %5431 = vmatprep.mubr.msk.f32.mxu0 %vm7308_vm0, %v7309_v1  ;;  %6471 = vmatpush3.bf16.msra.mxu0 %v6470_v51  ;;  %v1777_v51 = vld [vmem:[#allocation6 + $0x190] sm:$0xff] }
 0x6c2   : > { %6472 = vmatprep.subr.bf16.mxu0 %v7307_v0 }
 0x6c9   : > { %v7084_v18 = vpop.eup %7083 }
 0x6ca   : > { %v1099_v19 = vsel %vm587_vm1, %v7084_v18, 0.0 }
 0x6cb   : > { %1100 = vadd.xlane.f32.xlu1 %v1099_v19 }
 0x758   : > { %v1101_v22 = vpop.xlane.xlu1 %1100 }
 0x759   : > { %7085 = vrcp.f32 %v1101_v22  ;;  %v1361_v22 = vld [vmem:[#allocation6 + $0x528] sm:$0xff] }
 0x75a   : > { %v6452_v23 = vpack.c.bf16 %v1361_v22, %v1360_v21 }
 0x763   : > { %v7086_v25 = vpop.eup %7085 }
 0x764   : > { %v1103_v27 = vmul.f32 %v7086_v25, %v7084_v18  ;;  %v1363_v25 = vld [vmem:[#allocation6 + $0x538] sm:$0xff] }
 0x766   : > { %5292 = vmatmul.mubr.msk.f32.vlgmr.msra.gmra.mrb[12].mxu1 %vm587_vm1, %v1103_v27  ;;  %v1364_v27 = vld [vmem:[#allocation6 + $0x540] sm:$0xff] }
 0x767   : > { %6399 = vmatpush3.bf16.msra.mxu1 %v6398_v26  ;;  %5326 = vmatprep.mubr.msk.f32.mxu1 %vm7308_vm0, %v7309_v1  ;;  %v6455_v26 = vpack.c.bf16 %v1363_v25, %v1362_v24  ;;  %v6458_v29 = vpack.c.bf16 %v1365_v28, %v1364_v27  ;;  %v1687_v24 = vld [vmem:[#allocation8 + $0x110] sm:$0xff]  ;;  %v1688_v25 = vld [vmem:[#allocation8 + $0x118] sm:$0xff]  ;;  %v1689_v27 = vld [vmem:[#allocation8 + $0x120] sm:$0xff] }
 0x768   : > { %6400 = vmatprep.subr.bf16.mxu1 %v7307_v0  ;;  %v1690_v28 = vld [vmem:[#allocation8 + $0x128] sm:$0xff] }
 0x76b   : > { %6402 = vmatpush3.bf16.msra.mxu1 %v6401_v30  ;;  %v1366_v30 = vld [vmem:[#allocation6 + $0x550] sm:$0xff] }
 0x76c   : > { %6403 = vmatprep.subr.bf16.mxu1 %v7307_v0  ;;  %v6461_v32 = vpack.c.bf16 %v1367_v31, %v1366_v30  ;;  %v1691_v30 = vld [vmem:[#allocation8 + $0x130] sm:$0xff]  ;;  %v1692_v31 = vld [vmem:[#allocation8 + $0x138] sm:$0xff] }
 0x76f   : > { %6405 = vmatpush3.bf16.msra.mxu1 %v6404_v33  ;;  %v1368_v33 = vld [vmem:[#allocation6 + $0x560] sm:$0xff] }
 0x770   : > { %6406 = vmatprep.subr.bf16.mxu1 %v7307_v0  ;;  %v6464_v35 = vpack.c.bf16 %v1369_v34, %v1368_v33  ;;  %v1693_v33 = vld [vmem:[#allocation8 + $0x140] sm:$0xff]  ;;  %v1694_v34 = vld [vmem:[#allocation8 + $0x148] sm:$0xff] }
 0x773   : > { %6408 = vmatpush3.bf16.msra.mxu1 %v6407_v36  ;;  %v1370_v36 = vld [vmem:[#allocation6 + $0x570] sm:$0xff] }
 0x774   : > { %6409 = vmatprep.subr.bf16.mxu1 %v7307_v0  ;;  %v6467_v38 = vpack.c.bf16 %v1371_v37, %v1370_v36  ;;  %v1695_v36 = vld [vmem:[#allocation8 + $0x150] sm:$0xff]  ;;  %v1696_v37 = vld [vmem:[#allocation8 + $0x158] sm:$0xff] }
 0x777   : > { %6411 = vmatpush3.bf16.msra.mxu1 %v6410_v39 }
 0x778   : > { %6412 = vmatprep.subr.bf16.mxu1 %v7307_v0 }
 0x77b   : > { %6414 = vmatpush3.bf16.msra.mxu1 %v6413_v42 }
 0x77c   : > { %6415 = vmatprep.subr.bf16.mxu1 %v7307_v0 }
 0x77f   : > { %6417 = vmatpush3.bf16.msra.mxu1 %v6416_v46 }
 0x780   : > { %6418 = vmatprep.subr.bf16.mxu1 %v7307_v0 }
 0x783   : > { %6420 = vmatpush3.bf16.msra.mxu1 %v6419_v49  ;;  %v1445_v49 = vld [vmem:[#allocation6 + $0x910] sm:$0xff] }
 0x784   : > { %6445 = vmatprep.subr.bf16.mxu1 %v7307_v0  ;;  %v6473_v53 = vpack.c.bf16 %v1446_v52, %v1445_v49  ;;  %v6518_v49 = vpack.c.bf16 %v1776_v48, %v1775_v47  ;;  %v1778_v52 = vld [vmem:[#allocation6 + $0x198] sm:$0xff] }
 0x785   : > { %v1952_v48 = vld [vmem:[#allocation6 + $0x998] sm:$0xff] }
 0x786   : > { %6474 = vmatpush3.bf16.msra.mxu0 %v6473_v53  ;;  %v6521_v53 = vpack.c.bf16 %v1778_v52, %v1777_v51  ;;  %v1954_v51 = vld [vmem:[#allocation6 + $0x9a8] sm:$0xff] }
 0x787   : > { %6475 = vmatprep.subr.bf16.mxu0 %v7307_v0 }
 0x793   : > { %v1351_v39 = vpop.f32.mrb[8].mxu0 }
 0x794   : > { %v5363_v40 = vpop.f32.mrb[9].mxu0 }
 0x795   : > { %v1698_v40 = vld [vmem:[#allocation8 + $0x168] sm:$0xff] }
 0x839   : > { %v1173_v18 = vpop.f32.mrb[12].mxu1 }
 0x83a   : > { %v5293_v19 = vpop.f32.mrb[13].mxu1  ;;  %5327 = vmatmul.mubr.f32.vlgmr.msra.gmra.mrb[14].mxu1 %v1173_v18 }
 0x83b   : > { %6447 = vmatpush3.bf16.msra.mxu1 %v6446_v15  ;;  %5396 = vmatprep.mubr.msk.f32.mxu1 %vm7308_vm0, %v7309_v1  ;;  %v1685_v19 = vld [vmem:[#allocation8 + $0x100] sm:$0xff] }
 0x83c   : > { %6448 = vmatprep.subr.bf16.mxu1 %v7307_v0 }
 0x83f   : > { %6450 = vmatpush3.bf16.msra.mxu1 %v6449_v20  ;;  %v1686_v20 = vld [vmem:[#allocation8 + $0x108] sm:$0xff] }
 0x840   : > { %6451 = vmatprep.subr.bf16.mxu1 %v7307_v0  ;;  %v6494_v22 = vpack.c.bf16 %v1686_v20, %v1685_v19  ;;  %v1868_v20 = vld [vmem:[#allocation6 + $0x5b0] sm:$0xff] }
 0x843   : > { %6453 = vmatpush3.bf16.msra.mxu1 %v6452_v23 }
 0x844   : > { %6454 = vmatprep.subr.bf16.mxu1 %v7307_v0 }
 0x847   : > { %6456 = vmatpush3.bf16.msra.mxu1 %v6455_v26  ;;  %v6497_v26 = vpack.c.bf16 %v1688_v25, %v1687_v24  ;;  %v1871_v24 = vld [vmem:[#allocation6 + $0x5c8] sm:$0xff] }
 0x848   : > { %6457 = vmatprep.subr.bf16.mxu1 %v7307_v0 }
 0x84b   : > { %6459 = vmatpush3.bf16.msra.mxu1 %v6458_v29  ;;  %v6500_v29 = vpack.c.bf16 %v1690_v28, %v1689_v27  ;;  %v1873_v27 = vld [vmem:[#allocation6 + $0x5d8] sm:$0xff] }
 0x84c   : > { %6460 = vmatprep.subr.bf16.mxu1 %v7307_v0 }
 0x84f   : > { %6462 = vmatpush3.bf16.msra.mxu1 %v6461_v32  ;;  %v6503_v32 = vpack.c.bf16 %v1692_v31, %v1691_v30  ;;  %v1875_v30 = vld [vmem:[#allocation6 + $0x5e8] sm:$0xff] }
 0x850   : > { %6463 = vmatprep.subr.bf16.mxu1 %v7307_v0 }
 0x853   : > { %6465 = vmatpush3.bf16.msra.mxu1 %v6464_v35  ;;  %v6506_v35 = vpack.c.bf16 %v1694_v34, %v1693_v33  ;;  %v1877_v33 = vld [vmem:[#allocation6 + $0x5f8] sm:$0xff] }
 0x854   : > { %6466 = vmatprep.subr.bf16.mxu1 %v7307_v0 }
 0x857   : > { %6468 = vmatpush3.bf16.msra.mxu1 %v6467_v38  ;;  %v6509_v38 = vpack.c.bf16 %v1696_v37, %v1695_v36 }
 0x858   : > { %5434 = vmatprep.subr.mxu1 %v7309_v1 }
 0x85a   : > { %5397 = vmatmul.mubr.f32.vlgmr.msra.gmra.mrb[16].mxu1 %v7567_v50 }
 0x85b   : > { %5436 = vmatprep.mubr.msk.f32.mxu1 %vm7308_vm0, %v7309_v1 }
 0x90d   : > { %v1261_v41 = vpop.f32.mrb[14].mxu1 }
 0x90e   : > { %v7684_v42 = vadd.f32 %v1261_v41, %v7629_v45  ;;  %v5328_v43 = vpop.f32.mrb[15].mxu1  ;;  %v1447_v45 = vld [vmem:[#allocation6 + $0x920] sm:$0xff] }
 0x90f   : > { %v6476_v55 = vpack.c.bf16 %v1448_v54, %v1447_v45  ;;  %v1699_v43 = vld [vmem:[#allocation8 + $0x170] sm:$0xff]  ;;  %v1779_v45 = vld [vmem:[#allocation6 + $0x1a0] sm:$0xff]  ;;  %v1780_v54 = vld [vmem:[#allocation6 + $0x1a8] sm:$0xff] }
 0x911   : > { %6477 = vmatpush3.bf16.msra.mxu0 %v6476_v55  ;;  %v6524_v55 = vpack.c.bf16 %v1780_v54, %v1779_v45  ;;  %v1956_v45 = vld [vmem:[#allocation6 + $0x9b8] sm:$0xff] }
 0x912   : > { %6478 = vmatprep.subr.bf16.mxu0 %v7307_v0 }
 0x915   : > { %6480 = vmatpush3.bf16.msra.mxu0 %v6479_v58  ;;  %v6527_v58 = vpack.c.bf16 %v1782_v57, %v1781_v56  ;;  %v1958_v56 = vld [vmem:[#allocation6 + $0x9c8] sm:$0xff] }
 0x916   : > { %6481 = vmatprep.subr.bf16.mxu0 %v7307_v0 }
 0x919   : > { %6483 = vmatpush3.bf16.msra.mxu0 %v6482_v61  ;;  %v6530_v61 = vpack.c.bf16 %v1784_v60, %v1783_v59  ;;  %v1960_v59 = vld [vmem:[#allocation6 + $0x9d8] sm:$0xff] }
 0x91a   : > { %6484 = vmatprep.subr.bf16.mxu0 %v7307_v0 }
 0x91d   : > { %6486 = vmatpush3.bf16.msra.mxu0 %v6485_v2  ;;  %v6533_v2 = vpack.c.bf16 %v1786_v63, %v1785_v62  ;;  %v1962_v62 = vld [vmem:[#allocation6 + $0x9e8] sm:$0xff] }
 0x91e   : > { %6487 = vmatprep.subr.bf16.mxu0 %v7307_v0 }
 0x921   : > { %6489 = vmatpush3.bf16.msra.mxu0 %v6488_v5  ;;  %v6536_v5 = vpack.c.bf16 %v1788_v4, %v1787_v3  ;;  %v1964_v3 = vld [vmem:[#allocation6 + $0x9f8] sm:$0xff] }
 0x922   : > { %6490 = vmatprep.subr.bf16.mxu0 %v7307_v0 }
 0x925   : > { %6492 = vmatpush3.bf16.msra.mxu0 %v6491_v8  ;;  %v6539_v8 = vpack.c.bf16 %v1790_v7, %v1789_v6 }
 0x926   : > { %6517 = vmatprep.subr.bf16.mxu0 %v7307_v0 }
 0x928   : > { %5432 = vmatmul.mubr.f32.vlgmr.msra.gmra.mrb[10].mxu0 %v7567_v50 }
 0x929   : > { %5511 = vmatprep.mubr.msk.f32.mxu0 %vm7308_vm0, %v7309_v1  ;;  %6519 = vmatpush3.bf16.msra.mxu0 %v6518_v49 }
 0x92a   : > { %6520 = vmatprep.subr.bf16.mxu0 %v7307_v0 }
 0x92d   : > { %v1438_v44 = vpop.f32.mrb[16].mxu1  ;;  %6522 = vmatpush3.bf16.msra.mxu0 %v6521_v53  ;;  %v1955_v53 = vld [vmem:[#allocation6 + $0x9b0] sm:$0xff] }
 0x92e   : > { %v5398_v46 = vpop.f32.mrb[17].mxu1  ;;  %5435 = vmatpush3.xpose.msra.mxu1 %v1438_v44  ;;  %v1700_v44 = vld [vmem:[#allocation8 + $0x178] sm:$0xff]  ;;  %6523 = vmatprep.subr.bf16.mxu0 %v7307_v0  ;;  %v6575_v54 = vpack.c.bf16 %v1956_v45, %v1955_v53  ;;  %v2287_v45 = vld [vmem:[#allocation6 + $0x230] sm:$0xff] }
 0x92f   : > { %5439 = vmatprep.subr.mxu1 %v7309_v1  ;;  %v6515_v46 = vpack.c.bf16 %v1700_v44, %v1699_v43  ;;  %v1949_v43 = vld [vmem:[#allocation6 + $0x980] sm:$0xff]  ;;  %v1950_v44 = vld [vmem:[#allocation6 + $0x988] sm:$0xff] }
 0x930   : > { %v6566_v47 = vpack.c.bf16 %v1950_v44, %v1949_v43  ;;  %v2281_v44 = vld [vmem:[#allocation6 + $0x200] sm:$0xff] }
 0x931   : > { %5437 = vmatmul.mubr.f32.vlgmr.msra.gmra.mrb[18].mxu1 %v1351_v39  ;;  %v1697_v39 = vld [vmem:[#allocation8 + $0x160] sm:$0xff]  ;;  %6525 = vmatpush3.bf16.msra.mxu0 %v6524_v55 }
 0x932   : > { %5441 = vmatprep.mubr.msk.f32.mxu1 %vm7308_vm0, %v7309_v1  ;;  %v6512_v41 = vpack.c.bf16 %v1698_v40, %v1697_v39  ;;  %6526 = vmatprep.subr.bf16.mxu0 %v7307_v0  ;;  %v1957_v55 = vld [vmem:[#allocation6 + $0x9c0] sm:$0xff] }
 0x933   : > { %v6578_v57 = vpack.c.bf16 %v1958_v56, %v1957_v55  ;;  %v2289_v56 = vld [vmem:[#allocation6 + $0x240] sm:$0xff] }
 0x935   : > { %6528 = vmatpush3.bf16.msra.mxu0 %v6527_v58  ;;  %v1959_v58 = vld [vmem:[#allocation6 + $0x9d0] sm:$0xff] }
 0x936   : > { %6529 = vmatprep.subr.bf16.mxu0 %v7307_v0  ;;  %v6581_v60 = vpack.c.bf16 %v1960_v59, %v1959_v58  ;;  %v2291_v59 = vld [vmem:[#allocation6 + $0x250] sm:$0xff] }
 0x939   : > { %6531 = vmatpush3.bf16.msra.mxu0 %v6530_v61  ;;  %v1961_v61 = vld [vmem:[#allocation6 + $0x9e0] sm:$0xff] }
 0x93a   : > { %6532 = vmatprep.subr.bf16.mxu0 %v7307_v0  ;;  %v6584_v63 = vpack.c.bf16 %v1962_v62, %v1961_v61  ;;  %v2293_v62 = vld [vmem:[#allocation6 + $0x260] sm:$0xff] }
 0x93d   : > { %6534 = vmatpush3.bf16.msra.mxu0 %v6533_v2  ;;  %v1963_v2 = vld [vmem:[#allocation6 + $0x9f0] sm:$0xff] }
 0x93e   : > { %6535 = vmatprep.subr.bf16.mxu0 %v7307_v0  ;;  %v6587_v4 = vpack.c.bf16 %v1964_v3, %v1963_v2  ;;  %v2295_v3 = vld [vmem:[#allocation6 + $0x270] sm:$0xff] }
 0x941   : > { %6537 = vmatpush3.bf16.msra.mxu0 %v6536_v5 }
 0x942   : > { %6538 = vmatprep.subr.bf16.mxu0 %v7307_v0 }
 0x945   : > { %6540 = vmatpush3.bf16.msra.mxu0 %v6539_v8 }
 0x946   : > { %6565 = vmatprep.subr.bf16.mxu0 %v7307_v0 }
 0x9fb   : > { %v1525_v17 = vpop.f32.mrb[10].mxu0 }
 0x9fc   : > { %v5433_v18 = vpop.f32.mrb[11].mxu0  ;;  %5440 = vmatpush3.msra.mxu1 %v1525_v17 }
 0x9fd   : > { %6493 = vmatprep.subr.bf16.mxu1 %v7307_v0  ;;  %v1866_v18 = vld [vmem:[#allocation6 + $0x5a0] sm:$0xff] }
 0xa04   : > { %v1595_v9 = vpop.f32.mrb[18].mxu1 }
 0xa05   : > { %v5438_v10 = vpop.f32.mrb[19].mxu1  ;;  %v1599_v11 = vsel %vm587_vm1, %v1595_v9, -inf }
 0xa06   : > { %1600 = vmax.xlane.f32.xlu0 %v1599_v11  ;;  %v1862_v10 = vld [vmem:[#allocation6 + $0x580] sm:$0xff]  ;;  %v1863_v11 = vld [vmem:[#allocation6 + $0x588] sm:$0xff] }
 0xa93   : > { %v1601_v12 = vpop.xlane.xlu0 %1600 }
 0xa94   : > { %v1602_v13 = vsub.f32 %v1595_v9, %v1601_v12  ;;  %v7723_v9 = vld [vmem:[%s7532_s20] sm:$0xff]  ;;  %v6542_v12 = vpack.c.bf16 %v1863_v11, %v1862_v10 }
 0xa95   : > { %5512 = vmatmul.mubr.f32.vlgmr.msra.gmra.mrb[12].mxu0 %v7723_v9 }
 0xa96   : > { %v1603_v14 = vmul.f32 1.442695, %v1602_v13  ;;  %5581 = vmatprep.mubr.msk.f32.mxu0 %vm7308_vm0, %v7309_v1  ;;  %v1864_v13 = vld [vmem:[#allocation6 + $0x590] sm:$0xff]  ;;  %6567 = vmatpush3.bf16.msra.mxu0 %v6566_v47 }
 0xa97   : > { %6568 = vmatprep.subr.bf16.mxu0 %v7307_v0 }
 0xa98   : > { %7087 = vpow2.f32 %v1603_v14  ;;  %v1865_v14 = vld [vmem:[#allocation6 + $0x598] sm:$0xff] }
 0xa99   : > { %v6545_v17 = vpack.c.bf16 %v1865_v14, %v1864_v13 }
 0xaa2   : > { %v7088_v15 = vpop.eup %7087 }
 0xaa3   : > { %v1605_v16 = vsel %vm587_vm1, %v7088_v15, 0.0 }
 0xaa4   : > { %1606 = vadd.xlane.f32.xlu1 %v1605_v16 }
 0xb31   : > { %v1607_v50 = vpop.xlane.xlu1 %1606 }
 0xb32   : > { %7089 = vrcp.f32 %v1607_v50  ;;  %v1867_v50 = vld [vmem:[#allocation6 + $0x5a8] sm:$0xff] }
 0xb33   : > { %v6548_v19 = vpack.c.bf16 %v1867_v50, %v1866_v18  ;;  %v2193_v18 = vld [vmem:[#allocation8 + $0x190] sm:$0xff] }
 0xb3c   : > { %v7090_v21 = vpop.eup %7089 }
 0xb3d   : > { %v1609_v23 = vmul.f32 %v7090_v21, %v7088_v15  ;;  %v1869_v21 = vld [vmem:[#allocation6 + $0x5b8] sm:$0xff] }
 0xb3f   : > { %5442 = vmatmul.mubr.msk.f32.vlgmr.msra.gmra.mrb[20].mxu1 %vm587_vm1, %v1609_v23  ;;  %v1870_v23 = vld [vmem:[#allocation6 + $0x5c0] sm:$0xff] }
 0xb40   : > { %6495 = vmatpush3.bf16.msra.mxu1 %v6494_v22  ;;  %5476 = vmatprep.mubr.msk.f32.mxu1 %vm7308_vm0, %v7309_v1  ;;  %v6551_v22 = vpack.c.bf16 %v1869_v21, %v1868_v20  ;;  %v6554_v25 = vpack.c.bf16 %v1871_v24, %v1870_v23  ;;  %v2195_v21 = vld [vmem:[#allocation8 + $0x1a0] sm:$0xff]  ;;  %v2197_v24 = vld [vmem:[#allocation8 + $0x1b0] sm:$0xff] }
 0xb41   : > { %6496 = vmatprep.subr.bf16.mxu1 %v7307_v0 }
 0xb44   : > { %6498 = vmatpush3.bf16.msra.mxu1 %v6497_v26  ;;  %v1872_v26 = vld [vmem:[#allocation6 + $0x5d0] sm:$0xff] }
 0xb45   : > { %6499 = vmatprep.subr.bf16.mxu1 %v7307_v0  ;;  %v6557_v28 = vpack.c.bf16 %v1873_v27, %v1872_v26  ;;  %v2199_v27 = vld [vmem:[#allocation8 + $0x1c0] sm:$0xff] }
 0xb48   : > { %6501 = vmatpush3.bf16.msra.mxu1 %v6500_v29  ;;  %v1874_v29 = vld [vmem:[#allocation6 + $0x5e0] sm:$0xff] }
 0xb49   : > { %6502 = vmatprep.subr.bf16.mxu1 %v7307_v0  ;;  %v6560_v31 = vpack.c.bf16 %v1875_v30, %v1874_v29  ;;  %v2201_v30 = vld [vmem:[#allocation8 + $0x1d0] sm:$0xff] }
 0xb4c   : > { %6504 = vmatpush3.bf16.msra.mxu1 %v6503_v32  ;;  %v1876_v32 = vld [vmem:[#allocation6 + $0x5f0] sm:$0xff] }
 0xb4d   : > { %6505 = vmatprep.subr.bf16.mxu1 %v7307_v0  ;;  %v6563_v34 = vpack.c.bf16 %v1877_v33, %v1876_v32  ;;  %v2203_v33 = vld [vmem:[#allocation8 + $0x1e0] sm:$0xff] }
 0xb50   : > { %6507 = vmatpush3.bf16.msra.mxu1 %v6506_v35 }
 0xb51   : > { %6508 = vmatprep.subr.bf16.mxu1 %v7307_v0 }
 0xb54   : > { %6510 = vmatpush3.bf16.msra.mxu1 %v6509_v38 }
 0xb55   : > { %6511 = vmatprep.subr.bf16.mxu1 %v7307_v0 }
 0xb58   : > { %6513 = vmatpush3.bf16.msra.mxu1 %v6512_v41 }
 0xb59   : > { %6514 = vmatprep.subr.bf16.mxu1 %v7307_v0 }
 0xb5c   : > { %6516 = vmatpush3.bf16.msra.mxu1 %v6515_v46  ;;  %v1951_v46 = vld [vmem:[#allocation6 + $0x990] sm:$0xff] }
 0xb5d   : > { %6541 = vmatprep.subr.bf16.mxu1 %v7307_v0  ;;  %v6569_v49 = vpack.c.bf16 %v1952_v48, %v1951_v46  ;;  %v2282_v46 = vld [vmem:[#allocation6 + $0x208] sm:$0xff]  ;;  %v2283_v48 = vld [vmem:[#allocation6 + $0x210] sm:$0xff] }
 0xb5e   : > { %v6614_v47 = vpack.c.bf16 %v2282_v46, %v2281_v44  ;;  %v2462_v44 = vld [vmem:[#allocation6 + $0xa38] sm:$0xff] }
 0xb5f   : > { %6570 = vmatpush3.bf16.msra.mxu0 %v6569_v49  ;;  %v2284_v49 = vld [vmem:[#allocation6 + $0x218] sm:$0xff] }
 0xb60   : > { %6571 = vmatprep.subr.bf16.mxu0 %v7307_v0 }
 0xb68   : > { %v1857_v35 = vpop.f32.mrb[12].mxu0 }
 0xb69   : > { %v5513_v36 = vpop.f32.mrb[13].mxu0 }
 0xb6a   : > { %v2205_v36 = vld [vmem:[#allocation8 + $0x1f0] sm:$0xff] }
 0xc12   : > { %v1679_v15 = vpop.f32.mrb[20].mxu1 }
 0xc13   : > { %v5443_v16 = vpop.f32.mrb[21].mxu1  ;;  %5477 = vmatmul.mubr.f32.vlgmr.msra.gmra.mrb[22].mxu1 %v1679_v15 }
 0xc14   : > { %6543 = vmatpush3.bf16.msra.mxu1 %v6542_v12  ;;  %5546 = vmatprep.mubr.msk.f32.mxu1 %vm7308_vm0, %v7309_v1  ;;  %v2191_v16 = vld [vmem:[#allocation8 + $0x180] sm:$0xff] }
 0xc15   : > { %6544 = vmatprep.subr.bf16.mxu1 %v7307_v0 }
 0xc18   : > { %6546 = vmatpush3.bf16.msra.mxu1 %v6545_v17  ;;  %v2192_v17 = vld [vmem:[#allocation8 + $0x188] sm:$0xff] }
 0xc19   : > { %6547 = vmatprep.subr.bf16.mxu1 %v7307_v0  ;;  %v6590_v50 = vpack.c.bf16 %v2192_v17, %v2191_v16  ;;  %v2370_v16 = vld [vmem:[#allocation6 + $0x610] sm:$0xff]  ;;  %v2371_v17 = vld [vmem:[#allocation6 + $0x618] sm:$0xff] }
 0xc1c   : > { %6549 = vmatpush3.bf16.msra.mxu1 %v6548_v19  ;;  %v2194_v19 = vld [vmem:[#allocation8 + $0x198] sm:$0xff] }
 0xc1d   : > { %6550 = vmatprep.subr.bf16.mxu1 %v7307_v0  ;;  %v6593_v20 = vpack.c.bf16 %v2194_v19, %v2193_v18  ;;  %v6641_v19 = vpack.c.bf16 %v2371_v17, %v2370_v16  ;;  %v2700_v17 = vld [vmem:[#allocation8 + $0x218] sm:$0xff] }
 0xc20   : > { %6552 = vmatpush3.bf16.msra.mxu1 %v6551_v22  ;;  %v2196_v22 = vld [vmem:[#allocation8 + $0x1a8] sm:$0xff] }
 0xc21   : > { %6553 = vmatprep.subr.bf16.mxu1 %v7307_v0  ;;  %v6596_v23 = vpack.c.bf16 %v2196_v22, %v2195_v21  ;;  %v2373_v21 = vld [vmem:[#allocation6 + $0x628] sm:$0xff] }
 0xc24   : > { %6555 = vmatpush3.bf16.msra.mxu1 %v6554_v25  ;;  %v2198_v25 = vld [vmem:[#allocation8 + $0x1b8] sm:$0xff] }
 0xc25   : > { %6556 = vmatprep.subr.bf16.mxu1 %v7307_v0  ;;  %v6599_v26 = vpack.c.bf16 %v2198_v25, %v2197_v24  ;;  %v2375_v24 = vld [vmem:[#allocation6 + $0x638] sm:$0xff] }
 0xc28   : > { %6558 = vmatpush3.bf16.msra.mxu1 %v6557_v28  ;;  %v2200_v28 = vld [vmem:[#allocation8 + $0x1c8] sm:$0xff] }
 0xc29   : > { %6559 = vmatprep.subr.bf16.mxu1 %v7307_v0  ;;  %v6602_v29 = vpack.c.bf16 %v2200_v28, %v2199_v27  ;;  %v2377_v27 = vld [vmem:[#allocation6 + $0x648] sm:$0xff] }
 0xc2c   : > { %6561 = vmatpush3.bf16.msra.mxu1 %v6560_v31  ;;  %v2202_v31 = vld [vmem:[#allocation8 + $0x1d8] sm:$0xff] }
 0xc2d   : > { %6562 = vmatprep.subr.bf16.mxu1 %v7307_v0  ;;  %v6605_v32 = vpack.c.bf16 %v2202_v31, %v2201_v30  ;;  %v2379_v30 = vld [vmem:[#allocation6 + $0x658] sm:$0xff] }
 0xc30   : > { %6564 = vmatpush3.bf16.msra.mxu1 %v6563_v34  ;;  %v2204_v34 = vld [vmem:[#allocation8 + $0x1e8] sm:$0xff] }
 0xc31   : > { %5584 = vmatprep.subr.mxu1 %v7309_v1 }
 0xc33   : > { %5547 = vmatmul.mubr.f32.vlgmr.msra.gmra.mrb[24].mxu1 %v7723_v9 }
 0xc34   : > { %5586 = vmatprep.mubr.msk.f32.mxu1 %vm7308_vm0, %v7309_v1 }
 0xce6   : > { %v1767_v37 = vpop.f32.mrb[22].mxu1 }
 0xce7   : > { %v7742_v38 = vadd.f32 %v1767_v37, %v7684_v42  ;;  %v5478_v39 = vpop.f32.mrb[23].mxu1  ;;  %v1953_v42 = vld [vmem:[#allocation6 + $0x9a0] sm:$0xff]  ;;  %v2206_v37 = vld [vmem:[#allocation8 + $0x1f8] sm:$0xff] }
 0xce8   : > { %v6572_v52 = vpack.c.bf16 %v1954_v51, %v1953_v42  ;;  %v6611_v39 = vpack.c.bf16 %v2206_v37, %v2205_v36  ;;  %v6617_v42 = vpack.c.bf16 %v2284_v49, %v2283_v48  ;;  %v2285_v51 = vld [vmem:[#allocation6 + $0x220] sm:$0xff]  ;;  %v2383_v36 = vld [vmem:[#allocation6 + $0x678] sm:$0xff]  ;;  %v2464_v48 = vld [vmem:[#allocation6 + $0xa48] sm:$0xff] }
 0xcea   : > { %6573 = vmatpush3.bf16.msra.mxu0 %v6572_v52  ;;  %v2286_v52 = vld [vmem:[#allocation6 + $0x228] sm:$0xff] }
 0xceb   : > { %6574 = vmatprep.subr.bf16.mxu0 %v7307_v0  ;;  %v6620_v53 = vpack.c.bf16 %v2286_v52, %v2285_v51  ;;  %v2466_v51 = vld [vmem:[#allocation6 + $0xa58] sm:$0xff] }
 0xcee   : > { %6576 = vmatpush3.bf16.msra.mxu0 %v6575_v54  ;;  %v2288_v54 = vld [vmem:[#allocation6 + $0x238] sm:$0xff] }
 0xcef   : > { %6577 = vmatprep.subr.bf16.mxu0 %v7307_v0  ;;  %v6623_v55 = vpack.c.bf16 %v2288_v54, %v2287_v45  ;;  %v2468_v45 = vld [vmem:[#allocation6 + $0xa68] sm:$0xff] }
 0xcf2   : > { %6579 = vmatpush3.bf16.msra.mxu0 %v6578_v57  ;;  %v2290_v57 = vld [vmem:[#allocation6 + $0x248] sm:$0xff] }
 0xcf3   : > { %6580 = vmatprep.subr.bf16.mxu0 %v7307_v0  ;;  %v6626_v58 = vpack.c.bf16 %v2290_v57, %v2289_v56  ;;  %v2470_v56 = vld [vmem:[#allocation6 + $0xa78] sm:$0xff] }
 0xcf6   : > { %6582 = vmatpush3.bf16.msra.mxu0 %v6581_v60  ;;  %v2292_v60 = vld [vmem:[#allocation6 + $0x258] sm:$0xff] }
 0xcf7   : > { %6583 = vmatprep.subr.bf16.mxu0 %v7307_v0  ;;  %v6629_v61 = vpack.c.bf16 %v2292_v60, %v2291_v59 }
 0xcfa   : > { %6585 = vmatpush3.bf16.msra.mxu0 %v6584_v63  ;;  %v2294_v63 = vld [vmem:[#allocation6 + $0x268] sm:$0xff] }
 0xcfb   : > { %6586 = vmatprep.subr.bf16.mxu0 %v7307_v0  ;;  %v6632_v2 = vpack.c.bf16 %v2294_v63, %v2293_v62 }
 0xcfe   : > { %6588 = vmatpush3.bf16.msra.mxu0 %v6587_v4  ;;  %v2296_v4 = vld [vmem:[#allocation6 + $0x278] sm:$0xff] }
 0xcff   : > { %6589 = vmatprep.subr.bf16.mxu0 %v7307_v0 }
 0xd01   : > { %5582 = vmatmul.mubr.f32.vlgmr.msra.gmra.mrb[14].mxu0 %v7723_v9 }
 0xd02   : > { %5626 = vmatprep.mubr.msk.f32.mxu0 %vm7308_vm0, %v7309_v1  ;;  %6591 = vmatpush3.bf16.msra.mxu0 %v6590_v50 }
 0xd03   : > { %6592 = vmatprep.subr.bf16.mxu0 %v7307_v0 }
 0xd06   : > { %v1944_v40 = vpop.f32.mrb[24].mxu1  ;;  %6594 = vmatpush3.bf16.msra.mxu0 %v6593_v20  ;;  %v2372_v20 = vld [vmem:[#allocation6 + $0x620] sm:$0xff] }
 0xd07   : > { %v5548_v41 = vpop.f32.mrb[25].mxu1  ;;  %5585 = vmatpush3.xpose.msra.mxu1 %v1944_v40  ;;  %6595 = vmatprep.subr.bf16.mxu0 %v7307_v0  ;;  %v6644_v22 = vpack.c.bf16 %v2373_v21, %v2372_v20  ;;  %v2703_v21 = vld [vmem:[#allocation8 + $0x230] sm:$0xff] }
 0xd08   : > { %5589 = vmatprep.subr.mxu1 %v7309_v1 }
 0xd0a   : > { %5587 = vmatmul.mubr.f32.vlgmr.msra.gmra.mrb[26].mxu1 %v1857_v35  ;;  %6597 = vmatpush3.bf16.msra.mxu0 %v6596_v23  ;;  %v6608_v35 = vpack.c.bf16 %v2204_v34, %v2203_v33  ;;  %v2374_v23 = vld [vmem:[#allocation6 + $0x630] sm:$0xff]  ;;  %v2381_v33 = vld [vmem:[#allocation6 + $0x668] sm:$0xff] }
 0xd0b   : > { %5591 = vmatprep.mubr.msk.f32.mxu1 %vm7308_vm0, %v7309_v1  ;;  %6598 = vmatprep.subr.bf16.mxu0 %v7307_v0  ;;  %v6647_v25 = vpack.c.bf16 %v2375_v24, %v2374_v23  ;;  %v2705_v24 = vld [vmem:[#allocation8 + $0x240] sm:$0xff] }
 0xd0e   : > { %6600 = vmatpush3.bf16.msra.mxu0 %v6599_v26  ;;  %v2376_v26 = vld [vmem:[#allocation6 + $0x640] sm:$0xff] }
 0xd0f   : > { %6601 = vmatprep.subr.bf16.mxu0 %v7307_v0  ;;  %v6650_v28 = vpack.c.bf16 %v2377_v27, %v2376_v26  ;;  %v2707_v27 = vld [vmem:[#allocation8 + $0x250] sm:$0xff] }
 0xd12   : > { %6603 = vmatpush3.bf16.msra.mxu0 %v6602_v29  ;;  %v2378_v29 = vld [vmem:[#allocation6 + $0x650] sm:$0xff] }
 0xd13   : > { %6604 = vmatprep.subr.bf16.mxu0 %v7307_v0  ;;  %v6653_v31 = vpack.c.bf16 %v2379_v30, %v2378_v29  ;;  %v2709_v30 = vld [vmem:[#allocation8 + $0x260] sm:$0xff] }
 0xd16   : > { %6606 = vmatpush3.bf16.msra.mxu0 %v6605_v32  ;;  %v2380_v32 = vld [vmem:[#allocation6 + $0x660] sm:$0xff] }
 0xd17   : > { %6607 = vmatprep.subr.bf16.mxu0 %v7307_v0  ;;  %v6656_v34 = vpack.c.bf16 %v2381_v33, %v2380_v32  ;;  %v2711_v33 = vld [vmem:[#allocation8 + $0x270] sm:$0xff] }
 0xd1a   : > { %6609 = vmatpush3.bf16.msra.mxu0 %v6608_v35  ;;  %v2382_v35 = vld [vmem:[#allocation6 + $0x670] sm:$0xff] }
 0xd1b   : > { %6610 = vmatprep.subr.bf16.mxu0 %v7307_v0  ;;  %v6659_v37 = vpack.c.bf16 %v2383_v36, %v2382_v35 }
 0xd1e   : > { %6612 = vmatpush3.bf16.msra.mxu0 %v6611_v39  ;;  %v2459_v39 = vld [vmem:[#allocation6 + $0xa20] sm:$0xff] }
 0xd1f   : > { %6637 = vmatprep.subr.bf16.mxu0 %v7307_v0 }
 0xdd4   : > { %v2031_v14 = vpop.f32.mrb[14].mxu0 }
 0xdd5   : > { %v5583_v15 = vpop.f32.mrb[15].mxu0  ;;  %5590 = vmatpush3.msra.mxu1 %v2031_v14  ;;  %v2369_v14 = vld [vmem:[#allocation6 + $0x608] sm:$0xff] }
 0xdd6   : > { %6613 = vmatprep.subr.bf16.mxu1 %v7307_v0 }
 0xddd   : > { %v2101_v5 = vpop.f32.mrb[26].mxu1 }
 0xdde   : > { %v5588_v6 = vpop.f32.mrb[27].mxu1  ;;  %v2105_v7 = vsel %vm587_vm1, %v2101_v5, -inf }
 0xddf   : > { %2106 = vmax.xlane.f32.xlu0 %v2105_v7  ;;  %v2455_v6 = vld [vmem:[#allocation6 + $0xa00] sm:$0xff]  ;;  %v2456_v7 = vld [vmem:[#allocation6 + $0xa08] sm:$0xff] }
 0xe6c   : > { %v2107_v8 = vpop.xlane.xlu0 %2106 }
 0xe6d   : > { %v2108_v10 = vsub.f32 %v2101_v5, %v2107_v8  ;;  %v6635_v5 = vpack.c.bf16 %v2296_v4, %v2295_v3  ;;  %v2457_v8 = vld [vmem:[#allocation6 + $0xa10] sm:$0xff] }
 0xe6f   : > { %v2109_v11 = vmul.f32 1.442695, %v2108_v10  ;;  %v6662_v10 = vpack.c.bf16 %v2456_v7, %v2455_v6 }
 0xe71   : > { %7091 = vpow2.f32 %v2109_v11  ;;  %v2458_v11 = vld [vmem:[#allocation6 + $0xa18] sm:$0xff] }
 0xe7b   : > { %v7092_v12 = vpop.eup %7091 }
 0xe7c   : > { %v2111_v13 = vsel %vm587_vm1, %v7092_v12, 0.0 }
 0xe7d   : > { %2112 = vadd.xlane.f32.xlu1 %v2111_v13  ;;  %v2368_v13 = vld [vmem:[#allocation6 + $0x600] sm:$0xff] }
 0xe7e   : > { %v6638_v15 = vpack.c.bf16 %v2369_v14, %v2368_v13  ;;  %v2697_v13 = vld [vmem:[#allocation8 + $0x200] sm:$0xff]  ;;  %v2698_v14 = vld [vmem:[#allocation8 + $0x208] sm:$0xff] }
 0xe7f   : > { %v6686_v16 = vpack.c.bf16 %v2698_v14, %v2697_v13  ;;  %v2876_v13 = vld [vmem:[#allocation6 + $0x690] sm:$0xff]  ;;  %v2877_v14 = vld [vmem:[#allocation6 + $0x698] sm:$0xff] }
 0xf0a   : > { %v2113_v40 = vpop.xlane.xlu1 %2112 }
 0xf0b   : > { %7093 = vrcp.f32 %v2113_v40  ;;  %v2460_v40 = vld [vmem:[#allocation6 + $0xa28] sm:$0xff] }
 0xf15   : > { %v7094_v41 = vpop.eup %7093 }
 0xf16   : > { %v2115_v43 = vmul.f32 %v7094_v41, %v7092_v12  ;;  %v6665_v12 = vpack.c.bf16 %v2458_v11, %v2457_v8  ;;  %v2461_v41 = vld [vmem:[#allocation6 + $0xa30] sm:$0xff] }
 0xf17   : > { %v6671_v46 = vpack.c.bf16 %v2462_v44, %v2461_v41  ;;  %v2788_v41 = vld [vmem:[#allocation6 + $0x288] sm:$0xff]  ;;  %v2789_v44 = vld [vmem:[#allocation6 + $0x290] sm:$0xff] }
 0xf18   : > { %5592 = vmatmul.mubr.msk.f32.vlgmr.msra.gmra.mrb[28].mxu1 %vm587_vm1, %v2115_v43  ;;  %v6668_v43 = vpack.c.bf16 %v2460_v40, %v2459_v39  ;;  %v2787_v40 = vld [vmem:[#allocation6 + $0x280] sm:$0xff] }
 0xf19   : > { %5661 = vmatprep.mubr.msk.f32.mxu1 %vm7308_vm0, %v7309_v1  ;;  %6615 = vmatpush3.bf16.msra.mxu1 %v6614_v47  ;;  %v2463_v47 = vld [vmem:[#allocation6 + $0xa40] sm:$0xff] }
 0xf1a   : > { %6616 = vmatprep.subr.bf16.mxu1 %v7307_v0  ;;  %v6674_v49 = vpack.c.bf16 %v2464_v48, %v2463_v47  ;;  %v2791_v48 = vld [vmem:[#allocation6 + $0x2a0] sm:$0xff] }
 0xf1d   : > { %6618 = vmatpush3.bf16.msra.mxu1 %v6617_v42  ;;  %v2465_v42 = vld [vmem:[#allocation6 + $0xa50] sm:$0xff] }
 0xf1e   : > { %6619 = vmatprep.subr.bf16.mxu1 %v7307_v0  ;;  %v6677_v52 = vpack.c.bf16 %v2466_v51, %v2465_v42  ;;  %v2793_v51 = vld [vmem:[#allocation6 + $0x2b0] sm:$0xff] }
 0xf21   : > { %6621 = vmatpush3.bf16.msra.mxu1 %v6620_v53  ;;  %v2467_v53 = vld [vmem:[#allocation6 + $0xa60] sm:$0xff] }
 0xf22   : > { %6622 = vmatprep.subr.bf16.mxu1 %v7307_v0  ;;  %v6680_v54 = vpack.c.bf16 %v2468_v45, %v2467_v53  ;;  %v2795_v45 = vld [vmem:[#allocation6 + $0x2c0] sm:$0xff] }
 0xf25   : > { %6624 = vmatpush3.bf16.msra.mxu1 %v6623_v55  ;;  %v2469_v55 = vld [vmem:[#allocation6 + $0xa70] sm:$0xff] }
 0xf26   : > { %6625 = vmatprep.subr.bf16.mxu1 %v7307_v0  ;;  %v6683_v57 = vpack.c.bf16 %v2470_v56, %v2469_v55  ;;  %v2797_v56 = vld [vmem:[#allocation6 + $0x2d0] sm:$0xff] }
 0xf29   : > { %6627 = vmatpush3.bf16.msra.mxu1 %v6626_v58 }
 0xf2a   : > { %6628 = vmatprep.subr.bf16.mxu1 %v7307_v0 }
 0xf2d   : > { %6630 = vmatpush3.bf16.msra.mxu1 %v6629_v61 }
 0xf2e   : > { %6631 = vmatprep.subr.bf16.mxu1 %v7307_v0 }
 0xf31   : > { %6633 = vmatpush3.bf16.msra.mxu1 %v6632_v2 }
 0xf32   : > { %6634 = vmatprep.subr.bf16.mxu1 %v7307_v0 }
 0xf35   : > { %6636 = vmatpush3.bf16.msra.mxu1 %v6635_v5 }
 0xf36   : > { %6661 = vmatprep.subr.bf16.mxu1 %v7307_v0 }
 0xf38   : > { %5662 = vmatmul.mubr.f32.vlgmr.msra.gmra.mrb[30].mxu1 %v7723_v9 }
 0xf39   : > { %6663 = vmatpush3.bf16.msra.mxu1 %v6662_v10  ;;  %5731 = vmatprep.mubr.msk.f32.mxu1 %vm7308_vm0, %v7309_v1 }
 0xf3a   : > { %6664 = vmatprep.subr.bf16.mxu1 %v7307_v0 }
 0xf3d   : > { %6666 = vmatpush3.bf16.msra.mxu1 %v6665_v12 }
 0xf3e   : > { %6667 = vmatprep.subr.bf16.mxu1 %v7307_v0 }
 0xf41   : > { %6669 = vmatpush3.bf16.msra.mxu1 %v6668_v43  ;;  %v6710_v43 = vpack.c.bf16 %v2788_v41, %v2787_v40  ;;  %v2968_v40 = vld [vmem:[#allocation6 + $0xab8] sm:$0xff] }
 0xf42   : > { %6670 = vmatprep.subr.bf16.mxu1 %v7307_v0 }
 0xf45   : > { %6672 = vmatpush3.bf16.msra.mxu1 %v6671_v46  ;;  %v2790_v46 = vld [vmem:[#allocation6 + $0x298] sm:$0xff] }
 0xf46   : > { %6673 = vmatprep.subr.bf16.mxu1 %v7307_v0  ;;  %v6713_v47 = vpack.c.bf16 %v2790_v46, %v2789_v44  ;;  %v2970_v44 = vld [vmem:[#allocation6 + $0xac8] sm:$0xff] }
 0xf49   : > { %6675 = vmatpush3.bf16.msra.mxu1 %v6674_v49  ;;  %v2792_v49 = vld [vmem:[#allocation6 + $0x2a8] sm:$0xff] }
 0xf4a   : > { %6676 = vmatprep.subr.bf16.mxu1 %v7307_v0  ;;  %v6716_v42 = vpack.c.bf16 %v2792_v49, %v2791_v48  ;;  %v2972_v48 = vld [vmem:[#allocation6 + $0xad8] sm:$0xff] }
 0xf4d   : > { %6678 = vmatpush3.bf16.msra.mxu1 %v6677_v52  ;;  %v2794_v52 = vld [vmem:[#allocation6 + $0x2b8] sm:$0xff] }
 0xf4e   : > { %6679 = vmatprep.subr.bf16.mxu1 %v7307_v0  ;;  %v6719_v53 = vpack.c.bf16 %v2794_v52, %v2793_v51  ;;  %v2974_v51 = vld [vmem:[#allocation6 + $0xae8] sm:$0xff] }
 0xf51   : > { %6681 = vmatpush3.bf16.msra.mxu1 %v6680_v54  ;;  %v2796_v54 = vld [vmem:[#allocation6 + $0x2c8] sm:$0xff] }
 0xf52   : > { %6682 = vmatprep.subr.bf16.mxu1 %v7307_v0  ;;  %v6722_v55 = vpack.c.bf16 %v2796_v54, %v2795_v45  ;;  %v2976_v45 = vld [vmem:[#allocation6 + $0xaf8] sm:$0xff] }
 0xf55   : > { %6684 = vmatpush3.bf16.msra.mxu1 %v6683_v57  ;;  %v2798_v57 = vld [vmem:[#allocation6 + $0x2d8] sm:$0xff] }
 0xf56   : > { %5734 = vmatprep.subr.mxu1 %v7309_v1 }
 0xf58   : > { %5732 = vmatmul.mubr.f32.vlgmr.msra.gmra.mrb[32].mxu1 %v7723_v9 }
 0xf59   : > { %5736 = vmatprep.mubr.msk.f32.mxu1 %vm7308_vm0, %v7309_v1 }
 0xfeb   : > { %v2185_v18 = vpop.f32.mrb[28].mxu1 }
 0xfec   : > { %v5593_v50 = vpop.f32.mrb[29].mxu1  ;;  %5627 = vmatmul.mubr.f32.vlgmr.msra.gmra.mrb[16].mxu0 %v2185_v18 }
 0xfed   : > { %6639 = vmatpush3.bf16.msra.mxu0 %v6638_v15  ;;  %5696 = vmatprep.mubr.msk.f32.mxu0 %vm7308_vm0, %v7309_v1  ;;  %v2699_v15 = vld [vmem:[#allocation8 + $0x210] sm:$0xff]  ;;  %v2701_v50 = vld [vmem:[#allocation8 + $0x220] sm:$0xff] }
 0xfee   : > { %6640 = vmatprep.subr.bf16.mxu0 %v7307_v0  ;;  %v6689_v18 = vpack.c.bf16 %v2700_v17, %v2699_v15  ;;  %v6737_v17 = vpack.c.bf16 %v2877_v14, %v2876_v13  ;;  %v3206_v13 = vld [vmem:[#allocation8 + $0x298] sm:$0xff] }
 0xff1   : > { %6642 = vmatpush3.bf16.msra.mxu0 %v6641_v19  ;;  %v2702_v19 = vld [vmem:[#allocation8 + $0x228] sm:$0xff] }
 0xff2   : > { %6643 = vmatprep.subr.bf16.mxu0 %v7307_v0  ;;  %v6692_v20 = vpack.c.bf16 %v2702_v19, %v2701_v50  ;;  %v2879_v50 = vld [vmem:[#allocation6 + $0x6a8] sm:$0xff] }
 0xff5   : > { %6645 = vmatpush3.bf16.msra.mxu0 %v6644_v22  ;;  %v2704_v22 = vld [vmem:[#allocation8 + $0x238] sm:$0xff] }
 0xff6   : > { %6646 = vmatprep.subr.bf16.mxu0 %v7307_v0  ;;  %v6695_v23 = vpack.c.bf16 %v2704_v22, %v2703_v21  ;;  %v2881_v21 = vld [vmem:[#allocation6 + $0x6b8] sm:$0xff] }
 0xff9   : > { %6648 = vmatpush3.bf16.msra.mxu0 %v6647_v25  ;;  %v2706_v25 = vld [vmem:[#allocation8 + $0x248] sm:$0xff] }
 0xffa   : > { %6649 = vmatprep.subr.bf16.mxu0 %v7307_v0  ;;  %v6698_v26 = vpack.c.bf16 %v2706_v25, %v2705_v24  ;;  %v2883_v24 = vld [vmem:[#allocation6 + $0x6c8] sm:$0xff] }
 0xffd   : > { %6651 = vmatpush3.bf16.msra.mxu0 %v6650_v28  ;;  %v2708_v28 = vld [vmem:[#allocation8 + $0x258] sm:$0xff] }
 0xffe   : > { %6652 = vmatprep.subr.bf16.mxu0 %v7307_v0  ;;  %v6701_v29 = vpack.c.bf16 %v2708_v28, %v2707_v27  ;;  %v2885_v27 = vld [vmem:[#allocation6 + $0x6d8] sm:$0xff] }
0x1001   : > { %6654 = vmatpush3.bf16.msra.mxu0 %v6653_v31  ;;  %v2710_v31 = vld [vmem:[#allocation8 + $0x268] sm:$0xff] }
0x1002   : > { %6655 = vmatprep.subr.bf16.mxu0 %v7307_v0  ;;  %v6704_v32 = vpack.c.bf16 %v2710_v31, %v2709_v30  ;;  %v2887_v30 = vld [vmem:[#allocation6 + $0x6e8] sm:$0xff] }
0x1005   : > { %6657 = vmatpush3.bf16.msra.mxu0 %v6656_v34  ;;  %v2712_v34 = vld [vmem:[#allocation8 + $0x278] sm:$0xff] }
0x1006   : > { %6658 = vmatprep.subr.bf16.mxu0 %v7307_v0  ;;  %v6707_v35 = vpack.c.bf16 %v2712_v34, %v2711_v33  ;;  %v2889_v33 = vld [vmem:[#allocation6 + $0x6f8] sm:$0xff] }
0x1009   : > { %6660 = vmatpush3.bf16.msra.mxu0 %v6659_v37 }
0x100a   : > { %6685 = vmatprep.subr.bf16.mxu0 %v7307_v0 }
0x100b   : > { %v2363_v58 = vpop.f32.mrb[30].mxu1 }
0x100c   : > { %5697 = vmatmul.mubr.f32.vlgmr.msra.gmra.mrb[18].mxu0 %v7723_v9  ;;  %v5663_v59 = vpop.f32.mrb[31].mxu1 }
0x100d   : > { %5776 = vmatprep.mubr.msk.f32.mxu0 %vm7308_vm0, %v7309_v1  ;;  %6687 = vmatpush3.bf16.msra.mxu0 %v6686_v16  ;;  %v2799_v59 = vld [vmem:[#allocation6 + $0x2e0] sm:$0xff] }
0x100e   : > { %6688 = vmatprep.subr.bf16.mxu0 %v7307_v0 }
0x1011   : > { %6690 = vmatpush3.bf16.msra.mxu0 %v6689_v18  ;;  %v2878_v18 = vld [vmem:[#allocation6 + $0x6a0] sm:$0xff] }
0x1012   : > { %6691 = vmatprep.subr.bf16.mxu0 %v7307_v0  ;;  %v6740_v19 = vpack.c.bf16 %v2879_v50, %v2878_v18  ;;  %v3209_v18 = vld [vmem:[#allocation8 + $0x2b0] sm:$0xff]  ;;  %v3210_v50 = vld [vmem:[#allocation8 + $0x2b8] sm:$0xff] }
0x1015   : > { %6693 = vmatpush3.bf16.msra.mxu0 %v6692_v20  ;;  %v2880_v20 = vld [vmem:[#allocation6 + $0x6b0] sm:$0xff] }
0x1016   : > { %6694 = vmatprep.subr.bf16.mxu0 %v7307_v0  ;;  %v6743_v22 = vpack.c.bf16 %v2881_v21, %v2880_v20  ;;  %v3211_v20 = vld [vmem:[#allocation8 + $0x2c0] sm:$0xff]  ;;  %v3212_v21 = vld [vmem:[#allocation8 + $0x2c8] sm:$0xff] }
0x1019   : > { %6696 = vmatpush3.bf16.msra.mxu0 %v6695_v23  ;;  %v2882_v23 = vld [vmem:[#allocation6 + $0x6c0] sm:$0xff] }
0x101a   : > { %6697 = vmatprep.subr.bf16.mxu0 %v7307_v0  ;;  %v6746_v25 = vpack.c.bf16 %v2883_v24, %v2882_v23  ;;  %v3213_v23 = vld [vmem:[#allocation8 + $0x2d0] sm:$0xff]  ;;  %v3214_v24 = vld [vmem:[#allocation8 + $0x2d8] sm:$0xff] }
0x101d   : > { %6699 = vmatpush3.bf16.msra.mxu0 %v6698_v26  ;;  %v2884_v26 = vld [vmem:[#allocation6 + $0x6d0] sm:$0xff] }
0x101e   : > { %6700 = vmatprep.subr.bf16.mxu0 %v7307_v0  ;;  %v6749_v28 = vpack.c.bf16 %v2885_v27, %v2884_v26  ;;  %v3215_v26 = vld [vmem:[#allocation8 + $0x2e0] sm:$0xff]  ;;  %v3216_v27 = vld [vmem:[#allocation8 + $0x2e8] sm:$0xff] }
0x1021   : > { %6702 = vmatpush3.bf16.msra.mxu0 %v6701_v29  ;;  %v2886_v29 = vld [vmem:[#allocation6 + $0x6e0] sm:$0xff] }
0x1022   : > { %6703 = vmatprep.subr.bf16.mxu0 %v7307_v0  ;;  %v6752_v31 = vpack.c.bf16 %v2887_v30, %v2886_v29  ;;  %v3217_v29 = vld [vmem:[#allocation8 + $0x2f0] sm:$0xff]  ;;  %v3218_v30 = vld [vmem:[#allocation8 + $0x2f8] sm:$0xff] }
0x1025   : > { %6705 = vmatpush3.bf16.msra.mxu0 %v6704_v32  ;;  %v2888_v32 = vld [vmem:[#allocation6 + $0x6f0] sm:$0xff] }
0x1026   : > { %6706 = vmatprep.subr.bf16.mxu0 %v7307_v0  ;;  %v6755_v34 = vpack.c.bf16 %v2889_v33, %v2888_v32 }
0x1029   : > { %6708 = vmatpush3.bf16.msra.mxu0 %v6707_v35  ;;  %v2965_v35 = vld [vmem:[#allocation6 + $0xaa0] sm:$0xff] }
0x102a   : > { %6733 = vmatprep.subr.bf16.mxu0 %v7307_v0 }
0x102b   : > { %v2537_v3 = vpop.f32.mrb[32].mxu1 }
0x102c   : > { %v5733_v4 = vpop.f32.mrb[33].mxu1 }
0x102d   : > { %v2961_v4 = vld [vmem:[#allocation6 + $0xa80] sm:$0xff] }
0x10bf   : > { %v2273_v60 = vpop.f32.mrb[16].mxu0 }
0x10c0   : > { %v7808_v61 = vadd.f32 %v2273_v60, %v7742_v38  ;;  %v5628_v62 = vpop.f32.mrb[17].mxu0  ;;  %v2800_v60 = vld [vmem:[#allocation6 + $0x2e8] sm:$0xff] }
0x10c1   : > { %v6728_v62 = vpack.c.bf16 %v2800_v60, %v2799_v59 }
0x10df   : > { %v2450_v63 = vpop.f32.mrb[18].mxu0 }
0x10e0   : > { %v5698_v2 = vpop.f32.mrb[19].mxu0  ;;  %5735 = vmatpush3.xpose.msra.mxu1 %v2450_v63  ;;  %v2801_v63 = vld [vmem:[#allocation6 + $0x2f0] sm:$0xff] }
0x10e1   : > { %5739 = vmatprep.subr.mxu1 %v7309_v1  ;;  %v2802_v2 = vld [vmem:[#allocation6 + $0x2f8] sm:$0xff] }
0x10e3   : > { %5737 = vmatmul.mubr.f32.vlgmr.msra.gmra.mrb[34].mxu1 %v2363_v58  ;;  %v6725_v58 = vpack.c.bf16 %v2798_v57, %v2797_v56 }
0x10e4   : > { %5741 = vmatprep.mubr.msk.f32.mxu1 %vm7308_vm0, %v7309_v1  ;;  %5740 = vmatpush3.msra.mxu1 %v2537_v3  ;;  %v6731_v3 = vpack.c.bf16 %v2802_v2, %v2801_v63 }
0x10e5   : > { %6709 = vmatprep.subr.bf16.mxu1 %v7307_v0 }
0x11b6   : > { %v2607_v5 = vpop.f32.mrb[34].mxu1 }
0x11b7   : > { %v5738_v6 = vpop.f32.mrb[35].mxu1  ;;  %v2611_v38 = vsel %vm587_vm1, %v2607_v5, -inf }
0x11b8   : > { %2612 = vmax.xlane.f32.xlu0 %v2611_v38  ;;  %v2963_v6 = vld [vmem:[#allocation6 + $0xa90] sm:$0xff] }
0x1245   : > { %v2613_v7 = vpop.xlane.xlu0 %2612 }
0x1246   : > { %v2614_v8 = vsub.f32 %v2607_v5, %v2613_v7  ;;  %v2962_v5 = vld [vmem:[#allocation6 + $0xa88] sm:$0xff]  ;;  %v2964_v7 = vld [vmem:[#allocation6 + $0xa98] sm:$0xff] }
0x1247   : > { %v6758_v38 = vpack.c.bf16 %v2962_v5, %v2961_v4 }
0x1248   : > { %v2615_v10 = vmul.f32 1.442695, %v2614_v8  ;;  %v6761_v8 = vpack.c.bf16 %v2964_v7, %v2963_v6 }
0x124a   : > { %7095 = vpow2.f32 %v2615_v10  ;;  %v2874_v10 = vld [vmem:[#allocation6 + $0x680] sm:$0xff] }
0x1254   : > { %v7096_v11 = vpop.eup %7095 }
0x1255   : > { %v2617_v12 = vsel %vm587_vm1, %v7096_v11, 0.0 }
0x1256   : > { %2618 = vadd.xlane.f32.xlu1 %v2617_v12 }
0x12e3   : > { %v2619_v36 = vpop.xlane.xlu1 %2618 }
0x12e4   : > { %7097 = vrcp.f32 %v2619_v36  ;;  %v2966_v36 = vld [vmem:[#allocation6 + $0xaa8] sm:$0xff] }
0x12ee   : > { %v7098_v37 = vpop.eup %7097 }
0x12ef   : > { %v2621_v39 = vmul.f32 %v7098_v37, %v7096_v11  ;;  %v2875_v11 = vld [vmem:[#allocation6 + $0x688] sm:$0xff]  ;;  %v2967_v37 = vld [vmem:[#allocation6 + $0xab0] sm:$0xff] }
0x12f0   : > { %v6734_v12 = vpack.c.bf16 %v2875_v11, %v2874_v10  ;;  %v6767_v41 = vpack.c.bf16 %v2968_v40, %v2967_v37  ;;  %v3204_v10 = vld [vmem:[#allocation8 + $0x288] sm:$0xff]  ;;  %v3205_v11 = vld [vmem:[#allocation8 + $0x290] sm:$0xff]  ;;  %v3296_v40 = vld [vmem:[#allocation6 + $0x318] sm:$0xff] }
0x12f1   : > { %5742 = vmatmul.mubr.msk.f32.vlgmr.msra.gmra.mrb[36].mxu1 %vm587_vm1, %v2621_v39  ;;  %v6764_v39 = vpack.c.bf16 %v2966_v36, %v2965_v35  ;;  %v6785_v14 = vpack.c.bf16 %v3206_v13, %v3205_v11  ;;  %v3293_v35 = vld [vmem:[#allocation6 + $0x300] sm:$0xff]  ;;  %v3294_v36 = vld [vmem:[#allocation6 + $0x308] sm:$0xff] }
0x12f2   : > { %5811 = vmatprep.mubr.msk.f32.mxu1 %vm7308_vm0, %v7309_v1  ;;  %6711 = vmatpush3.bf16.msra.mxu1 %v6710_v43  ;;  %v2969_v43 = vld [vmem:[#allocation6 + $0xac0] sm:$0xff]  ;;  %v6806_v37 = vpack.c.bf16 %v3294_v36, %v3293_v35  ;;  %v3474_v35 = vld [vmem:[#allocation6 + $0xb38] sm:$0xff] }
0x12f3   : > { %6712 = vmatprep.subr.bf16.mxu1 %v7307_v0  ;;  %v6770_v46 = vpack.c.bf16 %v2970_v44, %v2969_v43  ;;  %v3297_v43 = vld [vmem:[#allocation6 + $0x320] sm:$0xff]  ;;  %v3298_v44 = vld [vmem:[#allocation6 + $0x328] sm:$0xff] }
0x12f6   : > { %6714 = vmatpush3.bf16.msra.mxu1 %v6713_v47  ;;  %v2971_v47 = vld [vmem:[#allocation6 + $0xad0] sm:$0xff] }
0x12f7   : > { %6715 = vmatprep.subr.bf16.mxu1 %v7307_v0  ;;  %v6773_v49 = vpack.c.bf16 %v2972_v48, %v2971_v47  ;;  %v3299_v47 = vld [vmem:[#allocation6 + $0x330] sm:$0xff]  ;;  %v3300_v48 = vld [vmem:[#allocation6 + $0x338] sm:$0xff] }
0x12fa   : > { %6717 = vmatpush3.bf16.msra.mxu1 %v6716_v42  ;;  %v2973_v42 = vld [vmem:[#allocation6 + $0xae0] sm:$0xff] }
0x12fb   : > { %6718 = vmatprep.subr.bf16.mxu1 %v7307_v0  ;;  %v6776_v52 = vpack.c.bf16 %v2974_v51, %v2973_v42  ;;  %v3301_v42 = vld [vmem:[#allocation6 + $0x340] sm:$0xff]  ;;  %v3302_v51 = vld [vmem:[#allocation6 + $0x348] sm:$0xff] }
0x12fe   : > { %6720 = vmatpush3.bf16.msra.mxu1 %v6719_v53  ;;  %v2975_v53 = vld [vmem:[#allocation6 + $0xaf0] sm:$0xff] }
0x12ff   : > { %6721 = vmatprep.subr.bf16.mxu1 %v7307_v0  ;;  %v6779_v54 = vpack.c.bf16 %v2976_v45, %v2975_v53  ;;  %v3303_v53 = vld [vmem:[#allocation6 + $0x350] sm:$0xff]  ;;  %v3304_v45 = vld [vmem:[#allocation6 + $0x358] sm:$0xff] }
0x1302   : > { %6723 = vmatpush3.bf16.msra.mxu1 %v6722_v55 }
0x1303   : > { %6724 = vmatprep.subr.bf16.mxu1 %v7307_v0 }
0x1306   : > { %6726 = vmatpush3.bf16.msra.mxu1 %v6725_v58 }
0x1307   : > { %6727 = vmatprep.subr.bf16.mxu1 %v7307_v0 }
0x130a   : > { %6729 = vmatpush3.bf16.msra.mxu1 %v6728_v62 }
0x130b   : > { %6730 = vmatprep.subr.bf16.mxu1 %v7307_v0 }
0x130e   : > { %6732 = vmatpush3.bf16.msra.mxu1 %v6731_v3 }
0x130f   : > { %6757 = vmatprep.subr.bf16.mxu1 %v7307_v0 }
0x1311   : > { %5812 = vmatmul.mubr.f32.vlgmr.msra.gmra.mrb[38].mxu1 %v7723_v9 }
0x1312   : > { %6759 = vmatpush3.bf16.msra.mxu1 %v6758_v38  ;;  %5881 = vmatprep.mubr.msk.f32.mxu1 %vm7308_vm0, %v7309_v1 }
0x1313   : > { %6760 = vmatprep.subr.bf16.mxu1 %v7307_v0 }
0x1316   : > { %6762 = vmatpush3.bf16.msra.mxu1 %v6761_v8  ;;  %v3203_v8 = vld [vmem:[#allocation8 + $0x280] sm:$0xff] }
0x1317   : > { %6763 = vmatprep.subr.bf16.mxu1 %v7307_v0 }
0x131a   : > { %6765 = vmatpush3.bf16.msra.mxu1 %v6764_v39  ;;  %v3295_v39 = vld [vmem:[#allocation6 + $0x310] sm:$0xff] }
0x131b   : > { %6766 = vmatprep.subr.bf16.mxu1 %v7307_v0 }
0x131e   : > { %6768 = vmatpush3.bf16.msra.mxu1 %v6767_v41  ;;  %v6809_v41 = vpack.c.bf16 %v3296_v40, %v3295_v39  ;;  %v3476_v39 = vld [vmem:[#allocation6 + $0xb48] sm:$0xff] }
0x131f   : > { %6769 = vmatprep.subr.bf16.mxu1 %v7307_v0 }
0x1322   : > { %6771 = vmatpush3.bf16.msra.mxu1 %v6770_v46  ;;  %v6812_v46 = vpack.c.bf16 %v3298_v44, %v3297_v43  ;;  %v3478_v43 = vld [vmem:[#allocation6 + $0xb58] sm:$0xff] }
0x1323   : > { %6772 = vmatprep.subr.bf16.mxu1 %v7307_v0 }
0x1326   : > { %6774 = vmatpush3.bf16.msra.mxu1 %v6773_v49  ;;  %v6815_v49 = vpack.c.bf16 %v3300_v48, %v3299_v47  ;;  %v3480_v47 = vld [vmem:[#allocation6 + $0xb68] sm:$0xff] }
0x1327   : > { %6775 = vmatprep.subr.bf16.mxu1 %v7307_v0 }
0x132a   : > { %6777 = vmatpush3.bf16.msra.mxu1 %v6776_v52  ;;  %v6818_v52 = vpack.c.bf16 %v3302_v51, %v3301_v42  ;;  %v3482_v42 = vld [vmem:[#allocation6 + $0xb78] sm:$0xff] }
0x132b   : > { %6778 = vmatprep.subr.bf16.mxu1 %v7307_v0 }
0x132e   : > { %6780 = vmatpush3.bf16.msra.mxu1 %v6779_v54  ;;  %v6821_v54 = vpack.c.bf16 %v3304_v45, %v3303_v53 }
0x132f   : > { %5884 = vmatprep.subr.mxu1 %v7309_v1 }
0x1331   : > { %5882 = vmatmul.mubr.f32.vlgmr.msra.gmra.mrb[40].mxu1 %v7723_v9 }
0x1332   : > { %5886 = vmatprep.mubr.msk.f32.mxu1 %vm7308_vm0, %v7309_v1 }
0x13c4   : > { %v2691_v15 = vpop.f32.mrb[36].mxu1 }
0x13c5   : > { %v5743_v16 = vpop.f32.mrb[37].mxu1  ;;  %5777 = vmatmul.mubr.f32.vlgmr.msra.gmra.mrb[20].mxu0 %v2691_v15  ;;  %v3207_v15 = vld [vmem:[#allocation8 + $0x2a0] sm:$0xff] }
0x13c6   : > { %6735 = vmatpush3.bf16.msra.mxu0 %v6734_v12  ;;  %5846 = vmatprep.mubr.msk.f32.mxu0 %vm7308_vm0, %v7309_v1  ;;  %v6782_v12 = vpack.c.bf16 %v3204_v10, %v3203_v8  ;;  %v3208_v16 = vld [vmem:[#allocation8 + $0x2a8] sm:$0xff]  ;;  %v3382_v8 = vld [vmem:[#allocation6 + $0x710] sm:$0xff]  ;;  %v3383_v10 = vld [vmem:[#allocation6 + $0x718] sm:$0xff] }
0x13c7   : > { %6736 = vmatprep.subr.bf16.mxu0 %v7307_v0  ;;  %v6833_v13 = vpack.c.bf16 %v3383_v10, %v3382_v8  ;;  %v3712_v10 = vld [vmem:[#allocation8 + $0x318] sm:$0xff] }
0x13ca   : > { %6738 = vmatpush3.bf16.msra.mxu0 %v6737_v17  ;;  %v6788_v17 = vpack.c.bf16 %v3208_v16, %v3207_v15  ;;  %v3385_v15 = vld [vmem:[#allocation6 + $0x728] sm:$0xff] }
0x13cb   : > { %6739 = vmatprep.subr.bf16.mxu0 %v7307_v0 }
0x13ce   : > { %6741 = vmatpush3.bf16.msra.mxu0 %v6740_v19  ;;  %v6791_v19 = vpack.c.bf16 %v3210_v50, %v3209_v18  ;;  %v3387_v18 = vld [vmem:[#allocation6 + $0x738] sm:$0xff] }
0x13cf   : > { %6742 = vmatprep.subr.bf16.mxu0 %v7307_v0 }
0x13d2   : > { %6744 = vmatpush3.bf16.msra.mxu0 %v6743_v22  ;;  %v6794_v22 = vpack.c.bf16 %v3212_v21, %v3211_v20  ;;  %v3389_v20 = vld [vmem:[#allocation6 + $0x748] sm:$0xff] }
0x13d3   : > { %6745 = vmatprep.subr.bf16.mxu0 %v7307_v0 }
0x13d6   : > { %6747 = vmatpush3.bf16.msra.mxu0 %v6746_v25  ;;  %v6797_v25 = vpack.c.bf16 %v3214_v24, %v3213_v23  ;;  %v3391_v23 = vld [vmem:[#allocation6 + $0x758] sm:$0xff] }
0x13d7   : > { %6748 = vmatprep.subr.bf16.mxu0 %v7307_v0 }
0x13da   : > { %6750 = vmatpush3.bf16.msra.mxu0 %v6749_v28  ;;  %v6800_v28 = vpack.c.bf16 %v3216_v27, %v3215_v26  ;;  %v3393_v26 = vld [vmem:[#allocation6 + $0x768] sm:$0xff] }
0x13db   : > { %6751 = vmatprep.subr.bf16.mxu0 %v7307_v0 }
0x13de   : > { %6753 = vmatpush3.bf16.msra.mxu0 %v6752_v31  ;;  %v6803_v31 = vpack.c.bf16 %v3218_v30, %v3217_v29  ;;  %v3395_v29 = vld [vmem:[#allocation6 + $0x778] sm:$0xff] }
0x13df   : > { %6754 = vmatprep.subr.bf16.mxu0 %v7307_v0 }
0x13e2   : > { %6756 = vmatpush3.bf16.msra.mxu0 %v6755_v34 }
0x13e3   : > { %6781 = vmatprep.subr.bf16.mxu0 %v7307_v0 }
0x13e4   : > { %v2869_v55 = vpop.f32.mrb[38].mxu1 }
0x13e5   : > { %5847 = vmatmul.mubr.f32.vlgmr.msra.gmra.mrb[22].mxu0 %v7723_v9  ;;  %v5813_v56 = vpop.f32.mrb[39].mxu1 }
0x13e6   : > { %5926 = vmatprep.mubr.msk.f32.mxu0 %vm7308_vm0, %v7309_v1  ;;  %6783 = vmatpush3.bf16.msra.mxu0 %v6782_v12  ;;  %v3306_v56 = vld [vmem:[#allocation6 + $0x368] sm:$0xff] }
0x13e7   : > { %6784 = vmatprep.subr.bf16.mxu0 %v7307_v0 }
0x13ea   : > { %6786 = vmatpush3.bf16.msra.mxu0 %v6785_v14  ;;  %v3384_v14 = vld [vmem:[#allocation6 + $0x720] sm:$0xff] }
0x13eb   : > { %6787 = vmatprep.subr.bf16.mxu0 %v7307_v0  ;;  %v6836_v16 = vpack.c.bf16 %v3385_v15, %v3384_v14  ;;  %v3715_v15 = vld [vmem:[#allocation8 + $0x330] sm:$0xff] }
0x13ee   : > { %6789 = vmatpush3.bf16.msra.mxu0 %v6788_v17  ;;  %v3386_v17 = vld [vmem:[#allocation6 + $0x730] sm:$0xff] }
0x13ef   : > { %6790 = vmatprep.subr.bf16.mxu0 %v7307_v0  ;;  %v6839_v50 = vpack.c.bf16 %v3387_v18, %v3386_v17  ;;  %v3717_v18 = vld [vmem:[#allocation8 + $0x340] sm:$0xff] }
0x13f2   : > { %6792 = vmatpush3.bf16.msra.mxu0 %v6791_v19  ;;  %v3388_v19 = vld [vmem:[#allocation6 + $0x740] sm:$0xff] }
0x13f3   : > { %6793 = vmatprep.subr.bf16.mxu0 %v7307_v0  ;;  %v6842_v21 = vpack.c.bf16 %v3389_v20, %v3388_v19  ;;  %v3719_v20 = vld [vmem:[#allocation8 + $0x350] sm:$0xff] }
0x13f6   : > { %6795 = vmatpush3.bf16.msra.mxu0 %v6794_v22  ;;  %v3390_v22 = vld [vmem:[#allocation6 + $0x750] sm:$0xff] }
0x13f7   : > { %6796 = vmatprep.subr.bf16.mxu0 %v7307_v0  ;;  %v6845_v24 = vpack.c.bf16 %v3391_v23, %v3390_v22  ;;  %v3721_v23 = vld [vmem:[#allocation8 + $0x360] sm:$0xff] }
0x13fa   : > { %6798 = vmatpush3.bf16.msra.mxu0 %v6797_v25  ;;  %v3392_v25 = vld [vmem:[#allocation6 + $0x760] sm:$0xff] }
0x13fb   : > { %6799 = vmatprep.subr.bf16.mxu0 %v7307_v0  ;;  %v6848_v27 = vpack.c.bf16 %v3393_v26, %v3392_v25  ;;  %v3723_v26 = vld [vmem:[#allocation8 + $0x370] sm:$0xff] }
0x13fe   : > { %6801 = vmatpush3.bf16.msra.mxu0 %v6800_v28  ;;  %v3394_v28 = vld [vmem:[#allocation6 + $0x770] sm:$0xff] }
0x13ff   : > { %6802 = vmatprep.subr.bf16.mxu0 %v7307_v0  ;;  %v6851_v30 = vpack.c.bf16 %v3395_v29, %v3394_v28 }
0x1402   : > { %6804 = vmatpush3.bf16.msra.mxu0 %v6803_v31  ;;  %v3471_v31 = vld [vmem:[#allocation6 + $0xb20] sm:$0xff] }
0x1403   : > { %6829 = vmatprep.subr.bf16.mxu0 %v7307_v0 }
0x1404   : > { %v3043_v9 = vpop.f32.mrb[40].mxu1 }
0x1405   : > { %v5883_v63 = vpop.f32.mrb[41].mxu1 }
0x1406   : > { %v3468_v63 = vld [vmem:[#allocation6 + $0xb08] sm:$0xff] }
0x1498   : > { %v2779_v57 = vpop.f32.mrb[20].mxu0 }
0x1499   : > { %v7863_v58 = vadd.f32 %v2779_v57, %v7808_v61  ;;  %v5778_v59 = vpop.f32.mrb[21].mxu0 }
0x149a   : > { %v3307_v59 = vld [vmem:[#allocation6 + $0x370] sm:$0xff] }
0x14b8   : > { %v2956_v60 = vpop.f32.mrb[22].mxu0 }
0x14b9   : > { %v5848_v62 = vpop.f32.mrb[23].mxu0  ;;  %5885 = vmatpush3.xpose.msra.mxu1 %v2956_v60  ;;  %v3308_v60 = vld [vmem:[#allocation6 + $0x378] sm:$0xff] }
0x14ba   : > { %5889 = vmatprep.subr.mxu1 %v7309_v1  ;;  %v6827_v62 = vpack.c.bf16 %v3308_v60, %v3307_v59 }
0x14bc   : > { %5887 = vmatmul.mubr.f32.vlgmr.msra.gmra.mrb[42].mxu1 %v2869_v55  ;;  %v3305_v55 = vld [vmem:[#allocation6 + $0x360] sm:$0xff] }
0x14bd   : > { %5891 = vmatprep.mubr.msk.f32.mxu1 %vm7308_vm0, %v7309_v1  ;;  %5890 = vmatpush3.msra.mxu1 %v3043_v9  ;;  %v6824_v57 = vpack.c.bf16 %v3306_v56, %v3305_v55  ;;  %v3467_v9 = vld [vmem:[#allocation6 + $0xb00] sm:$0xff] }
0x14be   : > { %6805 = vmatprep.subr.bf16.mxu1 %v7307_v0 }
0x158f   : > { %v3113_v2 = vpop.f32.mrb[42].mxu1 }
0x1590   : > { %v5888_v3 = vpop.f32.mrb[43].mxu1  ;;  %v3117_v61 = vsel %vm587_vm1, %v3113_v2, -inf }
0x1591   : > { %3118 = vmax.xlane.f32.xlu0 %v3117_v61  ;;  %v7891_v3 = vld [vmem:[%s7532_s20] sm:$0xff]  ;;  %v6854_v61 = vpack.c.bf16 %v3468_v63, %v3467_v9 }
0x161e   : > { %v3119_v4 = vpop.xlane.xlu0 %3118 }
0x161f   : > { %v3120_v5 = vsub.f32 %v3113_v2, %v3119_v4  ;;  %v3469_v2 = vld [vmem:[#allocation6 + $0xb10] sm:$0xff]  ;;  %v3470_v4 = vld [vmem:[#allocation6 + $0xb18] sm:$0xff] }
0x1621   : > { %v3121_v6 = vmul.f32 1.442695, %v3120_v5  ;;  %v6857_v5 = vpack.c.bf16 %v3470_v4, %v3469_v2 }
0x1623   : > { %7099 = vpow2.f32 %v3121_v6  ;;  %v3380_v6 = vld [vmem:[#allocation6 + $0x700] sm:$0xff] }
0x162d   : > { %v7100_v38 = vpop.eup %7099 }
0x162e   : > { %v3123_v7 = vsel %vm587_vm1, %v7100_v38, 0.0 }
0x162f   : > { %3124 = vadd.xlane.f32.xlu1 %v3123_v7 }
0x16bc   : > { %v3125_v32 = vpop.xlane.xlu1 %3124 }
0x16bd   : > { %7101 = vrcp.f32 %v3125_v32  ;;  %v3472_v32 = vld [vmem:[#allocation6 + $0xb28] sm:$0xff] }
0x16c7   : > { %v7102_v33 = vpop.eup %7101 }
0x16c8   : > { %v3127_v34 = vmul.f32 %v7102_v33, %v7100_v38  ;;  %v3381_v38 = vld [vmem:[#allocation6 + $0x708] sm:$0xff]  ;;  %v3473_v33 = vld [vmem:[#allocation6 + $0xb30] sm:$0xff] }
0x16c9   : > { %v6830_v7 = vpack.c.bf16 %v3381_v38, %v3380_v6  ;;  %v6863_v36 = vpack.c.bf16 %v3474_v35, %v3473_v33  ;;  %v3709_v6 = vld [vmem:[#allocation8 + $0x300] sm:$0xff]  ;;  %v3710_v38 = vld [vmem:[#allocation8 + $0x308] sm:$0xff]  ;;  %v3801_v35 = vld [vmem:[#allocation6 + $0x390] sm:$0xff] }
0x16ca   : > { %5892 = vmatmul.mubr.msk.f32.vlgmr.msra.gmra.mrb[44].mxu1 %vm587_vm1, %v3127_v34  ;;  %v6860_v34 = vpack.c.bf16 %v3472_v32, %v3471_v31  ;;  %v6878_v8 = vpack.c.bf16 %v3710_v38, %v3709_v6  ;;  %v3799_v32 = vld [vmem:[#allocation6 + $0x380] sm:$0xff]  ;;  %v3800_v33 = vld [vmem:[#allocation6 + $0x388] sm:$0xff]  ;;  %v3888_v6 = vld [vmem:[#allocation6 + $0x790] sm:$0xff] }
0x16cb   : > { %5961 = vmatprep.mubr.msk.f32.mxu1 %vm7308_vm0, %v7309_v1  ;;  %6807 = vmatpush3.bf16.msra.mxu1 %v6806_v37  ;;  %v3475_v37 = vld [vmem:[#allocation6 + $0xb40] sm:$0xff]  ;;  %v3889_v38 = vld [vmem:[#allocation6 + $0x798] sm:$0xff] }
0x16cc   : > { %6808 = vmatprep.subr.bf16.mxu1 %v7307_v0  ;;  %v6866_v40 = vpack.c.bf16 %v3476_v39, %v3475_v37  ;;  %v3803_v39 = vld [vmem:[#allocation6 + $0x3a0] sm:$0xff] }
0x16cf   : > { %6810 = vmatpush3.bf16.msra.mxu1 %v6809_v41  ;;  %v3477_v41 = vld [vmem:[#allocation6 + $0xb50] sm:$0xff] }
0x16d0   : > { %6811 = vmatprep.subr.bf16.mxu1 %v7307_v0  ;;  %v6869_v44 = vpack.c.bf16 %v3478_v43, %v3477_v41  ;;  %v3805_v43 = vld [vmem:[#allocation6 + $0x3b0] sm:$0xff] }
0x16d3   : > { %6813 = vmatpush3.bf16.msra.mxu1 %v6812_v46  ;;  %v3479_v46 = vld [vmem:[#allocation6 + $0xb60] sm:$0xff] }
0x16d4   : > { %6814 = vmatprep.subr.bf16.mxu1 %v7307_v0  ;;  %v6872_v48 = vpack.c.bf16 %v3480_v47, %v3479_v46  ;;  %v3807_v47 = vld [vmem:[#allocation6 + $0x3c0] sm:$0xff] }
0x16d7   : > { %6816 = vmatpush3.bf16.msra.mxu1 %v6815_v49  ;;  %v3481_v49 = vld [vmem:[#allocation6 + $0xb70] sm:$0xff] }
0x16d8   : > { %6817 = vmatprep.subr.bf16.mxu1 %v7307_v0  ;;  %v6875_v51 = vpack.c.bf16 %v3482_v42, %v3481_v49  ;;  %v3809_v42 = vld [vmem:[#allocation6 + $0x3d0] sm:$0xff] }
0x16db   : > { %6819 = vmatpush3.bf16.msra.mxu1 %v6818_v52 }
0x16dc   : > { %6820 = vmatprep.subr.bf16.mxu1 %v7307_v0 }
0x16df   : > { %6822 = vmatpush3.bf16.msra.mxu1 %v6821_v54 }
0x16e0   : > { %6823 = vmatprep.subr.bf16.mxu1 %v7307_v0 }
0x16e3   : > { %6825 = vmatpush3.bf16.msra.mxu1 %v6824_v57 }
0x16e4   : > { %6826 = vmatprep.subr.bf16.mxu1 %v7307_v0 }
0x16e7   : > { %6828 = vmatpush3.bf16.msra.mxu1 %v6827_v62 }
0x16e8   : > { %6853 = vmatprep.subr.bf16.mxu1 %v7307_v0 }
0x16ea   : > { %5962 = vmatmul.mubr.f32.vlgmr.msra.gmra.mrb[46].mxu1 %v7891_v3 }
0x16eb   : > { %6855 = vmatpush3.bf16.msra.mxu1 %v6854_v61  ;;  %6031 = vmatprep.mubr.msk.f32.mxu1 %vm7308_vm0, %v7309_v1 }
0x16ec   : > { %6856 = vmatprep.subr.bf16.mxu1 %v7307_v0 }
0x16ef   : > { %6858 = vmatpush3.bf16.msra.mxu1 %v6857_v5 }
0x16f0   : > { %6859 = vmatprep.subr.bf16.mxu1 %v7307_v0 }
0x16f3   : > { %6861 = vmatpush3.bf16.msra.mxu1 %v6860_v34  ;;  %v6902_v34 = vpack.c.bf16 %v3800_v33, %v3799_v32  ;;  %v3980_v32 = vld [vmem:[#allocation6 + $0xbb8] sm:$0xff] }
0x16f4   : > { %6862 = vmatprep.subr.bf16.mxu1 %v7307_v0 }
0x16f7   : > { %6864 = vmatpush3.bf16.msra.mxu1 %v6863_v36  ;;  %v3802_v36 = vld [vmem:[#allocation6 + $0x398] sm:$0xff] }
0x16f8   : > { %6865 = vmatprep.subr.bf16.mxu1 %v7307_v0  ;;  %v6905_v37 = vpack.c.bf16 %v3802_v36, %v3801_v35  ;;  %v3982_v35 = vld [vmem:[#allocation6 + $0xbc8] sm:$0xff] }
0x16fb   : > { %6867 = vmatpush3.bf16.msra.mxu1 %v6866_v40  ;;  %v3804_v40 = vld [vmem:[#allocation6 + $0x3a8] sm:$0xff] }
0x16fc   : > { %6868 = vmatprep.subr.bf16.mxu1 %v7307_v0  ;;  %v6908_v41 = vpack.c.bf16 %v3804_v40, %v3803_v39  ;;  %v3984_v39 = vld [vmem:[#allocation6 + $0xbd8] sm:$0xff] }
0x16ff   : > { %6870 = vmatpush3.bf16.msra.mxu1 %v6869_v44  ;;  %v3806_v44 = vld [vmem:[#allocation6 + $0x3b8] sm:$0xff] }
0x1700   : > { %6871 = vmatprep.subr.bf16.mxu1 %v7307_v0  ;;  %v6911_v46 = vpack.c.bf16 %v3806_v44, %v3805_v43  ;;  %v3986_v43 = vld [vmem:[#allocation6 + $0xbe8] sm:$0xff] }
0x1703   : > { %6873 = vmatpush3.bf16.msra.mxu1 %v6872_v48  ;;  %v3808_v48 = vld [vmem:[#allocation6 + $0x3c8] sm:$0xff] }
0x1704   : > { %6874 = vmatprep.subr.bf16.mxu1 %v7307_v0  ;;  %v6914_v49 = vpack.c.bf16 %v3808_v48, %v3807_v47  ;;  %v3988_v47 = vld [vmem:[#allocation6 + $0xbf8] sm:$0xff] }
0x1707   : > { %6876 = vmatpush3.bf16.msra.mxu1 %v6875_v51  ;;  %v3810_v51 = vld [vmem:[#allocation6 + $0x3d8] sm:$0xff] }
0x1708   : > { %6034 = vmatprep.subr.mxu1 %v7309_v1 }
0x170a   : > { %6032 = vmatmul.mubr.f32.vlgmr.msra.gmra.mrb[48].mxu1 %v7891_v3 }
0x170b   : > { %6036 = vmatprep.mubr.msk.f32.mxu1 %vm7308_vm0, %v7309_v1 }
0x179d   : > { %v3197_v11 = vpop.f32.mrb[44].mxu1 }
0x179e   : > { %v5893_v12 = vpop.f32.mrb[45].mxu1  ;;  %5927 = vmatmul.mubr.f32.vlgmr.msra.gmra.mrb[24].mxu0 %v3197_v11 }
0x179f   : > { %6831 = vmatpush3.bf16.msra.mxu0 %v6830_v7  ;;  %5996 = vmatprep.mubr.msk.f32.mxu0 %vm7308_vm0, %v7309_v1  ;;  %v3711_v7 = vld [vmem:[#allocation8 + $0x310] sm:$0xff]  ;;  %v3713_v12 = vld [vmem:[#allocation8 + $0x320] sm:$0xff] }
0x17a0   : > { %6832 = vmatprep.subr.bf16.mxu0 %v7307_v0  ;;  %v6881_v11 = vpack.c.bf16 %v3712_v10, %v3711_v7  ;;  %v6929_v10 = vpack.c.bf16 %v3889_v38, %v3888_v6  ;;  %v4219_v38 = vld [vmem:[#allocation8 + $0x3a0] sm:$0xff] }
0x17a3   : > { %6834 = vmatpush3.bf16.msra.mxu0 %v6833_v13  ;;  %v3714_v13 = vld [vmem:[#allocation8 + $0x328] sm:$0xff] }
0x17a4   : > { %6835 = vmatprep.subr.bf16.mxu0 %v7307_v0  ;;  %v6884_v14 = vpack.c.bf16 %v3714_v13, %v3713_v12  ;;  %v3891_v12 = vld [vmem:[#allocation6 + $0x7a8] sm:$0xff] }
0x17a7   : > { %6837 = vmatpush3.bf16.msra.mxu0 %v6836_v16  ;;  %v3716_v16 = vld [vmem:[#allocation8 + $0x338] sm:$0xff] }
0x17a8   : > { %6838 = vmatprep.subr.bf16.mxu0 %v7307_v0  ;;  %v6887_v17 = vpack.c.bf16 %v3716_v16, %v3715_v15  ;;  %v3893_v15 = vld [vmem:[#allocation6 + $0x7b8] sm:$0xff] }
0x17ab   : > { %6840 = vmatpush3.bf16.msra.mxu0 %v6839_v50  ;;  %v3718_v50 = vld [vmem:[#allocation8 + $0x348] sm:$0xff] }
0x17ac   : > { %6841 = vmatprep.subr.bf16.mxu0 %v7307_v0  ;;  %v6890_v19 = vpack.c.bf16 %v3718_v50, %v3717_v18  ;;  %v3895_v18 = vld [vmem:[#allocation6 + $0x7c8] sm:$0xff] }
0x17af   : > { %6843 = vmatpush3.bf16.msra.mxu0 %v6842_v21  ;;  %v3720_v21 = vld [vmem:[#allocation8 + $0x358] sm:$0xff] }
0x17b0   : > { %6844 = vmatprep.subr.bf16.mxu0 %v7307_v0  ;;  %v6893_v22 = vpack.c.bf16 %v3720_v21, %v3719_v20  ;;  %v3897_v20 = vld [vmem:[#allocation6 + $0x7d8] sm:$0xff] }
0x17b3   : > { %6846 = vmatpush3.bf16.msra.mxu0 %v6845_v24  ;;  %v3722_v24 = vld [vmem:[#allocation8 + $0x368] sm:$0xff] }
0x17b4   : > { %6847 = vmatprep.subr.bf16.mxu0 %v7307_v0  ;;  %v6896_v25 = vpack.c.bf16 %v3722_v24, %v3721_v23  ;;  %v3899_v23 = vld [vmem:[#allocation6 + $0x7e8] sm:$0xff] }
0x17b7   : > { %6849 = vmatpush3.bf16.msra.mxu0 %v6848_v27  ;;  %v3724_v27 = vld [vmem:[#allocation8 + $0x378] sm:$0xff] }
0x17b8   : > { %6850 = vmatprep.subr.bf16.mxu0 %v7307_v0  ;;  %v6899_v28 = vpack.c.bf16 %v3724_v27, %v3723_v26  ;;  %v3901_v26 = vld [vmem:[#allocation6 + $0x7f8] sm:$0xff] }
0x17bb   : > { %6852 = vmatpush3.bf16.msra.mxu0 %v6851_v30 }
0x17bc   : > { %6877 = vmatprep.subr.bf16.mxu0 %v7307_v0 }
0x17bd   : > { %v3375_v52 = vpop.f32.mrb[46].mxu1 }
0x17be   : > { %5997 = vmatmul.mubr.f32.vlgmr.msra.gmra.mrb[26].mxu0 %v7891_v3  ;;  %v5963_v53 = vpop.f32.mrb[47].mxu1 }
0x17bf   : > { %6076 = vmatprep.mubr.msk.f32.mxu0 %vm7308_vm0, %v7309_v1  ;;  %6879 = vmatpush3.bf16.msra.mxu0 %v6878_v8  ;;  %v3811_v53 = vld [vmem:[#allocation6 + $0x3e0] sm:$0xff] }
0x17c0   : > { %6880 = vmatprep.subr.bf16.mxu0 %v7307_v0 }
0x17c3   : > { %6882 = vmatpush3.bf16.msra.mxu0 %v6881_v11  ;;  %v3890_v11 = vld [vmem:[#allocation6 + $0x7a0] sm:$0xff] }
0x17c4   : > { %6883 = vmatprep.subr.bf16.mxu0 %v7307_v0  ;;  %v6932_v13 = vpack.c.bf16 %v3891_v12, %v3890_v11  ;;  %v4222_v11 = vld [vmem:[#allocation8 + $0x3b8] sm:$0xff] }
0x17c7   : > { %6885 = vmatpush3.bf16.msra.mxu0 %v6884_v14  ;;  %v3892_v14 = vld [vmem:[#allocation6 + $0x7b0] sm:$0xff] }
0x17c8   : > { %6886 = vmatprep.subr.bf16.mxu0 %v7307_v0  ;;  %v6935_v16 = vpack.c.bf16 %v3893_v15, %v3892_v14  ;;  %v4224_v14 = vld [vmem:[#allocation8 + $0x3c8] sm:$0xff] }
0x17cb   : > { %6888 = vmatpush3.bf16.msra.mxu0 %v6887_v17  ;;  %v3894_v17 = vld [vmem:[#allocation6 + $0x7c0] sm:$0xff] }
0x17cc   : > { %6889 = vmatprep.subr.bf16.mxu0 %v7307_v0  ;;  %v6938_v50 = vpack.c.bf16 %v3895_v18, %v3894_v17  ;;  %v4226_v17 = vld [vmem:[#allocation8 + $0x3d8] sm:$0xff] }
0x17cf   : > { %6891 = vmatpush3.bf16.msra.mxu0 %v6890_v19  ;;  %v3896_v19 = vld [vmem:[#allocation6 + $0x7d0] sm:$0xff] }
0x17d0   : > { %6892 = vmatprep.subr.bf16.mxu0 %v7307_v0  ;;  %v6941_v21 = vpack.c.bf16 %v3897_v20, %v3896_v19  ;;  %v4228_v19 = vld [vmem:[#allocation8 + $0x3e8] sm:$0xff] }
0x17d3   : > { %6894 = vmatpush3.bf16.msra.mxu0 %v6893_v22  ;;  %v3898_v22 = vld [vmem:[#allocation6 + $0x7e0] sm:$0xff] }
0x17d4   : > { %6895 = vmatprep.subr.bf16.mxu0 %v7307_v0  ;;  %v6944_v24 = vpack.c.bf16 %v3899_v23, %v3898_v22  ;;  %v4230_v22 = vld [vmem:[#allocation8 + $0x3f8] sm:$0xff] }
0x17d7   : > { %6897 = vmatpush3.bf16.msra.mxu0 %v6896_v25  ;;  %v3900_v25 = vld [vmem:[#allocation6 + $0x7f0] sm:$0xff] }
0x17d8   : > { %6898 = vmatprep.subr.bf16.mxu0 %v7307_v0  ;;  %v6947_v27 = vpack.c.bf16 %v3901_v26, %v3900_v25 }
0x17db   : > { %6900 = vmatpush3.bf16.msra.mxu0 %v6899_v28  ;;  %v3977_v28 = vld [vmem:[#allocation6 + $0xba0] sm:$0xff] }
0x17dc   : > { %6925 = vmatprep.subr.bf16.mxu0 %v7307_v0 }
0x17dd   : > { %v3549_v59 = vpop.f32.mrb[48].mxu1 }
0x17de   : > { %v6033_v60 = vpop.f32.mrb[49].mxu1 }
0x17df   : > { %v3973_v60 = vld [vmem:[#allocation6 + $0xb80] sm:$0xff] }
0x1871   : > { %v3285_v45 = vpop.f32.mrb[24].mxu0 }
0x1872   : > { %v7921_v54 = vadd.f32 %v3285_v45, %v7863_v58  ;;  %v5928_v55 = vpop.f32.mrb[25].mxu0  ;;  %v3812_v45 = vld [vmem:[#allocation6 + $0x3e8] sm:$0xff] }
0x1873   : > { %v6920_v55 = vpack.c.bf16 %v3812_v45, %v3811_v53 }
0x1891   : > { %v3462_v56 = vpop.f32.mrb[26].mxu0 }
0x1892   : > { %v5998_v57 = vpop.f32.mrb[27].mxu0  ;;  %6035 = vmatpush3.xpose.msra.mxu1 %v3462_v56  ;;  %v3813_v56 = vld [vmem:[#allocation6 + $0x3f0] sm:$0xff] }
0x1893   : > { %6039 = vmatprep.subr.mxu1 %v7309_v1  ;;  %v3814_v57 = vld [vmem:[#allocation6 + $0x3f8] sm:$0xff] }
0x1895   : > { %6037 = vmatmul.mubr.f32.vlgmr.msra.gmra.mrb[50].mxu1 %v3375_v52  ;;  %v6917_v52 = vpack.c.bf16 %v3810_v51, %v3809_v42 }
0x1896   : > { %6041 = vmatprep.mubr.msk.f32.mxu1 %vm7308_vm0, %v7309_v1  ;;  %6040 = vmatpush3.msra.mxu1 %v3549_v59  ;;  %v6923_v59 = vpack.c.bf16 %v3814_v57, %v3813_v56 }
0x1897   : > { %6901 = vmatprep.subr.bf16.mxu1 %v7307_v0 }
0x1968   : > { %v3619_v62 = vpop.f32.mrb[50].mxu1 }
0x1969   : > { %v6038_v9 = vpop.f32.mrb[51].mxu1  ;;  %v3623_v58 = vsel %vm587_vm1, %v3619_v62, -inf }
0x196a   : > { %3624 = vmax.xlane.f32.xlu0 %v3623_v58  ;;  %v3975_v9 = vld [vmem:[#allocation6 + $0xb90] sm:$0xff] }
0x19f7   : > { %v3625_v63 = vpop.xlane.xlu0 %3624 }
0x19f8   : > { %v3626_v2 = vsub.f32 %v3619_v62, %v3625_v63  ;;  %v3974_v62 = vld [vmem:[#allocation6 + $0xb88] sm:$0xff]  ;;  %v3976_v63 = vld [vmem:[#allocation6 + $0xb98] sm:$0xff] }
0x19f9   : > { %v6950_v58 = vpack.c.bf16 %v3974_v62, %v3973_v60 }
0x19fa   : > { %v3627_v61 = vmul.f32 1.442695, %v3626_v2  ;;  %v6953_v2 = vpack.c.bf16 %v3976_v63, %v3975_v9 }
0x19fc   : > { %7103 = vpow2.f32 %v3627_v61  ;;  %v3886_v61 = vld [vmem:[#allocation6 + $0x780] sm:$0xff] }
0x1a06   : > { %v7104_v4 = vpop.eup %7103 }
0x1a07   : > { %v3629_v5 = vsel %vm587_vm1, %v7104_v4, 0.0 }
0x1a08   : > { %3630 = vadd.xlane.f32.xlu1 %v3629_v5 }
0x1a95   : > { %v3631_v29 = vpop.xlane.xlu1 %3630 }
0x1a96   : > { %7105 = vrcp.f32 %v3631_v29  ;;  %v3978_v29 = vld [vmem:[#allocation6 + $0xba8] sm:$0xff] }
0x1aa0   : > { %v7106_v30 = vpop.eup %7105 }
0x1aa1   : > { %v3633_v31 = vmul.f32 %v7106_v30, %v7104_v4  ;;  %v3887_v4 = vld [vmem:[#allocation6 + $0x788] sm:$0xff]  ;;  %v3979_v30 = vld [vmem:[#allocation6 + $0xbb0] sm:$0xff] }
0x1aa2   : > { %v6926_v5 = vpack.c.bf16 %v3887_v4, %v3886_v61  ;;  %v6959_v33 = vpack.c.bf16 %v3980_v32, %v3979_v30  ;;  %v4216_v61 = vld [vmem:[#allocation8 + $0x388] sm:$0xff]  ;;  %v4217_v4 = vld [vmem:[#allocation8 + $0x390] sm:$0xff]  ;;  %v4448_v30 = vld [vmem:[#allocation9] ss:$0 sm:$0xff] }
0x1aa3   : > { %6042 = vmatmul.mubr.msk.f32.vlgmr.msra.gmra.mrb[52].mxu1 %vm587_vm1, %v3633_v31  ;;  %v6956_v31 = vpack.c.bf16 %v3978_v29, %v3977_v28 }
0x1aa4   : > { %6111 = vmatprep.mubr.msk.f32.mxu1 %vm7308_vm0, %v7309_v1  ;;  %6903 = vmatpush3.bf16.msra.mxu1 %v6902_v34  ;;  %v3981_v34 = vld [vmem:[#allocation6 + $0xbc0] sm:$0xff] }
0x1aa5   : > { %6904 = vmatprep.subr.bf16.mxu1 %v7307_v0  ;;  %v6962_v36 = vpack.c.bf16 %v3982_v35, %v3981_v34 }
0x1aa8   : > { %6906 = vmatpush3.bf16.msra.mxu1 %v6905_v37  ;;  %v3983_v37 = vld [vmem:[#allocation6 + $0xbd0] sm:$0xff] }
0x1aa9   : > { %6907 = vmatprep.subr.bf16.mxu1 %v7307_v0  ;;  %v6965_v40 = vpack.c.bf16 %v3984_v39, %v3983_v37 }
0x1aac   : > { %6909 = vmatpush3.bf16.msra.mxu1 %v6908_v41  ;;  %v3985_v41 = vld [vmem:[#allocation6 + $0xbe0] sm:$0xff] }
0x1aad   : > { %6910 = vmatprep.subr.bf16.mxu1 %v7307_v0  ;;  %v6968_v44 = vpack.c.bf16 %v3986_v43, %v3985_v41 }
0x1ab0   : > { %6912 = vmatpush3.bf16.msra.mxu1 %v6911_v46  ;;  %v3987_v46 = vld [vmem:[#allocation6 + $0xbf0] sm:$0xff] }
0x1ab1   : > { %6913 = vmatprep.subr.bf16.mxu1 %v7307_v0  ;;  %v6971_v48 = vpack.c.bf16 %v3988_v47, %v3987_v46 }
0x1ab4   : > { %6915 = vmatpush3.bf16.msra.mxu1 %v6914_v49 }
0x1ab5   : > { %6916 = vmatprep.subr.bf16.mxu1 %v7307_v0 }
0x1ab8   : > { %6918 = vmatpush3.bf16.msra.mxu1 %v6917_v52 }
0x1ab9   : > { %6919 = vmatprep.subr.bf16.mxu1 %v7307_v0 }
0x1abc   : > { %6921 = vmatpush3.bf16.msra.mxu1 %v6920_v55 }
0x1abd   : > { %6922 = vmatprep.subr.bf16.mxu1 %v7307_v0 }
0x1ac0   : > { %6924 = vmatpush3.bf16.msra.mxu1 %v6923_v59 }
0x1ac1   : > { %6949 = vmatprep.subr.bf16.mxu1 %v7307_v0 }
0x1ac3   : > { %6112 = vmatmul.mubr.f32.vlgmr.msra.gmra.mrb[54].mxu1 %v7891_v3 }
0x1ac4   : > { %6951 = vmatpush3.bf16.msra.mxu1 %v6950_v58  ;;  %6181 = vmatprep.mubr.msk.f32.mxu1 %vm7308_vm0, %v7309_v1 }
0x1ac5   : > { %6952 = vmatprep.subr.bf16.mxu1 %v7307_v0 }
0x1ac8   : > { %6954 = vmatpush3.bf16.msra.mxu1 %v6953_v2  ;;  %v4215_v2 = vld [vmem:[#allocation8 + $0x380] sm:$0xff] }
0x1ac9   : > { %6955 = vmatprep.subr.bf16.mxu1 %v7307_v0 }
0x1acc   : > { %6957 = vmatpush3.bf16.msra.mxu1 %v6956_v31 }
0x1acd   : > { %6958 = vmatprep.subr.bf16.mxu1 %v7307_v0 }
0x1ad0   : > { %6960 = vmatpush3.bf16.msra.mxu1 %v6959_v33 }
0x1ad1   : > { %6961 = vmatprep.subr.bf16.mxu1 %v7307_v0 }
0x1ad4   : > { %6963 = vmatpush3.bf16.msra.mxu1 %v6962_v36 }
0x1ad5   : > { %6964 = vmatprep.subr.bf16.mxu1 %v7307_v0 }
0x1ad8   : > { %6966 = vmatpush3.bf16.msra.mxu1 %v6965_v40 }
0x1ad9   : > { %6967 = vmatprep.subr.bf16.mxu1 %v7307_v0 }
0x1adc   : > { %6969 = vmatpush3.bf16.msra.mxu1 %v6968_v44 }
0x1add   : > { %6970 = vmatprep.subr.bf16.mxu1 %v7307_v0 }
0x1ae0   : > { %6972 = vmatpush3.bf16.msra.mxu1 %v6971_v48 }
0x1ae1   : > { %6184 = vmatprep.subr.mxu1 %v7309_v1 }
0x1ae3   : > { %6182 = vmatmul.mubr.f32.vlgmr.msra.gmra.mrb[56].mxu1 %v7891_v3 }
0x1ae4   : > { %6186 = vmatprep.mubr.msk.f32.mxu1 %vm7308_vm0, %v7309_v1 }
0x1b76   : > { %v3703_v7 = vpop.f32.mrb[52].mxu1 }
0x1b77   : > { %v6043_v8 = vpop.f32.mrb[53].mxu1  ;;  %6077 = vmatmul.mubr.f32.vlgmr.msra.gmra.mrb[28].mxu0 %v3703_v7  ;;  %v4220_v7 = vld [vmem:[#allocation8 + $0x3a8] sm:$0xff] }
0x1b78   : > { %6927 = vmatpush3.bf16.msra.mxu0 %v6926_v5  ;;  %6146 = vmatprep.mubr.msk.f32.mxu0 %vm7308_vm0, %v7309_v1  ;;  %v4218_v5 = vld [vmem:[#allocation8 + $0x398] sm:$0xff]  ;;  %v6980_v8 = vpack.c.bf16 %v4220_v7, %v4219_v38 }
0x1b79   : > { %6928 = vmatprep.subr.bf16.mxu0 %v7307_v0  ;;  %v6977_v6 = vpack.c.bf16 %v4218_v5, %v4217_v4 }
0x1b7c   : > { %6930 = vmatpush3.bf16.msra.mxu0 %v6929_v10  ;;  %v4221_v10 = vld [vmem:[#allocation8 + $0x3b0] sm:$0xff] }
0x1b7d   : > { %6931 = vmatprep.subr.bf16.mxu0 %v7307_v0  ;;  %v6983_v12 = vpack.c.bf16 %v4222_v11, %v4221_v10 }
0x1b80   : > { %6933 = vmatpush3.bf16.msra.mxu0 %v6932_v13  ;;  %v4223_v13 = vld [vmem:[#allocation8 + $0x3c0] sm:$0xff] }
0x1b81   : > { %6934 = vmatprep.subr.bf16.mxu0 %v7307_v0  ;;  %v6986_v15 = vpack.c.bf16 %v4224_v14, %v4223_v13 }
0x1b84   : > { %6936 = vmatpush3.bf16.msra.mxu0 %v6935_v16  ;;  %v4225_v16 = vld [vmem:[#allocation8 + $0x3d0] sm:$0xff] }
0x1b85   : > { %6937 = vmatprep.subr.bf16.mxu0 %v7307_v0  ;;  %v6989_v18 = vpack.c.bf16 %v4226_v17, %v4225_v16 }
0x1b88   : > { %6939 = vmatpush3.bf16.msra.mxu0 %v6938_v50  ;;  %v4227_v50 = vld [vmem:[#allocation8 + $0x3e0] sm:$0xff] }
0x1b89   : > { %6940 = vmatprep.subr.bf16.mxu0 %v7307_v0  ;;  %v6992_v20 = vpack.c.bf16 %v4228_v19, %v4227_v50 }
0x1b8c   : > { %6942 = vmatpush3.bf16.msra.mxu0 %v6941_v21  ;;  %v4229_v21 = vld [vmem:[#allocation8 + $0x3f0] sm:$0xff] }
0x1b8d   : > { %6943 = vmatprep.subr.bf16.mxu0 %v7307_v0  ;;  %v6995_v23 = vpack.c.bf16 %v4230_v22, %v4229_v21 }
0x1b90   : > { %6945 = vmatpush3.bf16.msra.mxu0 %v6944_v24 }
0x1b91   : > { %6946 = vmatprep.subr.bf16.mxu0 %v7307_v0 }
0x1b94   : > { %6948 = vmatpush3.bf16.msra.mxu0 %v6947_v27 }
0x1b95   : > { %6973 = vmatprep.subr.bf16.mxu0 %v7307_v0 }
0x1b96   : > { %v3881_v49 = vpop.f32.mrb[54].mxu1 }
0x1b97   : > { %6147 = vmatmul.mubr.f32.vlgmr.msra.gmra.mrb[30].mxu0 %v7891_v3  ;;  %v6113_v42 = vpop.f32.mrb[55].mxu1 }
0x1b98   : > { %6226 = vmatprep.mubr.msk.f32.mxu0 %vm7308_vm0, %v7309_v1 }
0x1bb6   : > { %v4055_v3 = vpop.f32.mrb[56].mxu1 }
0x1bb7   : > { %v6183_v56 = vpop.f32.mrb[57].mxu1 }
0x1c4a   : > { %v3791_v51 = vpop.f32.mrb[28].mxu0 }
0x1c4b   : > { %v7976_v52 = vadd.f32 %v3791_v51, %v7921_v54  ;;  %v6078_v53 = vpop.f32.mrb[29].mxu0 }
0x1c6a   : > { %v3968_v45 = vpop.f32.mrb[30].mxu0 }
0x1c6b   : > { %v6148_v55 = vpop.f32.mrb[31].mxu0  ;;  %6185 = vmatpush3.xpose.msra.mxu1 %v3968_v45 }
0x1c6c   : > { %6189 = vmatprep.subr.mxu1 %v7309_v1 }
0x1c6e   : > { %6187 = vmatmul.mubr.f32.vlgmr.msra.gmra.mrb[58].mxu1 %v3881_v49 }
0x1c6f   : > { %6191 = vmatprep.mubr.msk.f32.mxu1 %vm7308_vm0, %v7309_v1  ;;  %6190 = vmatpush3.msra.mxu1 %v4055_v3  ;;  %v6974_v1 = vpack.c.bf16 %v4216_v61, %v4215_v2 }
0x1c71   : > { %6975 = vmatpush3.bf16.msra.mxu0 %v6974_v1 }
0x1c72   : > { %6976 = vmatprep.subr.bf16.mxu0 %v7307_v0 }
0x1c75   : > { %6978 = vmatpush3.bf16.msra.mxu0 %v6977_v6 }
0x1c76   : > { %6979 = vmatprep.subr.bf16.mxu0 %v7307_v0 }
0x1c79   : > { %6981 = vmatpush3.bf16.msra.mxu0 %v6980_v8 }
0x1c7a   : > { %6982 = vmatprep.subr.bf16.mxu0 %v7307_v0 }
0x1c7d   : > { %6984 = vmatpush3.bf16.msra.mxu0 %v6983_v12 }
0x1c7e   : > { %6985 = vmatprep.subr.bf16.mxu0 %v7307_v0 }
0x1c81   : > { %6987 = vmatpush3.bf16.msra.mxu0 %v6986_v15 }
0x1c82   : > { %6988 = vmatprep.subr.bf16.mxu0 %v7307_v0 }
0x1c85   : > { %6990 = vmatpush3.bf16.msra.mxu0 %v6989_v18 }
0x1c86   : > { %6991 = vmatprep.subr.bf16.mxu0 %v7307_v0 }
0x1c89   : > { %6993 = vmatpush3.bf16.msra.mxu0 %v6992_v20 }
0x1c8a   : > { %6994 = vmatprep.subr.bf16.mxu0 %v7307_v0 }
0x1c8d   : > { %6996 = vmatpush3.bf16.msra.mxu0 %v6995_v23 }
0x1d41   : > { %v4125_v57 = vpop.f32.mrb[58].mxu1 }
0x1d42   : > { %v6188_v59 = vpop.f32.mrb[59].mxu1  ;;  %v4129_v60 = vsel %vm587_vm1, %v4125_v57, -inf }
0x1d43   : > { %4130 = vmax.xlane.f32.xlu0 %v4129_v60 }
0x1dd0   : > { %v4131_v54 = vpop.xlane.xlu0 %4130 }
0x1dd1   : > { %v4132_v62 = vsub.f32 %v4125_v57, %v4131_v54 }
0x1dd3   : > { %v4133_v9 = vmul.f32 1.442695, %v4132_v62 }
0x1dd5   : > { %7107 = vpow2.f32 %v4133_v9 }
0x1ddf   : > { %v7108_v58 = vpop.eup %7107 }
0x1de0   : > { %v4135_v63 = vsel %vm587_vm1, %v7108_v58, 0.0 }
0x1de1   : > { %4136 = vadd.xlane.f32.xlu1 %v4135_v63 }
0x1e6e   : > { %v4137_v24 = vpop.xlane.xlu1 %4136 }
0x1e6f   : > { %7109 = vrcp.f32 %v4137_v24 }
0x1e79   : > { %v7110_v25 = vpop.eup %7109 }
0x1e7a   : > { %v4139_v26 = vmul.f32 %v7110_v25, %v7108_v58 }
0x1e7c   : > { %6192 = vmatmul.mubr.msk.f32.vlgmr.msra.gmra.mrb[60].mxu1 %vm587_vm1, %v4139_v26 }
0x1f4f   : > { %v4209_v27 = vpop.f32.mrb[60].mxu1 }
0x1f50   : > { %v6193_v28 = vpop.f32.mrb[61].mxu1  ;;  %6227 = vmatmul.mubr.f32.vlgmr.msra.gmra.mrb[32].mxu0 %v4209_v27 }
0x2023   : > { %v4297_v29 = vpop.f32.mrb[32].mxu0 }
0x2024   : > { %v4301_v0 = vadd.f32 %v4297_v29, %v7976_v52  ;;  %v6228_v31 = vpop.f32.mrb[33].mxu0 }
0x2026   : > { %v4311_v32 = vadd.f32 %v4448_v30, %v4301_v0 }
0x2028   : > { %4312 = vst [vmem:[%s254_s23] sm:$0xff] %v4311_v32 }
0x2029   : > { %7238 = shalt.err (!%p7235_p4)
}
0x202a   : > { %s7239_s30 = scalar_lea.hbm %s7998_s9, 128  ;;  %s7243_s6 = scalar_lea.hbm %s8046_s4, 256 }
0x202b   : > { %p7240_p0 = scmp.ne.s32.totalorder %s7998_s9, %s7239_s30  ;;  %p7244_p8 = scmp.lt.u32.totalorder %s7998_s9, %s8046_s4 }
0x202c   : > { %p7245_p13 = scmp.lt.u32.totalorder %s7243_s6, %s7239_s30  ;;  %p7247_p10 = scmp.lt.u32.totalorder %s7239_s30, %s7998_s9 }
0x202d   : > { %p7241_p9 = pnand %p7240_p0, %p7481_p5 }
0x202e   : > { %p7246_p6 = por %p7245_p13, %p7244_p8 }
0x202f   : > { %p7242_p11 = pneg %p7241_p9 }
0x2030   : > { %p7248_p3 = por %p7247_p10, %p7246_p6 }
0x2032   : > { %p7249_p7 = pnand %p7248_p3, %p7242_p11 }
0x2034   : > { %7252 = shalt.err (!%p7249_p7)
}
0x2035   : > { %7011 = dma.vmem_to_hbm [thread:$0]  (%p7481_p5), %s8000_s5, 128, %s7998_s9, %s4314_s11  }
0x2036 PF: > { %s4339_s20 = sand.u32 1, %s7287_s15   ;;  %p8064_p12 = scmp.ne.s32.totalorder %s8051_s22, 0 }
0x2037   : > { %p8065_p2 = scmp.ge.s32.totalorder %s7299_s18, 2  ;;  %s4340_s21 = scalar_lea.sflag [#allocation5], %s4339_s20 }
0x2039   : > { %p7028_p1 = pnand %p8065_p2, %p8064_p12 }
0x203b   : > { %7282 = dma.done.wait (!%p7028_p1), %s4340_s21, 128  }
0x203c   : > { %7284 = vsyncadd (!%p7028_p1), %s4340_s21, 4294967168  ;;  %p19_p4 = scmp.ge.s32.totalorder %s7467_s10, 4   ;;  %s8066_s15 = smov %s7291_s16 }
0x203d   : > { %s8067_s16 = smov %s7295_s17  ;;  %s8068_s17 = smov %s7477_s25 }
0x203e   : > { %s8069_s18 = smov %s7467_s10  ;;  %21 = sbr.rel (!%p19_p4) target bundleno = 7 (0x7), region = 123 }
0x2045   :  { %4345 = vsyncpa [#allocation4], 1 }
0x2046   :  { %4347 = vsyncpa [#allocation4 + $0x1], 1 }
0x2047   :  { %4348 = vsyncpa [#allocation7], 1 }
0x2048   :  { %4349 = vsyncpa [#allocation10], 1 }
0x2049   :  { %4350 = vsyncpa [#allocation5], 1 }
0x204a   :  { %4352 = vsyncpa [#allocation5 + $0x1], 1 }

</bundles_post_ra>
